<compile_context>
chip_gen: v7x
topology: tpu7x:2x2x1
jax: 0.10.0
libtpu: 0.0.40
codegen_flags: <defaults>
</compile_context>

<pallas_src>
import functools

import jax
import jax.numpy as jnp
from jax import lax
from jax.experimental import pallas as pl
from jax.experimental.pallas import tpu as pltpu

EPS = 1e-5  # PyTorch InstanceNorm1d default eps (affine=False -> no params)


def _inorm_relu(h, inv_n):
    """InstanceNorm1d (biased var, no affine) + ReLU over axis 1 of (Bt, N, C).

    Two-pass (centered) statistics in f32 for robustness to non-centered data.
    """
    mean = jnp.sum(h, axis=1, keepdims=True) * inv_n
    d = h - mean
    var = jnp.sum(d * d, axis=1, keepdims=True) * inv_n
    return jnp.maximum(d * lax.rsqrt(var + EPS), 0.0)


def stn_conv_kernel(x_ref, w1_ref, w2_ref, w3_ref, g_ref, *, chunk_n):
    """conv1/2/3 + InstanceNorm + ReLU + max-pool over points -> (Bt, 1, 1024)."""
    bt, n, k = x_ref.shape
    c1 = w1_ref.shape[1]
    c2 = w2_ref.shape[1]
    c3 = w3_ref.shape[1]
    cdt = w1_ref.dtype          # matmul-input dtype (f32 or bf16); stats stay f32
    inv_n = 1.0 / n

    # conv1 -> InstanceNorm -> ReLU  (conv bias dropped: cancelled by the norm)
    x = x_ref[...].reshape(bt * n, k)
    h = jnp.dot(x, w1_ref[...], preferred_element_type=jnp.float32)
    h = _inorm_relu(h.reshape(bt, n, c1), inv_n).astype(cdt)

    # conv2 -> InstanceNorm -> ReLU.  Keep only ONE live copy (cdt) of the
    # (bt, n, c2) activation into the conv3 loop; take its f32 column sum
    # (needed for the conv3 mean via linearity) before the cast.
    h = jnp.dot(h.reshape(bt * n, c1), w2_ref[...],
                preferred_element_type=jnp.float32)
    h = _inorm_relu(h.reshape(bt, n, c2), inv_n)          # f32
    colsum = jnp.sum(h, axis=1)                           # (bt, c2) f32
    h = h.astype(cdt)                                     # single live copy

    # conv3 streamed over point chunks.  Per-channel statistics go to the MXU:
    #   mean  = (colsum @ w3) / n                          (linearity, exact)
    #   E[x2] = diag(w3^T (h^T h) w3) / n                  (per-batch Gram)
    # Only the running max of the RAW conv3 output stays in the chunk epilogue;
    # relu((t - mean) * rsqrt(var)) is monotone in t, so max-pool commutes with
    # the norm + ReLU, which are applied once to the (bt, c3) max vector.
    w3 = w3_ref[...]
    w3f = w3.astype(jnp.float32)
    mx = jnp.full((bt, c3), -jnp.inf, jnp.float32)
    gram = jnp.zeros((bt, c2, c2), jnp.float32)
    n_chunks = n // chunk_n                               # N % chunk_n == 0 (host-enforced)
    for ci in range(n_chunks):
        hc = h[:, ci * chunk_n:(ci + 1) * chunk_n, :]     # (bt, chunk_n, c2)
        h3 = jnp.dot(hc.reshape(bt * chunk_n, c2), w3,
                     preferred_element_type=jnp.float32)
        mx = jnp.maximum(mx, jnp.max(h3.reshape(bt, chunk_n, c3), axis=1))
        gram = gram + jnp.einsum("bni,bnj->bij", hc, hc,
                                 preferred_element_type=jnp.float32)

    mean = jnp.dot(colsum, w3f, preferred_element_type=jnp.float32) * inv_n
    t = jnp.dot(gram.reshape(bt * c2, c2), w3f,
                preferred_element_type=jnp.float32).reshape(bt, c2, c3)
    sumsq = jnp.sum(t * w3f[None, :, :], axis=1)          # (bt, c3)
    var = jnp.maximum(sumsq * inv_n - mean * mean, 0.0)
    g = jnp.maximum((mx - mean) * lax.rsqrt(var + EPS), 0.0)
    g_ref[...] = g.reshape(bt, 1, c3).astype(g_ref.dtype)


def stn_fc_kernel(g_ref, wf1_ref, bf1_ref, wf2_ref, bf2_ref, wf3_ref, bf3_ref,
                  o_ref):
    """Batched FC head: (B,1024)->(B,512)->(B,256)->(B,k*k).

    Matmul inputs in the (possibly bf16) matmul dtype; bias adds and MXU
    accumulation in f32.  The flattened identity is folded into bf3 host-side.
    """
    cdt = wf1_ref.dtype
    f = jnp.dot(g_ref[...], wf1_ref[...], preferred_element_type=jnp.float32)
    f = jnp.maximum(f + bf1_ref[...], 0.0).astype(cdt)
    f = jnp.dot(f, wf2_ref[...], preferred_element_type=jnp.float32)
    f = jnp.maximum(f + bf2_ref[...], 0.0).astype(cdt)
    f = jnp.dot(f, wf3_ref[...], preferred_element_type=jnp.float32)
    o_ref[...] = (f + bf3_ref[...]).astype(o_ref.dtype)


def _pick_chunk(n, want):
    """Largest divisor of n that is <= want, preferring multiples of 8."""
    want = max(1, min(int(want), int(n)))
    fallback = 0
    for c in range(want, 0, -1):
        if n % c == 0:
            if c % 8 == 0:
                return c
            if fallback == 0:
                fallback = c
    return fallback if fallback else n


def _vmem_budget_bytes():
    """~75% of per-core VMEM capacity (generation-aware, safe fallback)."""
    cap = 64 << 20
    try:
        info_cap = int(pltpu.get_tpu_info().vmem_capacity_bytes)
        if info_cap > 0:
            cap = info_cap
    except Exception:
        pass
    return max(16 << 20, (cap * 3) // 4)


def stn_forward(x, params, k, *, batch_tile=None, chunk_n=256,
                matmul_dtype=jnp.float32):
    """x: (B, N, k) float32 (module transposes NCL internally). Returns (B, k, k)."""
    B, N, k_in = x.shape
    assert k_in == k
    (w1, b1, w2, b2, w3, b3, wf1, bf1, wf2, bf2, wf3, bf3) = params
    # conv biases are mathematically dead under InstanceNorm1d(affine=False):
    # mean subtraction removes any per-channel constant exactly.
    del b1, b2, b3

    c1, c2, c3 = w1.shape[1], w2.shape[1], w3.shape[1]
    isz = jnp.dtype(matmul_dtype).itemsize

    # Batch tile: guarantee >= 2 grid steps (v7x shards the "parallel" batch
    # axis across its 2 TensorCores) unless the caller forces a tile.
    if batch_tile is None:
        bt = next(d for d in (8, 4, 2, 1) if B % d == 0)
        bt = min(bt, max(1, B // 2))
        while B % bt:
            bt -= 1
    else:
        bt = int(batch_tile)
    assert B % bt == 0

    # chunk_n: divisor of N (no ragged tail), multiple of 8 when possible.
    chunk_n = _pick_chunk(N, chunk_n)

    # Generation-aware VMEM budget; shrink chunk_n then bt instead of clamping.
    budget = _vmem_budget_bytes()

    def est(bt_, cn_):
        return int(
            2 * bt_ * N * k * isz                          # x tile (double-buffered)
            + 2 * (k * c1 + c1 * c2 + c2 * c3) * isz       # weights (double-buffered)
            + c2 * c3 * 4                                  # f32 copy of w3 (stats)
            + 2 * bt_ * N * c1 * 4                         # conv1 raw + centered
            + bt_ * N * c2 * 4 + bt_ * N * c2 * isz        # conv2 f32 pass + cdt copy
            + bt_ * cn_ * c3 * 4                           # conv3 chunk
            + bt_ * c2 * c2 * 4 + bt_ * c2 * c3 * 4        # Gram + Gram@w3
            + 6 * bt_ * c3 * 4)                            # mx/mean/var/g tiles

    e = est(bt, chunk_n)
    while 3 * e // 2 > budget:
        new_chunk = _pick_chunk(N, chunk_n // 2) if chunk_n > 1 else chunk_n
        if new_chunk < chunk_n:
            chunk_n = new_chunk
        elif bt > 1:
            bt = next(d for d in range(bt // 2, 0, -1) if B % d == 0)
        else:
            break
        e = est(bt, chunk_n)
    vmem_bytes = max(int(min(max(3 * e // 2, 32 << 20), budget)), 4 << 20)

    # bf16 (or f32) matmul inputs, cast host-side so the DMAs shrink too.
    xc = x.astype(matmul_dtype)
    w1c = w1.astype(matmul_dtype)
    w2c = w2.astype(matmul_dtype)
    w3c = w3.astype(matmul_dtype)

    # ---- Kernel 1: conv stack + pooled feature g: (B, 1, 1024) ----
    g = pl.pallas_call(
        functools.partial(stn_conv_kernel, chunk_n=chunk_n),
        out_shape=jax.ShapeDtypeStruct((B, 1, c3), matmul_dtype),
        grid_spec=pltpu.PrefetchScalarGridSpec(
            num_scalar_prefetch=0,
            grid=(B // bt,),
            in_specs=[
                pl.BlockSpec((bt, N, k), lambda b: (b, 0, 0)),
                pl.BlockSpec(w1c.shape, lambda b: (0, 0)),
                pl.BlockSpec(w2c.shape, lambda b: (0, 0)),
                pl.BlockSpec(w3c.shape, lambda b: (0, 0)),
            ],
            out_specs=pl.BlockSpec((bt, 1, c3), lambda b: (b, 0, 0)),
        ),
        compiler_params=pltpu.CompilerParams(
            dimension_semantics=("parallel",),   # batch elements independent
            vmem_limit_bytes=vmem_bytes,
        ),
    )(xc, w1c, w2c, w3c)
    g = g.reshape(B, c3)

    # FC weights in the matmul dtype too (halves the wf1/wf2 DMA for bf16).
    wf1c = wf1.astype(matmul_dtype)
    wf2c = wf2.astype(matmul_dtype)
    wf3c = wf3.astype(matmul_dtype)
    # Fold the flattened identity (compile-time constant) into the fc3 bias.
    bf3_folded = bf3 + jnp.eye(k, dtype=jnp.float32).reshape(1, k * k)

    # ---- Kernel 2: batched FC head over the whole batch ----
    out = pl.pallas_call(
        stn_fc_kernel,
        out_shape=jax.ShapeDtypeStruct((B, k * k), jnp.float32),
        grid_spec=pltpu.PrefetchScalarGridSpec(
            num_scalar_prefetch=0,
            grid=(1,),
            in_specs=[
                pl.BlockSpec((B, c3), lambda i: (0, 0)),
                pl.BlockSpec(wf1c.shape, lambda i: (0, 0)),
                pl.BlockSpec(bf1.shape, lambda i: (0, 0)),
                pl.BlockSpec(wf2c.shape, lambda i: (0, 0)),
                pl.BlockSpec(bf2.shape, lambda i: (0, 0)),
                pl.BlockSpec(wf3c.shape, lambda i: (0, 0)),
                pl.BlockSpec(bf3_folded.shape, lambda i: (0, 0)),
            ],
            out_specs=pl.BlockSpec((B, k * k), lambda i: (0, 0)),
        ),
        compiler_params=pltpu.CompilerParams(
            dimension_semantics=("arbitrary",)),
    )(g, wf1c, bf1, wf2c, bf2, wf3c, bf3_folded)

    return out.reshape(B, k, k)


def init_params(key, k):
    """Deterministic synthetic weights. Conv/FC weights stored as (Cin, Cout)."""
    ks = jax.random.split(key, 12)
    def w(key, cin, cout):
        return jax.random.normal(key, (cin, cout), jnp.float32) / jnp.sqrt(cin)
    def b(key, cout):
        return jax.random.normal(key, (1, cout), jnp.float32) * 0.01
    return (
        w(ks[0], k, 64),     b(ks[1], 64),
        w(ks[2], 64, 128),   b(ks[3], 128),
        w(ks[4], 128, 1024), b(ks[5], 1024),
        w(ks[6], 1024, 512), b(ks[7], 512),
        w(ks[8], 512, 256),  b(ks[9], 256),
        w(ks[10], 256, k * k), b(ks[11], k * k),
    )


def stn_reference(x, params, k):
    """Pure-JAX reference of the PyTorch forward (for sanity check)."""
    (w1, b1, w2, b2, w3, b3, wf1, bf1, wf2, bf2, wf3, bf3) = params

    def inorm(h):  # h: (B, N, C), normalize over N (biased var, no affine)
        m = jnp.mean(h, axis=1, keepdims=True)
        v = jnp.mean((h - m) ** 2, axis=1, keepdims=True)
        return (h - m) / jnp.sqrt(v + EPS)

    h = jax.nn.relu(inorm(jnp.einsum("bnk,kc->bnc", x, w1) + b1))
    h = jax.nn.relu(inorm(jnp.einsum("bnk,kc->bnc", h, w2) + b2))
    h = jax.nn.relu(inorm(jnp.einsum("bnk,kc->bnc", h, w3) + b3))
    g = jnp.max(h, axis=1)                       # (B, 1024)
    f = jax.nn.relu(g @ wf1 + bf1)
    f = jax.nn.relu(f @ wf2 + bf2)
    f = f @ wf3 + bf3
    f = f + jnp.eye(k, dtype=jnp.float32).reshape(1, k * k)
    return f.reshape(-1, k, k)


if __name__ == "__main__":
    B, N, K = 4, 64, 16  # small synthetic shapes; K plays the role of k=64
    key = jax.random.PRNGKey(0)
    kx, kp = jax.random.split(key)
    x = jax.random.normal(kx, (B, N, K), jnp.float32)
    params = init_params(kp, K)

    ref = stn_reference(x, params, K)

    # f32 matmul path: batch_tile=2 -> grid of 2 steps, chunk_n=32 -> 2 chunks.
    out = stn_forward(x, params, K, batch_tile=2, chunk_n=32)
    out = jax.block_until_ready(out)
    assert out.shape == (B, K, K)
    if not jnp.allclose(out, ref, rtol=2e-2, atol=2e-2):
        raise AssertionError("Pallas STN (f32) output mismatch vs JAX reference")

    # bf16 matmul-input path (recommended on v5e/v6e/v7x); looser tolerance
    # since matmul inputs are quantized to bf16 (accumulation stays f32).
    out_bf16 = stn_forward(x, params, K, batch_tile=2, chunk_n=32,
                           matmul_dtype=jnp.bfloat16)
    out_bf16 = jax.block_until_ready(out_bf16)
    if not jnp.allclose(out_bf16, ref, rtol=2e-1, atol=2e-1):
        raise AssertionError("Pallas STN (bf16) output mismatch vs JAX reference")

    print("KERNEL_OK")
</pallas_src>

<mosaic_0001>
module attributes {stable_mosaic.version = 11 : i64} {
  func.func @stn_conv_kernel(%arg0: i32, %arg1: memref<2x64x16xf32, #tpu.memory_space<vmem>>, %arg2: memref<16x64xf32, #tpu.memory_space<vmem>>, %arg3: memref<64x128xf32, #tpu.memory_space<vmem>>, %arg4: memref<128x1024xf32, #tpu.memory_space<vmem>>, %arg5: memref<2x1x1024xf32, #tpu.memory_space<vmem>>) attributes {dimension_semantics = [#tpu.dimension_semantics<parallel>], iteration_bounds = array<i64: 2>, scalar_prefetch = 0 : i64, scratch_operands = 0 : i64, tpu.core_type = #tpu.core_type<tc>, window_params = [{transform_indices = @transform_0, window_bounds = array<i64: 2, 64, 16>}, {pipeline_mode = #tpu.pipeline_mode<synchronous>, transform_indices = @transform_1, window_bounds = array<i64: 16, 64>}, {pipeline_mode = #tpu.pipeline_mode<synchronous>, transform_indices = @transform_2, window_bounds = array<i64: 64, 128>}, {pipeline_mode = #tpu.pipeline_mode<synchronous>, transform_indices = @transform_3, window_bounds = array<i64: 128, 1024>}, {transform_indices = @transform_4, window_bounds = array<i64: 2, 1, 1024>}]} {
    %c0 = arith.constant 0 : index
    %c0_0 = arith.constant 0 : index
    %c0_1 = arith.constant 0 : index
    %0 = vector.load %arg1[%c0, %c0_0, %c0_1] : memref<2x64x16xf32, #tpu.memory_space<vmem>>, vector<2x64x16xf32>
    %1 = vector.shape_cast %0 : vector<2x64x16xf32> to vector<128x16xf32>
    %c0_2 = arith.constant 0 : index
    %c0_3 = arith.constant 0 : index
    %2 = vector.load %arg2[%c0_2, %c0_3] : memref<16x64xf32, #tpu.memory_space<vmem>>, vector<16x64xf32>
    %cst = arith.constant dense<0.000000e+00> : vector<128x64xf32>
    %3 = tpu.matmul %1, %2, %cst {dimension_numbers = #tpu.dot_dimension_numbers<[1], [0], [0], [1], [0, 0, 1, 1], [], []>} : vector<128x16xf32>, vector<16x64xf32>, vector<128x64xf32> -> vector<128x64xf32>
    %4 = vector.shape_cast %3 : vector<128x64xf32> to vector<2x64x64xf32>
    %cst_4 = arith.constant dense<0.000000e+00> : vector<2x64xf32>
    %5 = vector.multi_reduction <add>, %4, %cst_4 [1] : vector<2x64x64xf32> to vector<2x64xf32>
    %6 = vector.shape_cast %5 : vector<2x64xf32> to vector<2x1x64xf32>
    %cst_5 = arith.constant 1.562500e-02 : f32
    %7 = vector.broadcast %cst_5 : f32 to vector<2x1x64xf32>
    %8 = arith.mulf %6, %7 : vector<2x1x64xf32>
    %9 = vector.broadcast %8 : vector<2x1x64xf32> to vector<2x64x64xf32>
    %10 = arith.subf %4, %9 : vector<2x64x64xf32>
    %11 = arith.mulf %10, %10 : vector<2x64x64xf32>
    %cst_6 = arith.constant dense<0.000000e+00> : vector<2x64xf32>
    %12 = vector.multi_reduction <add>, %11, %cst_6 [1] : vector<2x64x64xf32> to vector<2x64xf32>
    %13 = vector.shape_cast %12 : vector<2x64xf32> to vector<2x1x64xf32>
    %cst_7 = arith.constant 1.562500e-02 : f32
    %14 = vector.broadcast %cst_7 : f32 to vector<2x1x64xf32>
    %15 = arith.mulf %13, %14 : vector<2x1x64xf32>
    %cst_8 = arith.constant 9.99999974E-6 : f32
    %16 = vector.broadcast %cst_8 : f32 to vector<2x1x64xf32>
    %17 = arith.addf %15, %16 : vector<2x1x64xf32>
    %18 = math.rsqrt %17 : vector<2x1x64xf32>
    %19 = vector.broadcast %18 : vector<2x1x64xf32> to vector<2x64x64xf32>
    %20 = arith.mulf %10, %19 : vector<2x64x64xf32>
    %cst_9 = arith.constant 0.000000e+00 : f32
    %21 = vector.broadcast %cst_9 : f32 to vector<2x64x64xf32>
    %22 = arith.maximumf %20, %21 : vector<2x64x64xf32>
    %23 = vector.shape_cast %22 : vector<2x64x64xf32> to vector<128x64xf32>
    %c0_10 = arith.constant 0 : index
    %c0_11 = arith.constant 0 : index
    %24 = vector.load %arg3[%c0_10, %c0_11] : memref<64x128xf32, #tpu.memory_space<vmem>>, vector<64x128xf32>
    %cst_12 = arith.constant dense<0.000000e+00> : vector<128x128xf32>
    %25 = tpu.matmul %23, %24, %cst_12 {dimension_numbers = #tpu.dot_dimension_numbers<[1], [0], [0], [1], [0, 0, 1, 1], [], []>} : vector<128x64xf32>, vector<64x128xf32>, vector<128x128xf32> -> vector<128x128xf32>
    %26 = vector.shape_cast %25 : vector<128x128xf32> to vector<2x64x128xf32>
    %cst_13 = arith.constant dense<0.000000e+00> : vector<2x128xf32>
    %27 = vector.multi_reduction <add>, %26, %cst_13 [1] : vector<2x64x128xf32> to vector<2x128xf32>
    %28 = vector.shape_cast %27 : vector<2x128xf32> to vector<2x1x128xf32>
    %cst_14 = arith.constant 1.562500e-02 : f32
    %29 = vector.broadcast %cst_14 : f32 to vector<2x1x128xf32>
    %30 = arith.mulf %28, %29 : vector<2x1x128xf32>
    %31 = vector.broadcast %30 : vector<2x1x128xf32> to vector<2x64x128xf32>
    %32 = arith.subf %26, %31 : vector<2x64x128xf32>
    %33 = arith.mulf %32, %32 : vector<2x64x128xf32>
    %cst_15 = arith.constant dense<0.000000e+00> : vector<2x128xf32>
    %34 = vector.multi_reduction <add>, %33, %cst_15 [1] : vector<2x64x128xf32> to vector<2x128xf32>
    %35 = vector.shape_cast %34 : vector<2x128xf32> to vector<2x1x128xf32>
    %cst_16 = arith.constant 1.562500e-02 : f32
    %36 = vector.broadcast %cst_16 : f32 to vector<2x1x128xf32>
    %37 = arith.mulf %35, %36 : vector<2x1x128xf32>
    %cst_17 = arith.constant 9.99999974E-6 : f32
    %38 = vector.broadcast %cst_17 : f32 to vector<2x1x128xf32>
    %39 = arith.addf %37, %38 : vector<2x1x128xf32>
    %40 = math.rsqrt %39 : vector<2x1x128xf32>
    %41 = vector.broadcast %40 : vector<2x1x128xf32> to vector<2x64x128xf32>
    %42 = arith.mulf %32, %41 : vector<2x64x128xf32>
    %cst_18 = arith.constant 0.000000e+00 : f32
    %43 = vector.broadcast %cst_18 : f32 to vector<2x64x128xf32>
    %44 = arith.maximumf %42, %43 : vector<2x64x128xf32>
    %cst_19 = arith.constant dense<0.000000e+00> : vector<2x128xf32>
    %45 = vector.multi_reduction <add>, %44, %cst_19 [1] : vector<2x64x128xf32> to vector<2x128xf32>
    %c0_20 = arith.constant 0 : index
    %c0_21 = arith.constant 0 : index
    %46 = vector.load %arg4[%c0_20, %c0_21] : memref<128x1024xf32, #tpu.memory_space<vmem>>, vector<128x1024xf32>
    %cst_22 = arith.constant 0xFF800000 : f32
    %47 = vector.broadcast %cst_22 : f32 to vector<2x1024xf32>
    %cst_23 = arith.constant 0.000000e+00 : f32
    %48 = vector.broadcast %cst_23 : f32 to vector<2x128x128xf32>
    %49 = vector.extract_strided_slice %44 {offsets = [0, 0, 0], sizes = [2, 32, 128], strides = [1, 1, 1]} : vector<2x64x128xf32> to vector<2x32x128xf32>
    %50 = vector.shape_cast %49 : vector<2x32x128xf32> to vector<64x128xf32>
    %cst_24 = arith.constant dense<0.000000e+00> : vector<64x1024xf32>
    %51 = tpu.matmul %50, %46, %cst_24 {dimension_numbers = #tpu.dot_dimension_numbers<[1], [0], [0], [1], [0, 0, 1, 1], [], []>} : vector<64x128xf32>, vector<128x1024xf32>, vector<64x1024xf32> -> vector<64x1024xf32>
    %52 = vector.shape_cast %51 : vector<64x1024xf32> to vector<2x32x1024xf32>
    %cst_25 = arith.constant dense<0xFF800000> : vector<2x1024xf32>
    %53 = vector.multi_reduction <maximumf>, %52, %cst_25 [1] : vector<2x32x1024xf32> to vector<2x1024xf32>
    %54 = arith.maximumf %47, %53 : vector<2x1024xf32>
    "tpu.trace_start"() <{level = 10 : i32, message = "bni,bnj->bij"}> : () -> ()
    %cst_26 = arith.constant dense<0.000000e+00> : vector<2x128x128xf32>
    %55 = tpu.matmul %49, %49, %cst_26 {dimension_numbers = #tpu.dot_dimension_numbers<[1], [1], [2], [2], [0, 0, 0, 2, 1, 2], [0], [0]>} : vector<2x32x128xf32>, vector<2x32x128xf32>, vector<2x128x128xf32> -> vector<2x128x128xf32>
    "tpu.trace_stop"() : () -> ()
    %56 = arith.addf %48, %55 : vector<2x128x128xf32>
    %57 = vector.extract_strided_slice %44 {offsets = [0, 32, 0], sizes = [2, 32, 128], strides = [1, 1, 1]} : vector<2x64x128xf32> to vector<2x32x128xf32>
    %58 = vector.shape_cast %57 : vector<2x32x128xf32> to vector<64x128xf32>
    %cst_27 = arith.constant dense<0.000000e+00> : vector<64x1024xf32>
    %59 = tpu.matmul %58, %46, %cst_27 {dimension_numbers = #tpu.dot_dimension_numbers<[1], [0], [0], [1], [0, 0, 1, 1], [], []>} : vector<64x128xf32>, vector<128x1024xf32>, vector<64x1024xf32> -> vector<64x1024xf32>
    %60 = vector.shape_cast %59 : vector<64x1024xf32> to vector<2x32x1024xf32>
    %cst_28 = arith.constant dense<0xFF800000> : vector<2x1024xf32>
    %61 = vector.multi_reduction <maximumf>, %60, %cst_28 [1] : vector<2x32x1024xf32> to vector<2x1024xf32>
    %62 = arith.maximumf %54, %61 : vector<2x1024xf32>
    "tpu.trace_start"() <{level = 10 : i32, message = "bni,bnj->bij"}> : () -> ()
    %cst_29 = arith.constant dense<0.000000e+00> : vector<2x128x128xf32>
    %63 = tpu.matmul %57, %57, %cst_29 {dimension_numbers = #tpu.dot_dimension_numbers<[1], [1], [2], [2], [0, 0, 0, 2, 1, 2], [0], [0]>} : vector<2x32x128xf32>, vector<2x32x128xf32>, vector<2x128x128xf32> -> vector<2x128x128xf32>
    "tpu.trace_stop"() : () -> ()
    %64 = arith.addf %56, %63 : vector<2x128x128xf32>
    %cst_30 = arith.constant dense<0.000000e+00> : vector<2x1024xf32>
    %65 = tpu.matmul %45, %46, %cst_30 {dimension_numbers = #tpu.dot_dimension_numbers<[1], [0], [0], [1], [0, 0, 1, 1], [], []>} : vector<2x128xf32>, vector<128x1024xf32>, vector<2x1024xf32> -> vector<2x1024xf32>
    %cst_31 = arith.constant 1.562500e-02 : f32
    %66 = vector.broadcast %cst_31 : f32 to vector<2x1024xf32>
    %67 = arith.mulf %65, %66 : vector<2x1024xf32>
    %68 = vector.shape_cast %64 : vector<2x128x128xf32> to vector<256x128xf32>
    %cst_32 = arith.constant dense<0.000000e+00> : vector<256x1024xf32>
    %69 = tpu.matmul %68, %46, %cst_32 {dimension_numbers = #tpu.dot_dimension_numbers<[1], [0], [0], [1], [0, 0, 1, 1], [], []>} : vector<256x128xf32>, vector<128x1024xf32>, vector<256x1024xf32> -> vector<256x1024xf32>
    %70 = vector.shape_cast %69 : vector<256x1024xf32> to vector<2x128x1024xf32>
    %71 = vector.shape_cast %46 : vector<128x1024xf32> to vector<1x128x1024xf32>
    %72 = vector.broadcast %71 : vector<1x128x1024xf32> to vector<2x128x1024xf32>
    %73 = arith.mulf %70, %72 : vector<2x128x1024xf32>
    %cst_33 = arith.constant dense<0.000000e+00> : vector<2x1024xf32>
    %74 = vector.multi_reduction <add>, %73, %cst_33 [1] : vector<2x128x1024xf32> to vector<2x1024xf32>
    %cst_34 = arith.constant 1.562500e-02 : f32
    %75 = vector.broadcast %cst_34 : f32 to vector<2x1024xf32>
    %76 = arith.mulf %74, %75 : vector<2x1024xf32>
    %77 = arith.mulf %67, %67 : vector<2x1024xf32>
    %78 = arith.subf %76, %77 : vector<2x1024xf32>
    %cst_35 = arith.constant 0.000000e+00 : f32
    %79 = vector.broadcast %cst_35 : f32 to vector<2x1024xf32>
    %80 = arith.maximumf %78, %79 : vector<2x1024xf32>
    %81 = arith.subf %62, %67 : vector<2x1024xf32>
    %cst_36 = arith.constant 9.99999974E-6 : f32
    %82 = vector.broadcast %cst_36 : f32 to vector<2x1024xf32>
    %83 = arith.addf %80, %82 : vector<2x1024xf32>
    %84 = math.rsqrt %83 : vector<2x1024xf32>
    %85 = arith.mulf %81, %84 : vector<2x1024xf32>
    %cst_37 = arith.constant 0.000000e+00 : f32
    %86 = vector.broadcast %cst_37 : f32 to vector<2x1024xf32>
    %87 = arith.maximumf %85, %86 : vector<2x1024xf32>
    %88 = vector.shape_cast %87 : vector<2x1024xf32> to vector<2x1x1024xf32>
    %c0_38 = arith.constant 0 : index
    %c0_39 = arith.constant 0 : index
    %c0_40 = arith.constant 0 : index
    %89 = vector.load %arg5[%c0_38, %c0_39, %c0_40] : memref<2x1x1024xf32, #tpu.memory_space<vmem>>, vector<2x1x1024xf32>
    tpu.vector_store %arg5[%c0_38, %c0_39, %c0_40], %88 {strides = array<i32>} : memref<2x1x1024xf32, #tpu.memory_space<vmem>>, vector<2x1x1024xf32>,
    return
  }
  func.func @transform_0(%arg0: i32) -> (i32, i32, i32) {
    %c0_i32 = arith.constant 0 : i32
    %c0_i32_0 = arith.constant 0 : i32
    %c0_i32_1 = arith.constant 0 : i32
    return %arg0, %c0_i32, %c0_i32_0 : i32, i32, i32
  }
  func.func @transform_1(%arg0: i32) -> (i32, i32) {
    %c0_i32 = arith.constant 0 : i32
    %c0_i32_0 = arith.constant 0 : i32
    %c0_i32_1 = arith.constant 0 : i32
    return %c0_i32, %c0_i32_0 : i32, i32
  }
  func.func @transform_2(%arg0: i32) -> (i32, i32) {
    %c0_i32 = arith.constant 0 : i32
    %c0_i32_0 = arith.constant 0 : i32
    %c0_i32_1 = arith.constant 0 : i32
    return %c0_i32, %c0_i32_0 : i32, i32
  }
  func.func @transform_3(%arg0: i32) -> (i32, i32) {
    %c0_i32 = arith.constant 0 : i32
    %c0_i32_0 = arith.constant 0 : i32
    %c0_i32_1 = arith.constant 0 : i32
    return %c0_i32, %c0_i32_0 : i32, i32
  }
  func.func @transform_4(%arg0: i32) -> (i32, i32, i32) {
    %c0_i32 = arith.constant 0 : i32
    %c0_i32_0 = arith.constant 0 : i32
    %c0_i32_1 = arith.constant 0 : i32
    return %arg0, %c0_i32, %c0_i32_0 : i32, i32, i32
  }
}

</mosaic_0001>

<bundles_post_ra>
// kernel: tpu_custom_call.1
= control target key start
LH: loop header
LB: loop body
LE: loop exit
PB: predicated region body
PF: predicated region fallthrough
CT: control target
= control target key end

     0   :  { %9 = vsyncpa [#allocation3], 0  ;;  %s9351_s0 = inlined_call_operand.vmem [shape: f32[4,64,16], index: 0, kind: input, shape index: {}]   ;;  %s9352_s1 = inlined_call_operand.vmem [shape: f32[16,64], index: 1, kind: input, shape index: {}]   ;;  %s9353_s2 = inlined_call_operand.vmem [shape: f32[64,128], index: 2, kind: input, shape index: {}]   ;;  %s9354_s3 = inlined_call_operand.hbm [shape: f32[128,1024], index: 3, kind: input, shape index: {}]   ;;  %s9355_s4 = inlined_call_operand.hbm [shape: f32[4,1,1024], index: 4, kind: output, shape index: {}]  }
   0x1   :  { %10 = vsyncpa [#allocation4], 0 }
   0x2   :  { %12 = vsyncpa [#allocation4 + $0x1], 0  ;;  %s6896_s15 = smov 0   ;;  %s6898_s16 = smov 0  }
   0x3   :  { %s6900_s17 = smov 0   ;;  %s6902_s18 = smov 0  }
   0x4 LB: > { %s6917_s19 = sadd.s32 4294967295, %s6861_s18   ;;  %s5498_s20 = sadd.s32 4294967294, %s6861_s18   ;;  %s6861_s18 = sphi %s6902_s18, %s9891_s18   ;;  %s6857_s17 = sphi %s6900_s17, %s9890_s17   ;;  %s6853_s16 = sphi %s6898_s16, %s9889_s16   ;;  %s6849_s15 = sphi %s6896_s15, %s9888_s15  }
   0x5   : > { %s6921_s21 = sadd.s32 1, %s6861_s18   ;;  %s114_s22 = sadd.s32 1, %s6857_s17 }
   0x6   : > { %s111_s23 = ssub.s32 %s6861_s18, %s6921_s21  ;;  %p124_p0 = scmp.ne.s32.totalorder %s6857_s17, %s6853_s16 }
   0x7   : > { %p112_p1 = scmp.eq.s32.totalorder %s111_s23, 0  ;;  %p125_p2 = scmp.eq.s32.totalorder %s6917_s19, 1 }
   0x8   : > { %p130_p3 = scmp.ne.s32.totalorder %s6853_s16, %s6849_s15  ;;  %p131_p4 = scmp.eq.s32.totalorder %s5498_s20, 1 }
   0x9   : > { %s6932_s24 = scalar_select %p112_p1, %s6857_s17, %s114_s22  }
   0xa   : > { %p6934_p5 = por %p125_p2, %p124_p0  ;;  %p6938_p6 = por %p131_p4, %p130_p3 }
   0xb   : > { %p5499_p7 = scmp.ge.s32.totalorder %s6861_s18, 1  ;;  %p138_p8 = scmp.lt.s32.totalorder %s6861_s18, 3 }
   0xc   : > { %s9523_s25 = scalar_select %p6934_p5, 1, 0 }
   0xd   : > { %s9524_s26 = scalar_select %p6938_p6, 1, 0 }
   0xe   : > { %p9356_p9 = scmp.eq.s32.totalorder %s6917_s19, 0  ;;  %p6945_p10 = pnand %p5499_p7, %p138_p8 }
   0xf   : > { %s6863_s28 = smov [#allocation2]   ;;  %s6767_s7 = scalar_lea.hbm %s9354_s3, 16384 }
  0x10   : > { %s9525_s27 = scalar_select %p6945_p10, 1, 0 }
  0x11   : > { %s156_s29 = sshll.u32 %s6863_s28, 4  ;;  %p6549_p11 = pneg %p6945_p10  ;;  %s157_s29 = int_to_ptr.vmem [resolvable:$true] %s156_s29 }
  0x12   : > { %p6768_p13 = scmp.ne.s32.totalorder %s9354_s3, %s6767_s7  ;;  %p6774_p3 = scmp.lt.u32.totalorder %s6767_s7, %s9354_s3 }
  0x13   : > { %p6953_p12 = pnand %p9356_p9, %p6549_p11 }
  0x15   : > { %p6769_p0 = pneg %p6953_p12 }
  0x17   : > { %p6770_p1 = pnand %p6769_p0, %p6768_p13 }
  0x19   : > { %p6771_p2 = pneg %p6770_p1 }
  0x1b   : > { %p6776_p4 = pnand %p6774_p3, %p6771_p2 }
  0x1d   : > { %6779 = shalt.err (!%p6776_p4)
}
  0x1e   : > { %s6780_s12 = scalar_lea.vmem %s157_s29, 16384  ;;  %p6788_p9 = scmp.lt.s32.totalorder %s157_s29, %s157_s29 }
  0x1f   : > { %p6781_p7 = scmp.ne.s32.totalorder %s157_s29, %s6780_s12  ;;  %p6789_p6 = scmp.lt.s32.totalorder %s6780_s12, %s6780_s12 }
  0x21   : > { %p6783_p8 = pnand %p6781_p7, %p6769_p0  ;;  %p6790_p5 = por %p6789_p6, %p6788_p9 }
  0x23   : > { %p6784_p11 = pneg %p6783_p8 }
  0x25   : > { %p6791_p10 = pnand %p6790_p5, %p6784_p11 }
  0x27   : > { %6794 = shalt.err (!%p6791_p10)
}
  0x28   : > { %s6864_s13 = smov 1024   ;;  %s6865_s14 = smov 64  }
  0x29   : > { %6552 = dma.hbm_to_vmem [thread:$0]  (!%p6953_p12), %s9354_s3, 16384, %s157_s29, [#allocation3], %s6864_s13, %s6864_s13, %s6865_s14  }
  0x2a   : > { %p9527_p13 = scmp.ne.s32.totalorder %s9525_s27, 0 }
  0x2c   : > { %182 = sbr.rel (%p9527_p13) target bundleno = 1630 (0x65e), region = 36 }
  0x33   : > { %p9528_p1 = scmp.eq.s32.totalorder %s6917_s19, 0 }
  0x35   : > { %6840 = dma.done.wait (%p9528_p1), [#allocation3], 16384   ;;  %p9529_p0 = pmov %p9528_p1 }
  0x36   : > { %s5505_s23 = sshll.u32 %s6917_s19, 1  ;;  %vm235_vm0 = vcmask 130048   ;;  %v233_v0 = vld [vmem:[%s9352_s1] sm:$0xff]  ;;  %v234_v1 = vld [vmem:[%s9352_s1 + $0x8] sm:$0xff]  ;;  %v588_v22 = vld [vmem:[%s9353_s2 + $0x10] sm:$0xff]  ;;  %vm429_vm1 = vcmask 523264  }
  0x37   : > { %6842 = vsyncadd (%p9529_p0), [#allocation3], 4294950912  ;;  %p210_p5 = scmp.lt.s32.totalorder %s5505_s23, 3  ;;  %v5931_v3 = vpack.c.bf16 %v234_v1, %v233_v0  ;;  %v586_v19 = vld [vmem:[%s9353_s2] sm:$0xff]  ;;  %v587_v20 = vld [vmem:[%s9353_s2 + $0x8] sm:$0xff]  ;;  %vm3176_vm2 = vcmask 1041409  }
  0x38   : > { %v5935_v21 = vpack.c.bf16 %v587_v20, %v586_v19  ;;  %v589_v23 = vld [vmem:[%s9353_s2 + $0x18] sm:$0xff]  ;;  %v590_v25 = vld [vmem:[%s9353_s2 + $0x20] sm:$0xff]  ;;  %v591_v26 = vld [vmem:[%s9353_s2 + $0x28] sm:$0xff]  ;;  %vm2305_vm3 = vcmask 261120   ;;  %s206_s8 = sand.u32 1, %s6853_s16   ;;  %s5612_s11 = sshll.u32 %s6917_s19, 8 }
  0x39   : > { %s9893_s23 = smov (!%p210_p5, %s5505_s23), 3  ;;  %5932 = vmatprep.subr.bf16.mxu0 %v5931_v3  ;;  %v5939_v24 = vpack.c.bf16 %v589_v23, %v588_v22  ;;  %v5943_v27 = vpack.c.bf16 %v591_v26, %v590_v25  ;;  %v592_v28 = vld [vmem:[%s9353_s2 + $0x30] sm:$0xff]  ;;  %v593_v29 = vld [vmem:[%s9353_s2 + $0x38] sm:$0xff]  ;;  %s5504_s9 = sshll.u32 %s206_s8, 4 }
  0x3a   : > { %s5610_s28 = sshll.u32 %s9893_s23, 6  ;;  %5934 = vmatpush3.bf16.msra.mxu0 %v5931_v3  ;;  %5936 = vmatprep.subr.bf16.mxu1 %v5935_v21  ;;  %v5947_v30 = vpack.c.bf16 %v593_v29, %v592_v28  ;;  %s208_s10 = scalar_lea.vmem [#allocation5], %s5504_s9 }
  0x3b   : > { %s6983_s6 = scalar_lea.vmem %s9351_s0, %s5610_s28  ;;  %5938 = vmatpush3.bf16.msra.mxu1 %v5935_v21  ;;  %s5424_s12 = sshll.u32 %s208_s10, 4  ;;  %s9306_s12 = int_to_ptr.vmem [resolvable:$true] %s5424_s12 }
  0x3c   : > { %v217_v2 = vld [vmem:[%s6983_s6] sm:$0xff]  ;;  %v218_v4 = vld [vmem:[%s6983_s6 + $0x8] sm:$0xff]  ;;  %v219_v5 = vld [vmem:[%s6983_s6 + $0x10] sm:$0xff]  ;;  %5940 = vmatprep.subr.bf16.mxu1 %v5939_v24  ;;  %s9304_s20 = scalar_lea.hbm %s9355_s4, %s5612_s11  ;;  %s9310_s19 = scalar_lea.sflag [#allocation4], %s206_s8 }
  0x3d   : > { %5739 = vmatprep.mubr.msk.f32.mxu0 %vm235_vm0, %v217_v2  ;;  %v220_v6 = vld [vmem:[%s6983_s6 + $0x18] sm:$0xff]  ;;  %v221_v7 = vld [vmem:[%s6983_s6 + $0x20] sm:$0xff]  ;;  %v222_v8 = vld [vmem:[%s6983_s6 + $0x28] sm:$0xff]  ;;  %s6795_s22 = scalar_lea.vmem %s9306_s12, 256  ;;  %p9886_p9 = scmp.ne.s32.totalorder %s9523_s25, 0 }
  0x3e   : > { %5740 = vmatmul.mubr.msk.f32.vlgmr.msra.gmra.mrb[0].mxu0 %vm235_vm0, %v218_v4  ;;  %v223_v9 = vld [vmem:[%s6983_s6 + $0x30] sm:$0xff]  ;;  %v224_v10 = vld [vmem:[%s6983_s6 + $0x38] sm:$0xff]  ;;  %v225_v11 = vld [vmem:[%s6983_s6 + $0x40] sm:$0xff]  ;;  %p6796_p6 = scmp.ne.s32.totalorder %s9306_s12, %s6795_s22  ;;  %s6868_s23 = smov [#allocation5]  }
  0x3f   : > { %5742 = vmatprep.mubr.msk.f32.mxu0 %vm235_vm0, %v219_v5  ;;  %v226_v12 = vld [vmem:[%s6983_s6 + $0x48] sm:$0xff]  ;;  %v227_v13 = vld [vmem:[%s6983_s6 + $0x50] sm:$0xff]  ;;  %v228_v14 = vld [vmem:[%s6983_s6 + $0x58] sm:$0xff]  ;;  %5942 = vmatpush3.bf16.msra.mxu1 %v5939_v24  ;;  %s6799_s28 = sshll.u32 %s6868_s23, 4  ;;  %s6800_s28 = int_to_ptr.vmem [resolvable:$false] %s6799_s28 }
  0x40   : > { %v229_v15 = vld [vmem:[%s6983_s6 + $0x60] sm:$0xff]  ;;  %v230_v16 = vld [vmem:[%s6983_s6 + $0x68] sm:$0xff]  ;;  %v231_v17 = vld [vmem:[%s6983_s6 + $0x70] sm:$0xff]  ;;  %5944 = vmatprep.subr.bf16.mxu1 %v5943_v27  ;;  %p6797_p10 = pnand %p6796_p6, %p9886_p9  ;;  %s6801_s30 = scalar_lea.vmem %s6800_s28, 512 }
  0x41   : > { %v232_v18 = vld [vmem:[%s6983_s6 + $0x78] sm:$0xff]  ;;  %p6802_p2 = scmp.lt.s32.totalorder %s9306_s12, %s6800_s28  ;;  %p6803_p3 = scmp.lt.s32.totalorder %s6801_s30, %s6795_s22 }
  0x42   : > { %5743 = vmatmul.mubr.msk.f32.gmra.mrb[2].mxu0 %vm235_vm0, %v220_v6  ;;  %p6798_p12 = pneg %p6797_p10 }
  0x43   : > { %5745 = vmatprep.mubr.msk.f32.mxu0 %vm235_vm0, %v221_v7  ;;  %5946 = vmatpush3.bf16.msra.mxu1 %v5943_v27  ;;  %p6804_p4 = por %p6803_p3, %p6802_p2 }
  0x44   : > { %5948 = vmatprep.subr.bf16.mxu1 %v5947_v30 }
  0x45   : > { %p6805_p7 = pnand %p6804_p4, %p6798_p12 }
  0x46   : > { %5746 = vmatmul.mubr.msk.f32.gmra.mrb[4].mxu0 %vm235_vm0, %v222_v8 }
  0x47   : > { %5748 = vmatprep.mubr.msk.f32.mxu0 %vm235_vm0, %v223_v9  ;;  %5950 = vmatpush3.bf16.msra.mxu1 %v5947_v30 }
  0x4a   : > { %5749 = vmatmul.mubr.msk.f32.gmra.mrb[6].mxu0 %vm235_vm0, %v224_v10 }
  0x4b   : > { %5751 = vmatprep.mubr.msk.f32.mxu0 %vm235_vm0, %v225_v11 }
  0x4e   : > { %5752 = vmatmul.mubr.msk.f32.gmra.mrb[8].mxu0 %vm235_vm0, %v226_v12 }
  0x4f   : > { %5754 = vmatprep.mubr.msk.f32.mxu0 %vm235_vm0, %v227_v13 }
  0x52   : > { %5755 = vmatmul.mubr.msk.f32.gmra.mrb[10].mxu0 %vm235_vm0, %v228_v14 }
  0x53   : > { %5757 = vmatprep.mubr.msk.f32.mxu0 %vm235_vm0, %v229_v15 }
  0x56   : > { %5758 = vmatmul.mubr.msk.f32.gmra.mrb[12].mxu0 %vm235_vm0, %v230_v16 }
  0x57   : > { %5760 = vmatprep.mubr.msk.f32.mxu0 %vm235_vm0, %v231_v17 }
  0x5a   : > { %5761 = vmatmul.mubr.msk.f32.gmra.mrb[14].mxu0 %vm235_vm0, %v232_v18 }
 0x111   : > { %v5741_v31 = vpop.f32.mrb[0].mxu0 }
 0x112   : > { %v431_v32 = vsel %vm429_vm1, %v5741_v31, 0.0  ;;  %v350_v33 = vpop.f32.mrb[1].mxu0 }
 0x113   : > { %v430_v34 = vsel %vm429_vm1, %v350_v33, 0.0 }
 0x114   : > { %v432_v35 = vadd.f32 %v431_v32, %v430_v34 }
 0x115   : > { %v5744_v36 = vpop.f32.mrb[2].mxu0 }
 0x116   : > { %v360_v37 = vpop.f32.mrb[3].mxu0  ;;  %v435_v40 = vsel %vm429_vm1, %v5744_v36, 0.0 }
 0x117   : > { %v433_v38 = vsel %vm429_vm1, %v360_v37, 0.0 }
 0x118   : > { %v434_v39 = vadd.f32 %v433_v38, %v432_v35 }
 0x119   : > { %v5747_v41 = vpop.f32.mrb[4].mxu0 }
 0x11a   : > { %v370_v42 = vpop.f32.mrb[5].mxu0  ;;  %v436_v43 = vadd.f32 %v435_v40, %v434_v39  ;;  %v439_v46 = vsel %vm429_vm1, %v5747_v41, 0.0 }
 0x11b   : > { %v437_v44 = vsel %vm429_vm1, %v370_v42, 0.0 }
 0x11c   : > { %v438_v45 = vadd.f32 %v437_v44, %v436_v43 }
 0x11d   : > { %v5750_v47 = vpop.f32.mrb[6].mxu0 }
 0x11e   : > { %v380_v48 = vpop.f32.mrb[7].mxu0  ;;  %v440_v49 = vadd.f32 %v439_v46, %v438_v45  ;;  %v443_v52 = vsel %vm429_vm1, %v5750_v47, 0.0 }
 0x11f   : > { %v441_v50 = vsel %vm429_vm1, %v380_v48, 0.0 }
 0x120   : > { %v442_v51 = vadd.f32 %v441_v50, %v440_v49 }
 0x121   : > { %v7055_v53 = vpop.f32.mrb[8].mxu0 }
 0x122   : > { %v444_v54 = vadd.f32 %v443_v52, %v442_v51  ;;  %v452_v55 = vsel %vm429_vm1, %v7055_v53, 0.0  ;;  %v7059_v56 = vpop.f32.mrb[9].mxu0 }
 0x123   : > { %v451_v57 = vsel %vm429_vm1, %v7059_v56, 0.0 }
 0x124   : > { %v445_v58 = vrot.slane %v444_v54, 4  ;;  %v453_v59 = vadd.f32 %v452_v55, %v451_v57 }
 0x125   : > { %v7063_v60 = vpop.f32.mrb[10].mxu0 }
 0x126   : > { %v446_v61 = vadd.f32 %v445_v58, %v444_v54  ;;  %v7065_v62 = vpop.f32.mrb[11].mxu0  ;;  %v456_v63 = vsel %vm429_vm1, %v7063_v60, 0.0 }
 0x127   : > { %v454_v0 = vsel %vm429_vm1, %v7065_v62, 0.0 }
 0x128   : > { %v447_v1 = vrot.slane %v446_v61, 2  ;;  %v455_v2 = vadd.f32 %v454_v0, %v453_v59 }
 0x129   : > { %v7071_v3 = vpop.f32.mrb[12].mxu0 }
 0x12a   : > { %v448_v4 = vadd.f32 %v447_v1, %v446_v61  ;;  %v410_v5 = vpop.f32.mrb[13].mxu0  ;;  %v457_v6 = vadd.f32 %v456_v63, %v455_v2  ;;  %v460_v7 = vsel %vm429_vm1, %v7071_v3, 0.0 }
 0x12b   : > { %v458_v8 = vsel %vm429_vm1, %v410_v5, 0.0 }
 0x12c   : > { %v449_v9 = vrot.slane %v448_v4, 1  ;;  %v459_v10 = vadd.f32 %v458_v8, %v457_v6 }
 0x12d   : > { %v5762_v11 = vpop.f32.mrb[14].mxu0 }
 0x12e   : > { %v450_v12 = vadd.f32 %v449_v9, %v448_v4  ;;  %v420_v13 = vpop.f32.mrb[15].mxu0  ;;  %v461_v14 = vadd.f32 %v460_v7, %v459_v10  ;;  %v464_v29 = vsel %vm429_vm1, %v5762_v11, 0.0 }
 0x12f   : > { %v462_v15 = vsel %vm429_vm1, %v420_v13, 0.0 }
 0x130   : > { %v472_v16 = vmul.f32 0.015625, %v450_v12  ;;  %v463_v17 = vadd.f32 %v462_v15, %v461_v14 }
 0x132   : > { %v7077_v18 = vsub.f32 %v350_v33, %v472_v16  ;;  %v7079_v19 = vsub.f32 %v5741_v31, %v472_v16  ;;  %v7081_v20 = vsub.f32 %v360_v37, %v472_v16  ;;  %v7083_v21 = vsub.f32 %v5744_v36, %v472_v16 }
 0x133   : > { %v7085_v22 = vsub.f32 %v370_v42, %v472_v16  ;;  %v7087_v23 = vsub.f32 %v5747_v41, %v472_v16  ;;  %v7089_v24 = vsub.f32 %v380_v48, %v472_v16  ;;  %v7091_v25 = vsub.f32 %v5750_v47, %v472_v16 }
 0x134   : > { %v490_v26 = vmul.f32 %v7077_v18, %v7077_v18  ;;  %v491_v27 = vmul.f32 %v7079_v19, %v7079_v19  ;;  %v492_v28 = vmul.f32 %v7081_v20, %v7081_v20  ;;  %v493_v30 = vmul.f32 %v7083_v21, %v7083_v21 }
 0x135   : > { %v494_v34 = vmul.f32 %v7085_v22, %v7085_v22  ;;  %v465_v36 = vadd.f32 %v464_v29, %v463_v17  ;;  %v495_v38 = vmul.f32 %v7087_v23, %v7087_v23  ;;  %v496_v42 = vmul.f32 %v7089_v24, %v7089_v24 }
 0x136   : > { %v506_v31 = vsel %vm429_vm1, %v490_v26, 0.0  ;;  %v507_v32 = vsel %vm429_vm1, %v491_v27, 0.0  ;;  %v509_v35 = vsel %vm429_vm1, %v492_v28, 0.0  ;;  %v511_v39 = vsel %vm429_vm1, %v493_v30, 0.0 }
 0x137   : > { %v508_v33 = vadd.f32 %v507_v32, %v506_v31  ;;  %v466_v40 = vrot.slane %v465_v36, 4  ;;  %v513_v43 = vsel %vm429_vm1, %v494_v34, 0.0  ;;  %v497_v46 = vmul.f32 %v7091_v25, %v7091_v25 }
 0x138   : > { %v515_v47 = vsel %vm429_vm1, %v495_v38, 0.0  ;;  %v517_v50 = vsel %vm429_vm1, %v496_v42, 0.0 }
 0x139   : > { %v510_v37 = vadd.f32 %v509_v35, %v508_v33  ;;  %v467_v44 = vadd.f32 %v466_v40, %v465_v36  ;;  %v519_v54 = vsel %vm429_vm1, %v497_v46, 0.0 }
 0x13b   : > { %v512_v41 = vadd.f32 %v511_v39, %v510_v37  ;;  %v468_v48 = vrot.slane %v467_v44, 2 }
 0x13d   : > { %v514_v45 = vadd.f32 %v513_v43, %v512_v41  ;;  %v469_v51 = vadd.f32 %v468_v48, %v467_v44 }
 0x13f   : > { %v516_v49 = vadd.f32 %v515_v47, %v514_v45  ;;  %v470_v55 = vrot.slane %v469_v51, 1 }
 0x141   : > { %v518_v52 = vadd.f32 %v517_v50, %v516_v49  ;;  %v471_v58 = vadd.f32 %v470_v55, %v469_v51 }
 0x143   : > { %v520_v57 = vadd.f32 %v519_v54, %v518_v52  ;;  %v473_v61 = vmul.f32 0.015625, %v471_v58 }
 0x145   : > { %v521_v59 = vrot.slane %v520_v57, 4  ;;  %v7119_v0 = vsub.f32 %v7059_v56, %v473_v61  ;;  %v7122_v1 = vsub.f32 %v7055_v53, %v473_v61  ;;  %v7125_v2 = vsub.f32 %v7065_v62, %v473_v61 }
 0x146   : > { %v7128_v4 = vsub.f32 %v7063_v60, %v473_v61  ;;  %v7130_v7 = vsub.f32 %v410_v5, %v473_v61  ;;  %v7133_v8 = vsub.f32 %v7071_v3, %v473_v61  ;;  %v7135_v9 = vsub.f32 %v420_v13, %v473_v61 }
 0x147   : > { %v522_v63 = vadd.f32 %v521_v59, %v520_v57  ;;  %v7137_v10 = vsub.f32 %v5762_v11, %v473_v61  ;;  %v498_v53 = vmul.f32 %v7119_v0, %v7119_v0  ;;  %v499_v56 = vmul.f32 %v7122_v1, %v7122_v1 }
 0x148   : > { %v500_v60 = vmul.f32 %v7125_v2, %v7125_v2  ;;  %v501_v5 = vmul.f32 %v7128_v4, %v7128_v4  ;;  %v502_v3 = vmul.f32 %v7130_v7, %v7130_v7  ;;  %v503_v16 = vmul.f32 %v7133_v8, %v7133_v8 }
 0x149   : > { %v523_v6 = vrot.slane %v522_v63, 2  ;;  %v527_v12 = vsel %vm429_vm1, %v498_v53, 0.0  ;;  %v528_v11 = vsel %vm429_vm1, %v499_v56, 0.0  ;;  %v504_v28 = vmul.f32 %v7135_v9, %v7135_v9 }
 0x14a   : > { %v529_v14 = vadd.f32 %v528_v11, %v527_v12  ;;  %v530_v15 = vsel %vm429_vm1, %v500_v60, 0.0  ;;  %v532_v17 = vsel %vm429_vm1, %v501_v5, 0.0  ;;  %v534_v29 = vsel %vm429_vm1, %v502_v3, 0.0 }
 0x14b   : > { %v524_v62 = vadd.f32 %v523_v6, %v522_v63  ;;  %v505_v32 = vmul.f32 %v7137_v10, %v7137_v10  ;;  %v536_v33 = vsel %vm429_vm1, %v503_v16, 0.0  ;;  %v538_v36 = vsel %vm429_vm1, %v504_v28, 0.0  ;;  %v937_v16 = vld [vmem:[#allocation2] sm:$0xff]  ;;  %v939_v28 = vld [vmem:[#allocation2 + $0x10] sm:$0xff] }
 0x14c   : > { %v531_v27 = vadd.f32 %v530_v15, %v529_v14  ;;  %v948_v15 = vld [vmem:[#allocation2 + $0x58] sm:$0xff] }
 0x14d   : > { %v525_v13 = vrot.slane %v524_v62, 1  ;;  %v540_v38 = vsel %vm429_vm1, %v505_v32, 0.0  ;;  %v962_v32 = vld [vmem:[#allocation2 + $0xc8] sm:$0xff] }
 0x14e   : > { %v533_v31 = vadd.f32 %v532_v17, %v531_v27  ;;  %v945_v17 = vld [vmem:[#allocation2 + $0x40] sm:$0xff] }
 0x14f   : > { %v526_v26 = vadd.f32 %v525_v13, %v524_v62  ;;  %v7199_v27 = vpack.c.bf16 %v945_v17, %v937_v16  ;;  %v1019_v17 = vld [vmem:[#allocation2 + $0x290] sm:$0xff] }
 0x150   : > { %v535_v35 = vadd.f32 %v534_v29, %v533_v31  ;;  %v947_v29 = vld [vmem:[#allocation2 + $0x50] sm:$0xff]  ;;  %v954_v31 = vld [vmem:[#allocation2 + $0x88] sm:$0xff] }
 0x151   : > { %v548_v30 = vmul.f32 0.015625, %v526_v26 }
 0x152   : > { %v537_v37 = vadd.f32 %v536_v33, %v535_v35  ;;  %v956_v33 = vld [vmem:[#allocation2 + $0x98] sm:$0xff] }
 0x153   : > { %v550_v34 = vadd.f32 1e-05, %v548_v30  ;;  %v7202_v30 = vpack.c.bf16 %v947_v29, %v939_v28  ;;  %v964_v35 = vld [vmem:[#allocation2 + $0xd8] sm:$0xff]  ;;  %v1027_v28 = vld [vmem:[#allocation2 + $0x2d0] sm:$0xff] }
 0x154   : > { %v539_v39 = vadd.f32 %v538_v36, %v537_v37  ;;  %v953_v36 = vld [vmem:[#allocation2 + $0x80] sm:$0xff]  ;;  %v7262_v29 = vpack.c.bf16 %v1027_v28, %v1019_v17 }
 0x155   : > { %6599 = vrsqrt.f32 %v550_v34  ;;  %v7207_v34 = vpack.c.bf16 %v962_v32, %v954_v31  ;;  %v961_v37 = vld [vmem:[#allocation2 + $0xc0] sm:$0xff]  ;;  %v1034_v31 = vld [vmem:[#allocation2 + $0x308] sm:$0xff] }
 0x156   : > { %v541_v40 = vadd.f32 %v540_v38, %v539_v39  ;;  %v7209_v38 = vpack.c.bf16 %v964_v35, %v956_v33  ;;  %v7211_v39 = vpack.c.bf16 %v961_v37, %v953_v36  ;;  %9534 = vst [vmem:[#allocation12_spill] sm:$0xff] %v7262_v29  ;;  %v1042_v32 = vld [vmem:[#allocation2 + $0x348] sm:$0xff]  ;;  %v1036_v33 = vld [vmem:[#allocation2 + $0x318] sm:$0xff]  ;;  %v1033_v37 = vld [vmem:[#allocation2 + $0x300] sm:$0xff] }
 0x157   : > { %v7267_v35 = vpack.c.bf16 %v1042_v32, %v1034_v31  ;;  %v1044_v36 = vld [vmem:[#allocation2 + $0x358] sm:$0xff] }
 0x158   : > { %v542_v41 = vrot.slane %v541_v40, 4 }
 0x15a   : > { %v543_v42 = vadd.f32 %v542_v41, %v541_v40  ;;  %v955_v40 = vld [vmem:[#allocation2 + $0x90] sm:$0xff] }
 0x15b   : > { %v963_v41 = vld [vmem:[#allocation2 + $0xd0] sm:$0xff] }
 0x15c   : > { %v544_v44 = vrot.slane %v543_v42, 2 }
 0x15e   : > { %v545_v49 = vadd.f32 %v544_v44, %v543_v42  ;;  %v7214_v42 = vpack.c.bf16 %v963_v41, %v955_v40  ;;  %v978_v44 = vld [vmem:[#allocation2 + $0x148] sm:$0xff]  ;;  %v1041_v40 = vld [vmem:[#allocation2 + $0x340] sm:$0xff]  ;;  %v7269_v41 = vpack.c.bf16 %v1044_v36, %v1036_v33 }
 0x15f   : > { %v6600_v43 = vpop.eup %6599 }
 0x160   : > { %v560_v45 = vmul.f32 %v6600_v43, %v7089_v24  ;;  %v554_v46 = vmul.f32 %v6600_v43, %v7077_v18  ;;  %v555_v47 = vmul.f32 %v6600_v43, %v7079_v19  ;;  %v556_v48 = vmul.f32 %v6600_v43, %v7081_v20  ;;  %9535 = vst [vmem:[#allocation13_spill] sm:$0xff] %v7269_v41 }
 0x161   : > { %v557_v50 = vmul.f32 %v6600_v43, %v7083_v21  ;;  %v558_v51 = vmul.f32 %v6600_v43, %v7085_v22  ;;  %v559_v52 = vmul.f32 %v6600_v43, %v7087_v23  ;;  %v546_v57 = vrot.slane %v545_v49, 1 }
 0x162   : > { %v570_v54 = vmax.f32 %v554_v46, 0.0  ;;  %v571_v55 = vmax.f32 %v555_v47, 0.0  ;;  %v572_v58 = vmax.f32 %v556_v48, 0.0  ;;  %v561_v24 = vmul.f32 %v6600_v43, %v7091_v25  ;;  %v970_v43 = vld [vmem:[#allocation2 + $0x108] sm:$0xff]  ;;  %v980_v47 = vld [vmem:[#allocation2 + $0x158] sm:$0xff]  ;;  %v969_v48 = vld [vmem:[#allocation2 + $0x100] sm:$0xff] }
 0x163   : > { %v547_v18 = vadd.f32 %v546_v57, %v545_v49  ;;  %v573_v20 = vmax.f32 %v557_v50, 0.0  ;;  %v574_v21 = vmax.f32 %v558_v51, 0.0  ;;  %v575_v22 = vmax.f32 %v559_v52, 0.0  ;;  %v977_v49 = vld [vmem:[#allocation2 + $0x140] sm:$0xff]  ;;  %v971_v52 = vld [vmem:[#allocation2 + $0x110] sm:$0xff]  ;;  %v986_v57 = vld [vmem:[#allocation2 + $0x188] sm:$0xff] }
 0x164   : > { %5779 = vmatprep.mubr.msk.f32.mxu1 %vm429_vm1, %v570_v54  ;;  %v576_v23 = vmax.f32 %v560_v45, 0.0  ;;  %v577_v25 = vmax.f32 %v561_v24, 0.0  ;;  %v972_v45 = vld [vmem:[#allocation2 + $0x118] sm:$0xff]  ;;  %v7219_v46 = vpack.c.bf16 %v978_v44, %v970_v43  ;;  %v7223_v51 = vpack.c.bf16 %v977_v49, %v969_v48  ;;  %v979_v54 = vld [vmem:[#allocation2 + $0x150] sm:$0xff]  ;;  %v1050_v48 = vld [vmem:[#allocation2 + $0x388] sm:$0xff] }
 0x165   : > { %5780 = vmatmul.mubr.msk.f32.vlgmr.msra.gmra.mrb[0].mxu1 %vm429_vm1, %v571_v55  ;;  %v549_v19 = vmul.f32 0.015625, %v547_v18  ;;  %v7221_v50 = vpack.c.bf16 %v980_v47, %v972_v45  ;;  %v7226_v55 = vpack.c.bf16 %v979_v54, %v971_v52  ;;  %v988_v24 = vld [vmem:[#allocation2 + $0x198] sm:$0xff]  ;;  %v7271_v43 = vpack.c.bf16 %v1041_v40, %v1033_v37  ;;  %v1035_v44 = vld [vmem:[#allocation2 + $0x310] sm:$0xff]  ;;  %v1058_v49 = vld [vmem:[#allocation2 + $0x3c8] sm:$0xff] }
 0x166   : > { %5782 = vmatprep.mubr.msk.f32.mxu1 %vm429_vm1, %v572_v58  ;;  %v994_v58 = vld [vmem:[#allocation2 + $0x1c8] sm:$0xff]  ;;  %v1043_v45 = vld [vmem:[#allocation2 + $0x350] sm:$0xff]  ;;  %v1052_v52 = vld [vmem:[#allocation2 + $0x398] sm:$0xff]  ;;  %v7279_v54 = vpack.c.bf16 %v1058_v49, %v1050_v48 }
 0x167   : > { %v551_v59 = vadd.f32 1e-05, %v549_v19  ;;  %v7231_v18 = vpack.c.bf16 %v994_v58, %v986_v57  ;;  %v996_v19 = vld [vmem:[#allocation2 + $0x1d8] sm:$0xff]  ;;  %9536 = vst [vmem:[#allocation14_spill] sm:$0xff] %v7271_v43  ;;  %v7274_v47 = vpack.c.bf16 %v1043_v45, %v1035_v44  ;;  %v1049_v58 = vld [vmem:[#allocation2 + $0x380] sm:$0xff] }
 0x168   : > { %9538 = vst [vmem:[#allocation16_spill] sm:$0xff] %v7279_v54  ;;  %v1060_v57 = vld [vmem:[#allocation2 + $0x3d8] sm:$0xff] }
 0x169   : > { %5783 = vmatmul.mubr.msk.f32.gmra.mrb[2].mxu1 %vm429_vm1, %v573_v20  ;;  %6601 = vrsqrt.f32 %v551_v59  ;;  %v985_v20 = vld [vmem:[#allocation2 + $0x180] sm:$0xff]  ;;  %v7233_v59 = vpack.c.bf16 %v996_v19, %v988_v24  ;;  %9537 = vst [vmem:[#allocation15_spill] sm:$0xff] %v7274_v47  ;;  %v7281_v19 = vpack.c.bf16 %v1060_v57, %v1052_v52 }
 0x16a   : > { %5785 = vmatprep.mubr.msk.f32.mxu1 %vm429_vm1, %v574_v21  ;;  %v993_v21 = vld [vmem:[#allocation2 + $0x1c0] sm:$0xff] }
 0x16b   : > { %v1057_v24 = vld [vmem:[#allocation2 + $0x3c0] sm:$0xff]  ;;  %9539 = vst [vmem:[#allocation17_spill] sm:$0xff] %v7281_v19 }
 0x16d   : > { %5786 = vmatmul.mubr.msk.f32.gmra.mrb[4].mxu1 %vm429_vm1, %v575_v22  ;;  %v7235_v22 = vpack.c.bf16 %v993_v21, %v985_v20  ;;  %v7283_v20 = vpack.c.bf16 %v1057_v24, %v1049_v58  ;;  %v1051_v21 = vld [vmem:[#allocation2 + $0x390] sm:$0xff] }
 0x16e   : > { %5788 = vmatprep.mubr.msk.f32.mxu1 %vm429_vm1, %v576_v23  ;;  %v987_v23 = vld [vmem:[#allocation2 + $0x190] sm:$0xff] }
 0x16f   : > { %9540 = vst [vmem:[#allocation18_spill] sm:$0xff] %v7283_v20 }
 0x171   : > { %5789 = vmatmul.mubr.msk.f32.gmra.mrb[6].mxu1 %vm429_vm1, %v577_v25  ;;  %v995_v25 = vld [vmem:[#allocation2 + $0x1d0] sm:$0xff] }
 0x173   : > { %v6602_v61 = vpop.eup %6601 }
 0x174   : > { %v568_v63 = vmul.f32 %v6602_v61, %v7135_v9  ;;  %v562_v6 = vmul.f32 %v6602_v61, %v7119_v0  ;;  %v563_v53 = vmul.f32 %v6602_v61, %v7122_v1  ;;  %v564_v56 = vmul.f32 %v6602_v61, %v7125_v2  ;;  %v946_v9 = vld [vmem:[#allocation2 + $0x48] sm:$0xff] }
 0x175   : > { %v565_v60 = vmul.f32 %v6602_v61, %v7128_v4  ;;  %v566_v62 = vmul.f32 %v6602_v61, %v7130_v7  ;;  %v567_v5 = vmul.f32 %v6602_v61, %v7133_v8  ;;  %v569_v3 = vmul.f32 %v6602_v61, %v7137_v10  ;;  %v938_v8 = vld [vmem:[#allocation2 + $0x8] sm:$0xff]  ;;  %v940_v10 = vld [vmem:[#allocation2 + $0x18] sm:$0xff] }
 0x176   : > { %v578_v12 = vmax.f32 %v562_v6, 0.0  ;;  %v579_v11 = vmax.f32 %v563_v53, 0.0  ;;  %v580_v13 = vmax.f32 %v564_v56, 0.0  ;;  %v584_v4 = vmax.f32 %v568_v63, 0.0  ;;  %v1002_v63 = vld [vmem:[#allocation2 + $0x208] sm:$0xff]  ;;  %v1004_v53 = vld [vmem:[#allocation2 + $0x218] sm:$0xff] }
 0x177   : > { %v581_v0 = vmax.f32 %v565_v60, 0.0  ;;  %v582_v1 = vmax.f32 %v566_v62, 0.0  ;;  %v583_v2 = vmax.f32 %v567_v5, 0.0  ;;  %v585_v7 = vmax.f32 %v569_v3, 0.0  ;;  %v1010_v6 = vld [vmem:[#allocation2 + $0x248] sm:$0xff]  ;;  %v1012_v60 = vld [vmem:[#allocation2 + $0x258] sm:$0xff] }
 0x178   : > { %5791 = vmatprep.mubr.msk.f32.mxu1 %vm429_vm1, %v578_v12  ;;  %v7195_v14 = vpack.c.bf16 %v946_v9, %v938_v8  ;;  %v7197_v26 = vpack.c.bf16 %v948_v15, %v940_v10  ;;  %v7238_v61 = vpack.c.bf16 %v995_v25, %v987_v23  ;;  %v7243_v56 = vpack.c.bf16 %v1010_v6, %v1002_v63  ;;  %v1001_v62 = vld [vmem:[#allocation2 + $0x200] sm:$0xff]  ;;  %v1028_v8 = vld [vmem:[#allocation2 + $0x2d8] sm:$0xff]  ;;  %v1059_v23 = vld [vmem:[#allocation2 + $0x3d0] sm:$0xff] }
 0x179   : > { %5792 = vmatmul.mubr.msk.f32.gmra.mrb[8].mxu1 %vm429_vm1, %v579_v11  ;;  %v1009_v5 = vld [vmem:[#allocation2 + $0x240] sm:$0xff]  ;;  %v7245_v3 = vpack.c.bf16 %v1012_v60, %v1004_v53  ;;  %v1003_v11 = vld [vmem:[#allocation2 + $0x210] sm:$0xff]  ;;  %v7286_v25 = vpack.c.bf16 %v1059_v23, %v1051_v21  ;;  %v942_v63 = vld [vmem:[#allocation2 + $0x28] sm:$0xff] }
 0x17a   : > { %5794 = vmatprep.mubr.msk.f32.mxu1 %vm429_vm1, %v580_v13  ;;  %9530 = vst [vmem:[#allocation8_spill] sm:$0xff] %v7197_v26  ;;  %5952 = vmatprep.subr.bf16.mxu0 %v7195_v14  ;;  %v7247_v12 = vpack.c.bf16 %v1009_v5, %v1001_v62  ;;  %v1011_v13 = vld [vmem:[#allocation2 + $0x250] sm:$0xff]  ;;  %v1017_v9 = vld [vmem:[#allocation2 + $0x280] sm:$0xff]  ;;  %v950_v6 = vld [vmem:[#allocation2 + $0x68] sm:$0xff] }
 0x17b   : > { %5984 = vmatprep.subr.bf16.mxu1 %v7197_v26  ;;  %5954 = vmatpush1.bf16.msra.mxu0 %v7199_v27  ;;  %9531 = vst [vmem:[#allocation9_spill] sm:$0xff] %v7245_v3  ;;  %v1025_v10 = vld [vmem:[#allocation2 + $0x2c0] sm:$0xff]  ;;  %9541 = vst [vmem:[#allocation19_spill] sm:$0xff] %v7286_v25  ;;  %v944_v53 = vld [vmem:[#allocation2 + $0x38] sm:$0xff]  ;;  %v7291_v60 = vpack.c.bf16 %v950_v6, %v942_v63 }
 0x17c   : > { %5986 = vmatpush1.bf16.msra.mxu1 %v7202_v30  ;;  %5956 = vmatprep.subr.bf16.mxu0 %v7207_v34  ;;  %v7259_v16 = vpack.c.bf16 %v1025_v10, %v1017_v9  ;;  %v952_v62 = vld [vmem:[#allocation2 + $0x78] sm:$0xff] }
 0x17d   : > { %5795 = vmatmul.mubr.msk.f32.gmra.mrb[10].mxu1 %vm429_vm1, %v581_v0  ;;  %5988 = vmatprep.subr.bf16.mxu1 %v7209_v38  ;;  %v7250_v0 = vpack.c.bf16 %v1011_v13, %v1003_v11  ;;  %9542 = vst [vmem:[#allocation20_spill] sm:$0xff] %v7291_v60  ;;  %v7293_v5 = vpack.c.bf16 %v952_v62, %v944_v53  ;;  %v9359_v11 = vmov 0.0  }
 0x17e   : > { %5797 = vmatprep.mubr.msk.f32.mxu1 %vm429_vm1, %v582_v1  ;;  %v1018_v1 = vld [vmem:[#allocation2 + $0x288] sm:$0xff]  ;;  %1129 = vmatprep.mubr.f32.mxu0 %v9359_v11 }
 0x17f   : > { %5958 = vmatpush1.bf16.msra.mxu0 %v7211_v39  ;;  %9532 = vst [vmem:[#allocation10_spill] sm:$0xff] %v7250_v0  ;;  %9543 = vst [vmem:[#allocation21_spill] sm:$0xff] %v7293_v5 }
 0x180   : > { %5990 = vmatpush1.bf16.msra.mxu1 %v7214_v42  ;;  %5960 = vmatprep.subr.bf16.mxu0 %v7219_v46 }
 0x181   : > { %5798 = vmatmul.mubr.msk.f32.gmra.mrb[12].mxu1 %vm429_vm1, %v583_v2  ;;  %5992 = vmatprep.subr.bf16.mxu1 %v7221_v50  ;;  %v1026_v2 = vld [vmem:[#allocation2 + $0x2c8] sm:$0xff] }
 0x182   : > { %5800 = vmatprep.mubr.msk.f32.mxu1 %vm429_vm1, %v584_v4  ;;  %v1020_v4 = vld [vmem:[#allocation2 + $0x298] sm:$0xff] }
 0x183   : > { %5962 = vmatpush1.bf16.msra.mxu0 %v7223_v51  ;;  %v7257_v15 = vpack.c.bf16 %v1028_v8, %v1020_v4 }
 0x184   : > { %5994 = vmatpush1.bf16.msra.mxu1 %v7226_v55  ;;  %5964 = vmatprep.subr.bf16.mxu0 %v7231_v18 }
 0x185   : > { %5801 = vmatmul.mubr.msk.f32.gmra.mrb[14].mxu1 %vm429_vm1, %v585_v7  ;;  %5996 = vmatprep.subr.bf16.mxu1 %v7233_v59  ;;  %v7255_v7 = vpack.c.bf16 %v1026_v2, %v1018_v1  ;;  %9533 = vst [vmem:[#allocation11_spill] sm:$0xff] %v7257_v15 }
 0x186   : > { %1242 = vmatprep.mubr.f32.mxu1 %v9359_v11 }
 0x187   : > { %5966 = vmatpush1.bf16.msra.mxu0 %v7235_v22 }
 0x188   : > { %5998 = vmatpush1.bf16.msra.mxu1 %v7238_v61  ;;  %5968 = vmatprep.subr.bf16.mxu0 %v7243_v56 }
 0x189   : > { %6000 = vmatprep.subr.bf16.mxu1 %v7245_v3 }
 0x18b   : > { %5970 = vmatpush1.bf16.msra.mxu0 %v7247_v12 }
 0x18c   : > { %6002 = vmatpush1.bf16.msra.mxu1 %v7250_v0  ;;  %5972 = vmatprep.subr.bf16.mxu0 %v7255_v7 }
 0x18d   : > { %6004 = vmatprep.subr.bf16.mxu1 %v7257_v15 }
 0x18f   : > { %5974 = vmatpush1.bf16.msra.mxu0 %v7259_v16 }
 0x190   : > { %6006 = vmatpush1.bf16.msra.mxu1 %v7262_v29  ;;  %5976 = vmatprep.subr.bf16.mxu0 %v7267_v35 }
 0x191   : > { %6008 = vmatprep.subr.bf16.mxu1 %v7269_v41 }
 0x193   : > { %5978 = vmatpush1.bf16.msra.mxu0 %v7271_v43 }
 0x194   : > { %6010 = vmatpush1.bf16.msra.mxu1 %v7274_v47  ;;  %5980 = vmatprep.subr.bf16.mxu0 %v7279_v54 }
 0x195   : > { %6012 = vmatprep.subr.bf16.mxu1 %v7281_v19 }
 0x197   : > { %5982 = vmatpush1.bf16.msra.mxu0 %v7283_v20 }
 0x198   : > { %6014 = vmatpush1.bf16.msra.mxu1 %v7286_v25  ;;  %6016 = vmatprep.subr.bf16.mxu0 %v7291_v60 }
 0x199   : > { %6048 = vmatprep.subr.bf16.mxu1 %v7293_v5 }
 0x238   : > { %v5781_v13 = vpop.f32.mrb[0].mxu1 }
 0x239   : > { %v708_v1 = vpop.f32.mrb[1].mxu1 }
 0x23a   : > { %v787_v2 = vadd.f32 %v5781_v13, %v708_v1 }
 0x23c   : > { %v5784_v4 = vpop.f32.mrb[2].mxu1 }
 0x23d   : > { %v718_v8 = vpop.f32.mrb[3].mxu1 }
 0x23e   : > { %v788_v9 = vadd.f32 %v787_v2, %v718_v8 }
 0x240   : > { %v5787_v10 = vpop.f32.mrb[4].mxu1  ;;  %v789_v17 = vadd.f32 %v5784_v4, %v788_v9 }
 0x241   : > { %v728_v28 = vpop.f32.mrb[5].mxu1 }
 0x242   : > { %v790_v31 = vadd.f32 %v789_v17, %v728_v28 }
 0x244   : > { %v5790_v32 = vpop.f32.mrb[6].mxu1  ;;  %v791_v33 = vadd.f32 %v5787_v10, %v790_v31 }
 0x245   : > { %v738_v36 = vpop.f32.mrb[7].mxu1 }
 0x246   : > { %v792_v37 = vadd.f32 %v791_v33, %v738_v36 }
 0x248   : > { %v793_v40 = vadd.f32 %v5790_v32, %v792_v37 }
 0x24a   : > { %v794_v44 = vrot.slane %v793_v40, 4 }
 0x24c   : > { %v795_v45 = vadd.f32 %v794_v44, %v793_v40  ;;  %v5793_v49 = vpop.f32.mrb[8].mxu1 }
 0x24d   : > { %v748_v52 = vpop.f32.mrb[9].mxu1 }
 0x24e   : > { %v796_v48 = vrot.slane %v795_v45, 2  ;;  %v800_v58 = vadd.f32 %v5793_v49, %v748_v52 }
 0x250   : > { %v797_v57 = vadd.f32 %v796_v48, %v795_v45  ;;  %v5796_v21 = vpop.f32.mrb[10].mxu1 }
 0x251   : > { %v758_v23 = vpop.f32.mrb[11].mxu1 }
 0x252   : > { %v798_v24 = vrot.slane %v797_v57, 1  ;;  %v801_v6 = vadd.f32 %v800_v58, %v758_v23 }
 0x254   : > { %v799_v63 = vadd.f32 %v798_v24, %v797_v57  ;;  %v5799_v62 = vpop.f32.mrb[12].mxu1  ;;  %v802_v2 = vadd.f32 %v5796_v21, %v801_v6 }
 0x255   : > { %v768_v9 = vpop.f32.mrb[13].mxu1 }
 0x256   : > { %v813_v53 = vmul.f32 0.015625, %v799_v63 }
 0x258   : > { %v7299_v17 = vsub.f32 %v708_v1, %v813_v53  ;;  %v7301_v31 = vsub.f32 %v5781_v13, %v813_v53  ;;  %v7303_v33 = vsub.f32 %v718_v8, %v813_v53  ;;  %v7305_v37 = vsub.f32 %v5784_v4, %v813_v53  ;;  %v5802_v13 = vpop.f32.mrb[14].mxu1 }
 0x259   : > { %v7307_v40 = vsub.f32 %v728_v28, %v813_v53  ;;  %v7309_v44 = vsub.f32 %v5787_v10, %v813_v53  ;;  %v7311_v45 = vsub.f32 %v738_v36, %v813_v53  ;;  %v7313_v48 = vsub.f32 %v5790_v32, %v813_v53  ;;  %v778_v58 = vpop.f32.mrb[15].mxu1 }
 0x25a   : > { %v831_v57 = vmul.f32 %v7299_v17, %v7299_v17  ;;  %v832_v1 = vmul.f32 %v7301_v31, %v7301_v31  ;;  %v833_v4 = vmul.f32 %v7303_v33, %v7303_v33  ;;  %v803_v28 = vadd.f32 %v802_v2, %v768_v9 }
 0x25b   : > { %v834_v10 = vmul.f32 %v7305_v37, %v7305_v37  ;;  %v835_v32 = vmul.f32 %v7307_v40, %v7307_v40  ;;  %v836_v53 = vmul.f32 %v7309_v44, %v7309_v44  ;;  %v837_v60 = vmul.f32 %v7311_v45, %v7311_v45 }
 0x25c   : > { %v847_v8 = vadd.f32 %v832_v1, %v831_v57  ;;  %v804_v24 = vadd.f32 %v5799_v62, %v803_v28  ;;  %v838_v1 = vmul.f32 %v7313_v48, %v7313_v48 }
 0x25e   : > { %v848_v36 = vadd.f32 %v847_v8, %v833_v4  ;;  %v805_v6 = vadd.f32 %v804_v24, %v778_v58 }
 0x260   : > { %v849_v63 = vadd.f32 %v848_v36, %v834_v10  ;;  %v806_v5 = vadd.f32 %v5802_v13, %v805_v6 }
 0x262   : > { %v850_v11 = vadd.f32 %v849_v63, %v835_v32  ;;  %v807_v2 = vrot.slane %v806_v5, 4 }
 0x264   : > { %v851_v57 = vadd.f32 %v850_v11, %v836_v53  ;;  %v808_v8 = vadd.f32 %v807_v2, %v806_v5 }
 0x266   : > { %v852_v4 = vadd.f32 %v851_v57, %v837_v60  ;;  %v809_v25 = vrot.slane %v808_v8, 2 }
 0x268   : > { %v853_v28 = vadd.f32 %v852_v4, %v838_v1  ;;  %v810_v10 = vadd.f32 %v809_v25, %v808_v8 }
 0x26a   : > { %v854_v20 = vrot.slane %v853_v28, 4  ;;  %v811_v24 = vrot.slane %v810_v10, 1 }
 0x26c   : > { %v855_v36 = vadd.f32 %v854_v20, %v853_v28  ;;  %v812_v54 = vadd.f32 %v811_v24, %v810_v10  ;;  %v949_v24 = vld [vmem:[#allocation2 + $0x60] sm:$0xff] }
 0x26e   : > { %v856_v19 = vrot.slane %v855_v36, 2  ;;  %v814_v63 = vmul.f32 0.015625, %v812_v54 }
 0x270   : > { %v857_v32 = vadd.f32 %v856_v19, %v855_v36  ;;  %v7331_v47 = vsub.f32 %v748_v52, %v814_v63  ;;  %v7333_v11 = vsub.f32 %v5793_v49, %v814_v63  ;;  %v7335_v53 = vsub.f32 %v758_v23, %v814_v63  ;;  %v941_v36 = vld [vmem:[#allocation2 + $0x20] sm:$0xff] }
 0x271   : > { %v7337_v43 = vsub.f32 %v5796_v21, %v814_v63  ;;  %v7339_v60 = vsub.f32 %v768_v9, %v814_v63  ;;  %v7341_v5 = vsub.f32 %v5799_v62, %v814_v63  ;;  %v7343_v25 = vsub.f32 %v778_v58, %v814_v63 }
 0x272   : > { %v858_v6 = vrot.slane %v857_v32, 1  ;;  %v7345_v57 = vsub.f32 %v5802_v13, %v814_v63  ;;  %v839_v54 = vmul.f32 %v7331_v47, %v7331_v47  ;;  %v840_v19 = vmul.f32 %v7333_v11, %v7333_v11  ;;  %v951_v63 = vld [vmem:[#allocation2 + $0x70] sm:$0xff] }
 0x273   : > { %v841_v52 = vmul.f32 %v7335_v53, %v7335_v53  ;;  %v842_v62 = vmul.f32 %v7337_v43, %v7337_v43  ;;  %v843_v13 = vmul.f32 %v7339_v60, %v7339_v60  ;;  %v844_v2 = vmul.f32 %v7341_v5, %v7341_v5 }
 0x274   : > { %v859_v20 = vadd.f32 %v858_v6, %v857_v32  ;;  %v860_v21 = vadd.f32 %v840_v19, %v839_v54  ;;  %v845_v4 = vmul.f32 %v7343_v25, %v7343_v25  ;;  %v846_v28 = vmul.f32 %v7345_v57, %v7345_v57  ;;  %v943_v32 = vld [vmem:[#allocation2 + $0x30] sm:$0xff] }
 0x275   : > { %v7363_v19 = vpack.c.bf16 %v949_v24, %v941_v36 }
 0x276   : > { %v873_v49 = vmul.f32 0.015625, %v859_v20  ;;  %v861_v9 = vadd.f32 %v860_v21, %v841_v52  ;;  %v958_v52 = vld [vmem:[#allocation2 + $0xa8] sm:$0xff] }
 0x277   : > { %9544 = vst [vmem:[#allocation22_spill] sm:$0xff] %v7363_v19 }
 0x278   : > { %v875_v23 = vadd.f32 1e-05, %v873_v49  ;;  %v862_v58 = vadd.f32 %v861_v9, %v842_v62  ;;  %v7365_v49 = vpack.c.bf16 %v951_v63, %v943_v32  ;;  %v967_v32 = vld [vmem:[#allocation2 + $0xf0] sm:$0xff] }
 0x27a   : > { %6603 = vrsqrt.f32 %v875_v23  ;;  %v863_v1 = vadd.f32 %v862_v58, %v843_v13  ;;  %9545 = vst [vmem:[#allocation23_spill] sm:$0xff] %v7365_v49  ;;  %v966_v13 = vld [vmem:[#allocation2 + $0xe8] sm:$0xff]  ;;  %v960_v58 = vld [vmem:[#allocation2 + $0xb8] sm:$0xff] }
 0x27b   : > { %v7387_v36 = vpack.c.bf16 %v966_v13, %v958_v52  ;;  %v9552_v13 = vmov 0.0  }
 0x27c   : > { %v864_v8 = vadd.f32 %v863_v1, %v844_v2  ;;  %v968_v2 = vld [vmem:[#allocation2 + $0xf8] sm:$0xff] }
 0x27d   : > { %9547 = vst [vmem:[#allocation25_spill] sm:$0xff] %v7387_v36 }
 0x27e   : > { %v865_v10 = vadd.f32 %v864_v8, %v845_v4 }
 0x280   : > { %v866_v6 = vadd.f32 %v865_v10, %v846_v28 }
 0x282   : > { %v867_v54 = vrot.slane %v866_v6, 4 }
 0x284   : > { %v6604_v20 = vpop.eup %6603  ;;  %v868_v24 = vadd.f32 %v867_v54, %v866_v6  ;;  %v974_v6 = vld [vmem:[#allocation2 + $0x128] sm:$0xff] }
 0x285   : > { %v879_v21 = vmul.f32 %v6604_v20, %v7299_v17  ;;  %v880_v23 = vmul.f32 %v6604_v20, %v7301_v31  ;;  %v881_v62 = vmul.f32 %v6604_v20, %v7303_v33  ;;  %v882_v9 = vmul.f32 %v6604_v20, %v7305_v37 }
 0x286   : > { %v883_v1 = vmul.f32 %v6604_v20, %v7307_v40  ;;  %v884_v4 = vmul.f32 %v6604_v20, %v7309_v44  ;;  %v885_v8 = vmul.f32 %v6604_v20, %v7311_v45  ;;  %v7375_v28 = vmul.f32 %v6604_v20, %v7313_v48  ;;  %v957_v44 = vld [vmem:[#allocation2 + $0xa0] sm:$0xff]  ;;  %v959_v48 = vld [vmem:[#allocation2 + $0xb0] sm:$0xff] }
 0x287   : > { %v7377_v10 = vmax.f32 %v879_v21, 0.0  ;;  %v7379_v17 = vmax.f32 %v880_v23, 0.0  ;;  %v7381_v31 = vmax.f32 %v881_v62, 0.0  ;;  %v7383_v33 = vmax.f32 %v882_v9, 0.0  ;;  %v965_v45 = vld [vmem:[#allocation2 + $0xe0] sm:$0xff]  ;;  %v982_v21 = vld [vmem:[#allocation2 + $0x168] sm:$0xff] }
 0x288   : > { %v7385_v37 = vmax.f32 %v883_v1, 0.0  ;;  %v7389_v40 = vpack.c.bf16 %v968_v2, %v960_v58  ;;  %v869_v52 = vrot.slane %v868_v24, 2  ;;  %v976_v23 = vld [vmem:[#allocation2 + $0x138] sm:$0xff]  ;;  %v7407_v9 = vmax.f32 %v884_v4, 0.0 }
 0x289   : > { %2724 = vxpose.xlu1.b32.start [1/4] (short) %v7377_v10, 128  ;;  %1130 = vmatmul.mubr.f32.vlgmr.msra.gmra.mrb[16].mxu0 %v7377_v10  ;;  %v7395_v63 = vpack.c.bf16 %v7379_v17, %v7377_v10  ;;  %v7399_v20 = vpack.c.bf16 %v7383_v33, %v7381_v31  ;;  %v911_v54 = vadd.f32 %v7379_v17, %v7377_v10  ;;  %v984_v62 = vld [vmem:[#allocation2 + $0x178] sm:$0xff] }
 0x28a   : > { %9546 = vst [vmem:[#allocation24_spill] sm:$0xff] %v7385_v37  ;;  %9548 = vst [vmem:[#allocation26_spill] sm:$0xff] %v7389_v40  ;;  %2273 = vxpose.xlu0.b32.start [1/4] (short) %v7385_v37, 128  ;;  %1243 = vmatmul.mubr.f32.vlgmr.msra.gmra.mrb[16].mxu1 %v7377_v10  ;;  %v7411_v58 = vpack.c.bf16 %v965_v45, %v957_v44  ;;  %v7413_v2 = vpack.c.bf16 %v967_v32, %v959_v48  ;;  %v981_v44 = vld [vmem:[#allocation2 + $0x160] sm:$0xff]  ;;  %v975_v45 = vld [vmem:[#allocation2 + $0x130] sm:$0xff] }
 0x28b   : > { %9549 = vst [vmem:[#allocation27_spill] sm:$0xff] %v7395_v63  ;;  %9550 = vst [vmem:[#allocation28_spill] sm:$0xff] %v7399_v20  ;;  %6018 = vmatpush1.bf16.msra.mxu0 %v7363_v19  ;;  %6050 = vmatpush1.bf16.msra.mxu1 %v7365_v49  ;;  %v912_v1 = vadd.f32 %v911_v54, %v7381_v31  ;;  %v870_v20 = vadd.f32 %v869_v52, %v868_v24  ;;  %v973_v63 = vld [vmem:[#allocation2 + $0x120] sm:$0xff]  ;;  %v983_v48 = vld [vmem:[#allocation2 + $0x170] sm:$0xff] }
 0x28c   : > { %9551 = vst [vmem:[#allocation29_spill] sm:$0xff] %v7407_v9  ;;  %1135 = vmatprep.mubr.f32.mxu0 %v9552_v13  ;;  %1248 = vmatprep.mubr.f32.mxu1 %v9552_v13  ;;  %9553 = vst [vmem:[#allocation30_spill] sm:$0xff] %v7411_v58  ;;  %v7420_v4 = vpack.c.bf16 %v982_v21, %v974_v6  ;;  %v7422_v49 = vpack.c.bf16 %v984_v62, %v976_v23  ;;  %v990_v24 = vld [vmem:[#allocation2 + $0x1a8] sm:$0xff]  ;;  %v992_v6 = vld [vmem:[#allocation2 + $0x1b8] sm:$0xff]  ;;  %v7429_v23 = vmax.f32 %v885_v8, 0.0 }
 0x28d   : > { %9554 = vst [vmem:[#allocation31_spill] sm:$0xff] %v7413_v2  ;;  %6020 = vmatprep.subr.bf16.mxu0 %v7387_v36  ;;  %6052 = vmatprep.subr.bf16.mxu1 %v7389_v40  ;;  %v913_v32 = vadd.f32 %v912_v1, %v7383_v33  ;;  %v871_v54 = vrot.slane %v870_v20, 1  ;;  %v998_v52 = vld [vmem:[#allocation2 + $0x1e8] sm:$0xff]  ;;  %v1000_v21 = vld [vmem:[#allocation2 + $0x1f8] sm:$0xff]  ;;  %v7433_v1 = vpack.c.bf16 %v981_v44, %v973_v63  ;;  %v991_v36 = vld [vmem:[#allocation2 + $0x1b0] sm:$0xff] }
 0x28e   : > { %2274 = vxpose.xlu0.b32.cont [2/4] (short) %v7407_v9, 128  ;;  %2725 = vxpose.xlu1.b32.cont [2/4] (short) %v7379_v17, 128  ;;  %9555 = vst [vmem:[#allocation32_spill] sm:$0xff] %v7420_v4  ;;  %9556 = vst [vmem:[#allocation33_spill] sm:$0xff] %v7422_v49  ;;  %v7435_v40 = vpack.c.bf16 %v983_v48, %v975_v45  ;;  %v7441_v8 = vpack.c.bf16 %v998_v52, %v990_v24  ;;  %v999_v63 = vld [vmem:[#allocation2 + $0x1f0] sm:$0xff]  ;;  %v1006_v44 = vld [vmem:[#allocation2 + $0x228] sm:$0xff]  ;;  %v7450_v24 = vmax.f32 %v7375_v28, 0.0 }
 0x28f   : > { %1136 = vmatmul.mubr.f32.gmra.mrb[18].mxu0 %v7379_v17  ;;  %1249 = vmatmul.mubr.f32.gmra.mrb[18].mxu1 %v7379_v17  ;;  %v872_v62 = vadd.f32 %v871_v54, %v870_v20  ;;  %9557 = vst [vmem:[#allocation34_spill] sm:$0xff] %v7433_v1  ;;  %v7443_v20 = vpack.c.bf16 %v1000_v21, %v992_v6  ;;  %v997_v54 = vld [vmem:[#allocation2 + $0x1e0] sm:$0xff]  ;;  %v1014_v48 = vld [vmem:[#allocation2 + $0x268] sm:$0xff]  ;;  %v1023_v19 = vld [vmem:[#allocation2 + $0x2b0] sm:$0xff] }
 0x290   : > { %6022 = vmatpush1.bf16.msra.mxu0 %v7411_v58  ;;  %6054 = vmatpush1.bf16.msra.mxu1 %v7413_v2  ;;  %9558 = vst [vmem:[#allocation35_spill] sm:$0xff] %v7435_v40  ;;  %v989_v58 = vld [vmem:[#allocation2 + $0x1a0] sm:$0xff]  ;;  %9559 = vst [vmem:[#allocation36_spill] sm:$0xff] %v7441_v8  ;;  %v7456_v6 = vpack.c.bf16 %v999_v63, %v991_v36  ;;  %v7462_v28 = vpack.c.bf16 %v1014_v48, %v1006_v44  ;;  %v1030_v36 = vld [vmem:[#allocation2 + $0x2e8] sm:$0xff] }
 0x291   : > { %1141 = vmatprep.mubr.f32.mxu0 %v9552_v13  ;;  %1254 = vmatprep.mubr.f32.mxu1 %v9552_v13  ;;  %v874_v2 = vmul.f32 0.015625, %v872_v62  ;;  %9560 = vst [vmem:[#allocation37_spill] sm:$0xff] %v7443_v20  ;;  %v1008_v62 = vld [vmem:[#allocation2 + $0x238] sm:$0xff]  ;;  %v7454_v52 = vpack.c.bf16 %v997_v54, %v989_v58  ;;  %v1005_v21 = vld [vmem:[#allocation2 + $0x220] sm:$0xff] }
 0x292   : > { %6024 = vmatprep.subr.bf16.mxu0 %v7420_v4  ;;  %6056 = vmatprep.subr.bf16.mxu1 %v7422_v49  ;;  %v1016_v49 = vld [vmem:[#allocation2 + $0x278] sm:$0xff]  ;;  %9562 = vst [vmem:[#allocation39_spill] sm:$0xff] %v7456_v6  ;;  %v1022_v4 = vld [vmem:[#allocation2 + $0x2a8] sm:$0xff]  ;;  %9563 = vst [vmem:[#allocation40_spill] sm:$0xff] %v7462_v28 }
 0x293   : > { %2275 = vxpose.xlu0.b32.cont [3/4] (short) %v7429_v23, 128  ;;  %2726 = vxpose.xlu1.b32.cont [3/4] (short) %v7381_v31, 128  ;;  %v876_v45 = vadd.f32 1e-05, %v874_v2  ;;  %9561 = vst [vmem:[#allocation38_spill] sm:$0xff] %v7454_v52  ;;  %v1013_v2 = vld [vmem:[#allocation2 + $0x260] sm:$0xff]  ;;  %v7464_v58 = vpack.c.bf16 %v1016_v49, %v1008_v62  ;;  %v1024_v54 = vld [vmem:[#allocation2 + $0x2b8] sm:$0xff]  ;;  %v7477_v49 = vpack.c.bf16 %v1030_v36, %v1022_v4 }
 0x294   : > { %1142 = vmatmul.mubr.f32.gmra.mrb[20].mxu0 %v7381_v31  ;;  %1255 = vmatmul.mubr.f32.gmra.mrb[20].mxu1 %v7381_v31  ;;  %v1032_v63 = vld [vmem:[#allocation2 + $0x2f8] sm:$0xff]  ;;  %v1021_v48 = vld [vmem:[#allocation2 + $0x2a0] sm:$0xff] }
 0x295   : > { %6026 = vmatpush1.bf16.msra.mxu0 %v7433_v1  ;;  %6058 = vmatpush1.bf16.msra.mxu1 %v7435_v40  ;;  %6605 = vrsqrt.f32 %v876_v45  ;;  %v1007_v40 = vld [vmem:[#allocation2 + $0x230] sm:$0xff]  ;;  %9564 = vst [vmem:[#allocation41_spill] sm:$0xff] %v7464_v58  ;;  %v914_v45 = vadd.f32 %v913_v32, %v7385_v37  ;;  %9567 = vst [vmem:[#allocation44_spill] sm:$0xff] %v7477_v49  ;;  %v7479_v44 = vpack.c.bf16 %v1032_v63, %v1024_v54  ;;  %v1029_v62 = vld [vmem:[#allocation2 + $0x2e0] sm:$0xff] }
 0x296   : > { %1147 = vmatprep.mubr.f32.mxu0 %v9552_v13  ;;  %1260 = vmatprep.mubr.f32.mxu1 %v9552_v13  ;;  %v1015_v1 = vld [vmem:[#allocation2 + $0x270] sm:$0xff]  ;;  %v7486_v4 = vpack.c.bf16 %v1029_v62, %v1021_v48  ;;  %v1045_v36 = vld [vmem:[#allocation2 + $0x360] sm:$0xff]  ;;  %v1054_v48 = vld [vmem:[#allocation2 + $0x3a8] sm:$0xff] }
 0x297   : > { %6028 = vmatprep.subr.bf16.mxu0 %v7441_v8  ;;  %6060 = vmatprep.subr.bf16.mxu1 %v7443_v20  ;;  %v7471_v20 = vpack.c.bf16 %v1013_v2, %v1005_v21  ;;  %v7473_v8 = vpack.c.bf16 %v1015_v1, %v1007_v40  ;;  %9568 = vst [vmem:[#allocation45_spill] sm:$0xff] %v7479_v44  ;;  %v1031_v32 = vld [vmem:[#allocation2 + $0x2f0] sm:$0xff]  ;;  %v1038_v21 = vld [vmem:[#allocation2 + $0x328] sm:$0xff]  ;;  %v1040_v40 = vld [vmem:[#allocation2 + $0x338] sm:$0xff] }
 0x298   : > { %2276 = vxpose.xlu0.b32.end [4/4] (short) %v7450_v24, 128  ;;  %2727 = vxpose.xlu1.b32.end [4/4] (short) %v7383_v33, 128  ;;  %v1046_v2 = vld [vmem:[#allocation2 + $0x368] sm:$0xff]  ;;  %v1048_v1 = vld [vmem:[#allocation2 + $0x378] sm:$0xff]  ;;  %9569 = vst [vmem:[#allocation46_spill] sm:$0xff] %v7486_v4  ;;  %v1039_v54 = vld [vmem:[#allocation2 + $0x330] sm:$0xff] }
 0x299   : > { %1148 = vmatmul.mubr.f32.gmra.mrb[22].mxu0 %v7383_v33  ;;  %1261 = vmatmul.mubr.f32.gmra.mrb[22].mxu1 %v7383_v33  ;;  %9565 = vst [vmem:[#allocation42_spill] sm:$0xff] %v7471_v20  ;;  %9566 = vst [vmem:[#allocation43_spill] sm:$0xff] %v7473_v8  ;;  %v1047_v63 = vld [vmem:[#allocation2 + $0x370] sm:$0xff]  ;;  %v7494_v37 = vpack.c.bf16 %v1048_v1, %v1040_v40 }
 0x29a   : > { %6030 = vmatpush1.bf16.msra.mxu0 %v7454_v52  ;;  %6062 = vmatpush1.bf16.msra.mxu1 %v7456_v6  ;;  %v1037_v6 = vld [vmem:[#allocation2 + $0x320] sm:$0xff]  ;;  %v915_v52 = vadd.f32 %v914_v45, %v7407_v9 }
 0x29b   : > { %1153 = vmatprep.mubr.f32.mxu0 %v9552_v13  ;;  %1266 = vmatprep.mubr.f32.mxu1 %v9552_v13  ;;  %9572 = vst [vmem:[#allocation49_spill] sm:$0xff] %v7494_v37  ;;  %v7496_v9 = vpack.c.bf16 %v1045_v36, %v1037_v6  ;;  %v1055_v36 = vld [vmem:[#allocation2 + $0x3b0] sm:$0xff] }
 0x29c   : > { %6032 = vmatprep.subr.bf16.mxu0 %v7462_v28  ;;  %6064 = vmatprep.subr.bf16.mxu1 %v7464_v58  ;;  %v7490_v58 = vpack.c.bf16 %v1031_v32, %v1023_v19  ;;  %v7492_v28 = vpack.c.bf16 %v1046_v2, %v1038_v21  ;;  %v916_v62 = vadd.f32 %v915_v52, %v7429_v23  ;;  %v1062_v32 = vld [vmem:[#allocation2 + $0x3e8] sm:$0xff]  ;;  %v1056_v21 = vld [vmem:[#allocation2 + $0x3b8] sm:$0xff] }
 0x29d   : > { %9573 = vst [vmem:[#allocation50_spill] sm:$0xff] %v7496_v9  ;;  %v1064_v2 = vld [vmem:[#allocation2 + $0x3f8] sm:$0xff] }
 0x29e   : > { %6034 = vmatpush1.bf16.msra.mxu0 %v7471_v20  ;;  %6066 = vmatpush1.bf16.msra.mxu1 %v7473_v8  ;;  %9570 = vst [vmem:[#allocation47_spill] sm:$0xff] %v7490_v58  ;;  %9571 = vst [vmem:[#allocation48_spill] sm:$0xff] %v7492_v28  ;;  %v7498_v20 = vpack.c.bf16 %v1047_v63, %v1039_v54  ;;  %v1063_v54 = vld [vmem:[#allocation2 + $0x3f0] sm:$0xff] }
 0x29f   : > { %6036 = vmatprep.subr.bf16.mxu0 %v7477_v49  ;;  %6068 = vmatprep.subr.bf16.mxu1 %v7479_v44  ;;  %v6606_v45 = vpop.eup %6605 }
 0x2a0   : > { %9574 = vst [vmem:[#allocation51_spill] sm:$0xff] %v7498_v20  ;;  %v887_v8 = vmul.f32 %v6606_v45, %v7331_v47  ;;  %v888_v49 = vmul.f32 %v6606_v45, %v7333_v11  ;;  %v889_v44 = vmul.f32 %v6606_v45, %v7335_v53  ;;  %v890_v19 = vmul.f32 %v6606_v45, %v7337_v43 }
 0x2a1   : > { %v891_v6 = vmul.f32 %v6606_v45, %v7339_v60  ;;  %v892_v40 = vmul.f32 %v6606_v45, %v7341_v5  ;;  %v893_v1 = vmul.f32 %v6606_v45, %v7343_v25  ;;  %v894_v52 = vmul.f32 %v6606_v45, %v7345_v57  ;;  %v1053_v60 = vld [vmem:[#allocation2 + $0x3a0] sm:$0xff] }
 0x2a2   : > { %6038 = vmatpush1.bf16.msra.mxu0 %v7486_v4  ;;  %6070 = vmatpush1.bf16.msra.mxu1 %v7490_v58  ;;  %v7511_v47 = vmax.f32 %v887_v8, 0.0  ;;  %v7513_v11 = vmax.f32 %v888_v49, 0.0  ;;  %v7515_v43 = vmax.f32 %v889_v44, 0.0  ;;  %v7517_v53 = vmax.f32 %v890_v19, 0.0  ;;  %v1061_v57 = vld [vmem:[#allocation2 + $0x3e0] sm:$0xff] }
 0x2a3   : > { %6040 = vmatprep.subr.bf16.mxu0 %v7492_v28  ;;  %6072 = vmatprep.subr.bf16.mxu1 %v7494_v37  ;;  %v7521_v5 = vpack.c.bf16 %v1062_v32, %v1054_v48  ;;  %v7523_v25 = vpack.c.bf16 %v1064_v2, %v1056_v21  ;;  %v917_v44 = vadd.f32 %v916_v62, %v7450_v24  ;;  %v7551_v62 = vmax.f32 %v891_v6, 0.0 }
 0x2a4   : > { %1154 = vmatmul.mubr.f32.gmra.mrb[24].mxu0 %v7511_v47  ;;  %1267 = vmatmul.mubr.f32.gmra.mrb[24].mxu1 %v7511_v47  ;;  %v7529_v8 = vpack.c.bf16 %v7513_v11, %v7511_v47  ;;  %v7533_v49 = vpack.c.bf16 %v7517_v53, %v7515_v43  ;;  %v924_v63 = vadd.f32 %v7513_v11, %v7511_v47  ;;  %v7558_v2 = vmax.f32 %v892_v40, 0.0 }
 0x2a5   : > { %9575 = vst [vmem:[#allocation52_spill] sm:$0xff] %v7521_v5  ;;  %9576 = vst [vmem:[#allocation53_spill] sm:$0xff] %v7523_v25  ;;  %1159 = vmatprep.mubr.f32.mxu0 %v9552_v13  ;;  %1272 = vmatprep.mubr.f32.mxu1 %v9552_v13  ;;  %v7542_v45 = vpack.c.bf16 %v1061_v57, %v1053_v60  ;;  %v7544_v48 = vpack.c.bf16 %v1063_v54, %v1055_v36  ;;  %v918_v32 = vrot.slane %v917_v44, 4 }
 0x2a6   : > { %6042 = vmatpush1.bf16.msra.mxu0 %v7496_v9  ;;  %6074 = vmatpush1.bf16.msra.mxu1 %v7498_v20  ;;  %v925_v19 = vadd.f32 %v924_v63, %v7515_v43  ;;  %v7565_v60 = vmax.f32 %v893_v1, 0.0  ;;  %v7570_v36 = vmax.f32 %v894_v52, 0.0 }
 0x2a7   : > { %9577 = vst [vmem:[#allocation54_spill] sm:$0xff] %v7542_v45  ;;  %9578 = vst [vmem:[#allocation55_spill] sm:$0xff] %v7544_v48  ;;  %6044 = vmatprep.subr.bf16.mxu0 %v7521_v5  ;;  %6076 = vmatprep.subr.bf16.mxu1 %v7523_v25  ;;  %v919_v57 = vadd.f32 %v918_v32, %v917_v44 }
 0x2a8   : > { %1160 = vmatmul.mubr.f32.gmra.mrb[26].mxu0 %v7513_v11  ;;  %1273 = vmatmul.mubr.f32.gmra.mrb[26].mxu1 %v7513_v11  ;;  %v926_v21 = vadd.f32 %v925_v19, %v7517_v53 }
 0x2a9   : > { %1165 = vmatprep.mubr.f32.mxu0 %v9552_v13  ;;  %1278 = vmatprep.mubr.f32.mxu1 %v9552_v13  ;;  %v920_v1 = vrot.slane %v919_v57, 2 }
 0x2aa   : > { %6046 = vmatpush1.bf16.msra.mxu0 %v7542_v45  ;;  %6078 = vmatpush1.bf16.msra.mxu1 %v7544_v48  ;;  %v927_v6 = vadd.f32 %v926_v21, %v7551_v62 }
 0x2ab   : > { %6080 = vmatprep.subr.bf16.mxu0 %v7195_v14  ;;  %6112 = vmatprep.subr.bf16.mxu1 %v7197_v26  ;;  %v921_v52 = vadd.f32 %v920_v1, %v919_v57  ;;  %v9582_v1 = vld [vmem:[#allocation17_spill] sm:$0xff] }
 0x2ac   : > { %1166 = vmatmul.mubr.f32.gmra.mrb[28].mxu0 %v7515_v43  ;;  %1279 = vmatmul.mubr.f32.gmra.mrb[28].mxu1 %v7515_v43  ;;  %v928_v40 = vadd.f32 %v927_v6, %v7558_v2 }
 0x2ad   : > { %1171 = vmatprep.mubr.f32.mxu0 %v9552_v13  ;;  %1284 = vmatprep.mubr.f32.mxu1 %v9552_v13 }
 0x2ae   : > { %v929_v54 = vadd.f32 %v928_v40, %v7565_v60 }
 0x2b0   : > { %1172 = vmatmul.mubr.f32.gmra.mrb[30].mxu0 %v7517_v53  ;;  %1285 = vmatmul.mubr.f32.gmra.mrb[30].mxu1 %v7517_v53  ;;  %v930_v63 = vadd.f32 %v929_v54, %v7570_v36  ;;  %v9581_v54 = vld [vmem:[#allocation16_spill] sm:$0xff] }
 0x2b1   : > { %1355 = vmatprep.mubr.f32.mxu0 %v9552_v13  ;;  %1468 = vmatprep.mubr.f32.mxu1 %v9552_v13 }
 0x2b2   : > { %v931_v19 = vrot.slane %v930_v63, 4 }
 0x2b4   : > { %1356 = vmatmul.mubr.f32.vlgmr.msra.gmra.mrb[32].mxu0 %v7377_v10  ;;  %1469 = vmatmul.mubr.f32.vlgmr.msra.gmra.mrb[32].mxu1 %v7377_v10  ;;  %v932_v44 = vadd.f32 %v931_v19, %v930_v63  ;;  %v922_v10 = vrot.slane %v921_v52, 1  ;;  %v9583_v63 = vld [vmem:[#allocation18_spill] sm:$0xff]  ;;  %v9584_v19 = vld [vmem:[#allocation19_spill] sm:$0xff] }
 0x2b5   : > { %6082 = vmatpush1.bf16.msra.mxu0 %v7199_v27  ;;  %6114 = vmatpush1.bf16.msra.mxu1 %v7202_v30 }
 0x2b6   : > { %1361 = vmatprep.mubr.f32.mxu0 %v9552_v13  ;;  %1474 = vmatprep.mubr.f32.mxu1 %v9552_v13  ;;  %v933_v32 = vrot.slane %v932_v44, 2 }
 0x2b7   : > { %6084 = vmatprep.subr.bf16.mxu0 %v7207_v34  ;;  %6116 = vmatprep.subr.bf16.mxu1 %v7209_v38 }
 0x2b8   : > { %1362 = vmatmul.mubr.f32.gmra.mrb[34].mxu0 %v7379_v17  ;;  %1475 = vmatmul.mubr.f32.gmra.mrb[34].mxu1 %v7379_v17  ;;  %v934_v21 = vadd.f32 %v933_v32, %v932_v44  ;;  %v923_v17 = vadd.f32 %v922_v10, %v921_v52  ;;  %v9585_v52 = vld [vmem:[#allocation20_spill] sm:$0xff]  ;;  %v9586_v44 = vld [vmem:[#allocation21_spill] sm:$0xff]  ;;  %v9588_v10 = vld [vmem:[#allocation22_spill] sm:$0xff] }
 0x2b9   : > { %6086 = vmatpush1.bf16.msra.mxu0 %v7211_v39  ;;  %6118 = vmatpush1.bf16.msra.mxu1 %v7214_v42  ;;  %v9587_v32 = vld [vmem:[#allocation24_spill] sm:$0xff] }
 0x2ba   : > { %1367 = vmatprep.mubr.f32.mxu0 %v9552_v13  ;;  %1480 = vmatprep.mubr.f32.mxu1 %v9552_v13  ;;  %v935_v6 = vrot.slane %v934_v21, 1 }
 0x2bb   : > { %6088 = vmatprep.subr.bf16.mxu0 %v7219_v46  ;;  %6120 = vmatprep.subr.bf16.mxu1 %v7221_v50 }
 0x2bc   : > { %1368 = vmatmul.mubr.f32.gmra.mrb[36].mxu0 %v7381_v31  ;;  %1481 = vmatmul.mubr.f32.gmra.mrb[36].mxu1 %v7381_v31  ;;  %v936_v57 = vadd.f32 %v935_v6, %v934_v21  ;;  %v9579_v31 = vld [vmem:[#allocation14_spill] sm:$0xff]  ;;  %v9589_v21 = vld [vmem:[#allocation23_spill] sm:$0xff] }
 0x2bd   : > { %6090 = vmatpush1.bf16.msra.mxu0 %v7223_v51  ;;  %6122 = vmatpush1.bf16.msra.mxu1 %v7226_v55  ;;  %v9591_v6 = vld [vmem:[#allocation26_spill] sm:$0xff] }
 0x2be   : > { %1373 = vmatprep.mubr.f32.mxu0 %v9552_v13  ;;  %1486 = vmatprep.mubr.f32.mxu1 %v9552_v13  ;;  %v7602_v40 = vsel %vm3176_vm2, %v936_v57, %v923_v17  ;;  %v9592_v17 = vld [vmem:[#allocation29_spill] sm:$0xff]  ;;  %v9593_v57 = vld [vmem:[#allocation30_spill] sm:$0xff] }
 0x2bf   : > { %6092 = vmatprep.subr.bf16.mxu0 %v7231_v18  ;;  %6124 = vmatprep.subr.bf16.mxu1 %v7233_v59 }
 0x2c0   : > { %1374 = vmatmul.mubr.f32.gmra.mrb[38].mxu0 %v7383_v33  ;;  %1487 = vmatmul.mubr.f32.gmra.mrb[38].mxu1 %v7383_v33  ;;  %v9580_v33 = vld [vmem:[#allocation15_spill] sm:$0xff] }
 0x2c1   : > { %6094 = vmatpush1.bf16.msra.mxu0 %v7235_v22  ;;  %6126 = vmatpush1.bf16.msra.mxu1 %v7238_v61 }
 0x2c2   : > { %1379 = vmatprep.mubr.f32.mxu0 %v9552_v13  ;;  %1492 = vmatprep.mubr.f32.mxu1 %v9552_v13 }
 0x2c3   : > { %6096 = vmatprep.subr.bf16.mxu0 %v7243_v56  ;;  %6128 = vmatprep.subr.bf16.mxu1 %v7245_v3 }
 0x2c4   : > { %1380 = vmatmul.mubr.f32.gmra.mrb[40].mxu0 %v7511_v47  ;;  %1493 = vmatmul.mubr.f32.gmra.mrb[40].mxu1 %v7511_v47 }
 0x2c5   : > { %6098 = vmatpush1.bf16.msra.mxu0 %v7247_v12  ;;  %6130 = vmatpush1.bf16.msra.mxu1 %v7250_v0 }
 0x2c6   : > { %1385 = vmatprep.mubr.f32.mxu0 %v9552_v13  ;;  %1498 = vmatprep.mubr.f32.mxu1 %v9552_v13 }
 0x2c7   : > { %6100 = vmatprep.subr.bf16.mxu0 %v7255_v7  ;;  %6132 = vmatprep.subr.bf16.mxu1 %v7257_v15 }
 0x2c8   : > { %1386 = vmatmul.mubr.f32.gmra.mrb[42].mxu0 %v7513_v11  ;;  %1499 = vmatmul.mubr.f32.gmra.mrb[42].mxu1 %v7513_v11 }
 0x2c9   : > { %6102 = vmatpush1.bf16.msra.mxu0 %v7259_v16  ;;  %6134 = vmatpush1.bf16.msra.mxu1 %v7262_v29 }
 0x2ca   : > { %1391 = vmatprep.mubr.f32.mxu0 %v9552_v13  ;;  %1504 = vmatprep.mubr.f32.mxu1 %v9552_v13 }
 0x2cb   : > { %6104 = vmatprep.subr.bf16.mxu0 %v7267_v35  ;;  %6136 = vmatprep.subr.bf16.mxu1 %v7269_v41  ;;  %v9608_v41 = vld [vmem:[#allocation45_spill] sm:$0xff] }
 0x2cc   : > { %1392 = vmatmul.mubr.f32.gmra.mrb[44].mxu0 %v7515_v43  ;;  %1505 = vmatmul.mubr.f32.gmra.mrb[44].mxu1 %v7515_v43 }
 0x2cd   : > { %6106 = vmatpush1.bf16.msra.mxu0 %v9579_v31  ;;  %6138 = vmatpush1.bf16.msra.mxu1 %v9580_v33  ;;  %v9606_v33 = vld [vmem:[#allocation43_spill] sm:$0xff] }
 0x2ce   : > { %1397 = vmatprep.mubr.f32.mxu0 %v9552_v13  ;;  %1510 = vmatprep.mubr.f32.mxu1 %v9552_v13 }
 0x2cf   : > { %6108 = vmatprep.subr.bf16.mxu0 %v9581_v54  ;;  %6140 = vmatprep.subr.bf16.mxu1 %v9582_v1  ;;  %v9602_v1 = vld [vmem:[#allocation39_spill] sm:$0xff] }
 0x2d0   : > { %1398 = vmatmul.mubr.f32.gmra.mrb[46].mxu0 %v7517_v53  ;;  %1511 = vmatmul.mubr.f32.gmra.mrb[46].mxu1 %v7517_v53 }
 0x2d1   : > { %6110 = vmatpush1.bf16.msra.mxu0 %v9583_v63  ;;  %6142 = vmatpush1.bf16.msra.mxu1 %v9584_v19  ;;  %v9598_v19 = vld [vmem:[#allocation35_spill] sm:$0xff] }
 0x2d2   : > { %2499 = vxpose.xlu0.b32.start [1/4] (short) %v7551_v62, 128  ;;  %2949 = vxpose.xlu1.b32.start [1/4] (short) %v7511_v47, 128  ;;  %v9590_v47 = vld [vmem:[#allocation25_spill] sm:$0xff] }
 0x2d3   : > { %1725 = vmatprep.mubr.f32.mxu0 %v9552_v13  ;;  %1838 = vmatprep.mubr.f32.mxu1 %v9552_v13 }
 0x2d4   : > { %6144 = vmatprep.subr.bf16.mxu0 %v9585_v52  ;;  %6176 = vmatprep.subr.bf16.mxu1 %v9586_v44  ;;  %v9594_v44 = vld [vmem:[#allocation31_spill] sm:$0xff] }
 0x2d5   : > { %1726 = vmatmul.mubr.f32.vlgmr.msra.gmra.mrb[48].mxu0 %v9587_v32  ;;  %1839 = vmatmul.mubr.f32.vlgmr.msra.gmra.mrb[48].mxu1 %v9587_v32 }
 0x2d6   : > { %6146 = vmatpush1.bf16.msra.mxu0 %v9588_v10  ;;  %6178 = vmatpush1.bf16.msra.mxu1 %v9589_v21  ;;  %v9596_v21 = vld [vmem:[#allocation33_spill] sm:$0xff] }
 0x2d7   : > { %2500 = vxpose.xlu0.b32.cont [2/4] (short) %v7558_v2, 128  ;;  %2950 = vxpose.xlu1.b32.cont [2/4] (short) %v7513_v11, 128  ;;  %v9595_v11 = vld [vmem:[#allocation32_spill] sm:$0xff] }
 0x2d8   : > { %1731 = vmatprep.mubr.f32.mxu0 %v9552_v13  ;;  %1844 = vmatprep.mubr.f32.mxu1 %v9552_v13 }
 0x2d9   : > { %6148 = vmatprep.subr.bf16.mxu0 %v9590_v47  ;;  %6180 = vmatprep.subr.bf16.mxu1 %v9591_v6  ;;  %v9597_v6 = vld [vmem:[#allocation34_spill] sm:$0xff] }
 0x2da   : > { %1732 = vmatmul.mubr.f32.gmra.mrb[50].mxu0 %v9592_v17  ;;  %1845 = vmatmul.mubr.f32.gmra.mrb[50].mxu1 %v9592_v17 }
 0x2db   : > { %6150 = vmatpush1.bf16.msra.mxu0 %v9593_v57  ;;  %6182 = vmatpush1.bf16.msra.mxu1 %v9594_v44  ;;  %v9600_v44 = vld [vmem:[#allocation37_spill] sm:$0xff] }
 0x2dc   : > { %2501 = vxpose.xlu0.b32.cont [3/4] (short) %v7565_v60, 128  ;;  %2951 = vxpose.xlu1.b32.cont [3/4] (short) %v7515_v43, 128  ;;  %v9599_v43 = vld [vmem:[#allocation36_spill] sm:$0xff] }
 0x2dd   : > { %1737 = vmatprep.mubr.f32.mxu0 %v9552_v13  ;;  %1850 = vmatprep.mubr.f32.mxu1 %v9552_v13 }
 0x2de   : > { %6152 = vmatprep.subr.bf16.mxu0 %v9595_v11  ;;  %6184 = vmatprep.subr.bf16.mxu1 %v9596_v21  ;;  %v9601_v21 = vld [vmem:[#allocation38_spill] sm:$0xff] }
 0x2df   : > { %1738 = vmatmul.mubr.f32.gmra.mrb[52].mxu0 %v7429_v23  ;;  %1851 = vmatmul.mubr.f32.gmra.mrb[52].mxu1 %v7429_v23 }
 0x2e0   : > { %6154 = vmatpush1.bf16.msra.mxu0 %v9597_v6  ;;  %6186 = vmatpush1.bf16.msra.mxu1 %v9598_v19  ;;  %v9604_v19 = vld [vmem:[#allocation41_spill] sm:$0xff] }
 0x2e1   : > { %2502 = vxpose.xlu0.b32.end [4/4] (short) %v7570_v36, 128  ;;  %2952 = vxpose.xlu1.b32.end [4/4] (short) %v7517_v53, 128  ;;  %v9603_v53 = vld [vmem:[#allocation40_spill] sm:$0xff] }
 0x2e2   : > { %1743 = vmatprep.mubr.f32.mxu0 %v9552_v13  ;;  %1856 = vmatprep.mubr.f32.mxu1 %v9552_v13 }
 0x2e3   : > { %6156 = vmatprep.subr.bf16.mxu0 %v9599_v43  ;;  %6188 = vmatprep.subr.bf16.mxu1 %v9600_v44  ;;  %v9605_v44 = vld [vmem:[#allocation42_spill] sm:$0xff] }
 0x2e4   : > { %1744 = vmatmul.mubr.f32.gmra.mrb[54].mxu0 %v7450_v24  ;;  %1857 = vmatmul.mubr.f32.gmra.mrb[54].mxu1 %v7450_v24 }
 0x2e5   : > { %6158 = vmatpush1.bf16.msra.mxu0 %v9601_v21  ;;  %6190 = vmatpush1.bf16.msra.mxu1 %v9602_v1  ;;  %v9607_v1 = vld [vmem:[#allocation44_spill] sm:$0xff] }
 0x2e6   : > { %1749 = vmatprep.mubr.f32.mxu0 %v9552_v13  ;;  %1862 = vmatprep.mubr.f32.mxu1 %v9552_v13 }
 0x2e7   : > { %6160 = vmatprep.subr.bf16.mxu0 %v9603_v53  ;;  %6192 = vmatprep.subr.bf16.mxu1 %v9604_v19 }
 0x2e8   : > { %1750 = vmatmul.mubr.f32.gmra.mrb[56].mxu0 %v7551_v62  ;;  %1863 = vmatmul.mubr.f32.gmra.mrb[56].mxu1 %v7551_v62 }
 0x2e9   : > { %6162 = vmatpush1.bf16.msra.mxu0 %v9605_v44  ;;  %6194 = vmatpush1.bf16.msra.mxu1 %v9606_v33 }
 0x2ea   : > { %1755 = vmatprep.mubr.f32.mxu0 %v9552_v13  ;;  %1868 = vmatprep.mubr.f32.mxu1 %v9552_v13 }
 0x2eb   : > { %6164 = vmatprep.subr.bf16.mxu0 %v9607_v1  ;;  %6196 = vmatprep.subr.bf16.mxu1 %v9608_v41 }
 0x2ec   : > { %1756 = vmatmul.mubr.f32.gmra.mrb[58].mxu0 %v7558_v2  ;;  %1869 = vmatmul.mubr.f32.gmra.mrb[58].mxu1 %v7558_v2 }
 0x2ed   : > { %6166 = vmatpush1.bf16.msra.mxu0 %v7486_v4  ;;  %6198 = vmatpush1.bf16.msra.mxu1 %v7490_v58  ;;  %v6215_v58 = vpack.c.bf16 %v7558_v2, %v7551_v62 }
 0x2ee   : > { %1761 = vmatprep.mubr.f32.mxu0 %v9552_v13  ;;  %1874 = vmatprep.mubr.f32.mxu1 %v9552_v13 }
 0x2ef   : > { %6168 = vmatprep.subr.bf16.mxu0 %v7492_v28  ;;  %6200 = vmatprep.subr.bf16.mxu1 %v7494_v37  ;;  %v6207_v37 = vpack.c.bf16 %v9592_v17, %v9587_v32 }
 0x2f0   : > { %1762 = vmatmul.mubr.f32.gmra.mrb[60].mxu0 %v7565_v60  ;;  %1875 = vmatmul.mubr.f32.gmra.mrb[60].mxu1 %v7565_v60 }
 0x2f1   : > { %6170 = vmatpush1.bf16.msra.mxu0 %v7496_v9  ;;  %6202 = vmatpush1.bf16.msra.mxu1 %v7498_v20  ;;  %v6219_v20 = vpack.c.bf16 %v7570_v36, %v7565_v60 }
 0x2f2   : > { %1767 = vmatprep.mubr.f32.mxu0 %v9552_v13  ;;  %1880 = vmatprep.mubr.f32.mxu1 %v9552_v13 }
 0x2f3   : > { %6172 = vmatprep.subr.bf16.mxu0 %v7521_v5  ;;  %6204 = vmatprep.subr.bf16.mxu1 %v7523_v25  ;;  %v6211_v25 = vpack.c.bf16 %v7450_v24, %v7429_v23 }
 0x2f4   : > { %1768 = vmatmul.mubr.f32.gmra.mrb[62].mxu0 %v7570_v36  ;;  %1881 = vmatmul.mubr.f32.gmra.mrb[62].mxu1 %v7570_v36 }
 0x2f5   : > { %6174 = vmatpush1.bf16.msra.mxu0 %v7542_v45  ;;  %6206 = vmatpush1.bf16.msra.mxu1 %v7544_v48 }
 0x2f6   : > { %6208 = vmatprep.subr.bf16.mxu0 %v6207_v37  ;;  %6216 = vmatprep.subr.bf16.mxu1 %v6215_v58 }
 0x2f7   : > { %1951 = vmatprep.mubr.f32.mxu0 %v9552_v13  ;;  %2064 = vmatprep.mubr.f32.mxu1 %v9552_v13 }
 0x2f8   : > { %1952 = vmatmul.mubr.f32.vlgmr.msra.gmra.mrb[64].mxu0 %v9587_v32  ;;  %2065 = vmatmul.mubr.f32.vlgmr.msra.gmra.mrb[64].mxu1 %v9587_v32  ;;  %v9609_v32 = vld [vmem:[#allocation27_spill] sm:$0xff] }
 0x2f9   : > { %6210 = vmatpush3.bf16.msra.mxu0 %v6207_v37  ;;  %6218 = vmatpush3.bf16.msra.mxu1 %v6215_v58 }
 0x2fa   : > { %6212 = vmatprep.subr.bf16.mxu0 %v6211_v25  ;;  %6220 = vmatprep.subr.bf16.mxu1 %v6219_v20 }
 0x2fb   : > { %1957 = vmatprep.mubr.f32.mxu0 %v9552_v13  ;;  %2070 = vmatprep.mubr.f32.mxu1 %v9552_v13 }
 0x2fc   : > { %1958 = vmatmul.mubr.f32.gmra.mrb[66].mxu0 %v9592_v17  ;;  %2071 = vmatmul.mubr.f32.gmra.mrb[66].mxu1 %v9592_v17 }
 0x2fd   : > { %6214 = vmatpush3.bf16.msra.mxu0 %v6211_v25  ;;  %6222 = vmatpush3.bf16.msra.mxu1 %v6219_v20 }
 0x2fe   : > { %6224 = vmatprep.subr.bf16.mxu0 %v9609_v32  ;;  %6232 = vmatprep.subr.bf16.mxu1 %v7529_v8 }
 0x2ff   : > { %1963 = vmatprep.mubr.f32.mxu0 %v9552_v13  ;;  %2076 = vmatprep.mubr.f32.mxu1 %v9552_v13 }
 0x300   : > { %1964 = vmatmul.mubr.f32.gmra.mrb[68].mxu0 %v7429_v23  ;;  %2077 = vmatmul.mubr.f32.gmra.mrb[68].mxu1 %v7429_v23 }
 0x301   : > { %1969 = vmatprep.mubr.f32.mxu0 %v9552_v13  ;;  %2082 = vmatprep.mubr.f32.mxu1 %v9552_v13 }
 0x304   : > { %1970 = vmatmul.mubr.f32.gmra.mrb[70].mxu0 %v7450_v24  ;;  %2083 = vmatmul.mubr.f32.gmra.mrb[70].mxu1 %v7450_v24 }
 0x305   : > { %1975 = vmatprep.mubr.f32.mxu0 %v9552_v13  ;;  %2088 = vmatprep.mubr.f32.mxu1 %v9552_v13 }
 0x308   : > { %1976 = vmatmul.mubr.f32.gmra.mrb[72].mxu0 %v7551_v62  ;;  %2089 = vmatmul.mubr.f32.gmra.mrb[72].mxu1 %v7551_v62 }
 0x309   : > { %1981 = vmatprep.mubr.f32.mxu0 %v9552_v13  ;;  %2094 = vmatprep.mubr.f32.mxu1 %v9552_v13 }
 0x30c   : > { %v2289_v37 = vpop.trf.xlu0  ;;  %v2740_v23 = vpop.trf.xlu1  ;;  %1982 = vmatmul.mubr.f32.gmra.mrb[74].mxu0 %v7558_v2  ;;  %2095 = vmatmul.mubr.f32.gmra.mrb[74].mxu1 %v7558_v2 }
 0x30d   : > { %1987 = vmatprep.mubr.f32.mxu0 %v9552_v13  ;;  %2100 = vmatprep.mubr.f32.mxu1 %v9552_v13 }
 0x310   : > { %v2290_v20 = vpop.trf.xlu0  ;;  %v2741_v24 = vpop.trf.xlu1  ;;  %1988 = vmatmul.mubr.f32.gmra.mrb[76].mxu0 %v7565_v60  ;;  %2101 = vmatmul.mubr.f32.gmra.mrb[76].mxu1 %v7565_v60  ;;  %v9610_v60 = vld [vmem:[#allocation28_spill] sm:$0xff] }
 0x311   : > { %1993 = vmatprep.mubr.f32.mxu0 %v9552_v13  ;;  %2106 = vmatprep.mubr.f32.mxu1 %v9552_v13 }
 0x314   : > { %v2291_v58 = vpop.trf.xlu0  ;;  %v2742_v25 = vpop.trf.xlu1  ;;  %1994 = vmatmul.mubr.f32.gmra.mrb[78].mxu0 %v7570_v36  ;;  %2107 = vmatmul.mubr.f32.gmra.mrb[78].mxu1 %v7570_v36 }
 0x315   : > { %5811 = vmatprep.mubr.msk.f32.mxu0 %vm2305_vm3, %v2289_v37 }
 0x318   : > { %v2292_v62 = vpop.trf.xlu0  ;;  %v2743_v2 = vpop.trf.xlu1  ;;  %5812 = vmatmul.mubr.msk.f32.vlgmr.msra.gmra.mrb[80].mxu0 %vm2305_vm3, %v2290_v20 }
 0x319   : > { %6226 = vmatpush3.bf16.msra.mxu0 %v9609_v32  ;;  %5814 = vmatprep.mubr.msk.f32.mxu0 %vm2305_vm3, %v2291_v58 }
 0x31a   : > { %6228 = vmatprep.subr.bf16.mxu0 %v9610_v60 }
 0x31c   : > { %v2293_v17 = vpop.trf.xlu0  ;;  %v2744_v48 = vpop.trf.xlu1  ;;  %5815 = vmatmul.mubr.msk.f32.gmra.mrb[82].mxu0 %vm2305_vm3, %v2292_v62 }
 0x31d   : > { %6230 = vmatpush3.bf16.msra.mxu0 %v9610_v60  ;;  %5817 = vmatprep.mubr.msk.f32.mxu0 %vm2305_vm3, %v2293_v17 }
 0x31e   : > { %6240 = vmatprep.subr.bf16.mxu0 %v7195_v14 }
 0x320   : > { %v2294_v36 = vpop.trf.xlu0  ;;  %v2745_v37 = vpop.trf.xlu1 }
 0x321   : > { %5818 = vmatmul.mubr.msk.f32.gmra.mrb[84].mxu0 %vm2305_vm3, %v2294_v36 }
 0x324   : > { %v2295_v20 = vpop.trf.xlu0  ;;  %v2746_v32 = vpop.trf.xlu1 }
 0x325   : > { %5820 = vmatprep.mubr.msk.f32.mxu0 %vm2305_vm3, %v2295_v20 }
 0x328   : > { %v2296_v58 = vpop.trf.xlu0  ;;  %v2747_v41 = vpop.trf.xlu1 }
 0x329   : > { %5821 = vmatmul.mubr.msk.f32.gmra.mrb[86].mxu0 %vm2305_vm3, %v2296_v58 }
 0x32c   : > { %v2297_v33 = vpop.trf.xlu0  ;;  %v2748_v62 = vpop.trf.xlu1 }
 0x32d   : > { %5823 = vmatprep.mubr.msk.f32.mxu0 %vm2305_vm3, %v2297_v33 }
 0x330   : > { %v2298_v60 = vpop.trf.xlu0  ;;  %v2749_v17 = vpop.trf.xlu1 }
 0x331   : > { %5824 = vmatmul.mubr.msk.f32.gmra.mrb[88].mxu0 %vm2305_vm3, %v2298_v60 }
 0x334   : > { %v2299_v19 = vpop.trf.xlu0  ;;  %v2750_v29 = vpop.trf.xlu1 }
 0x335   : > { %5826 = vmatprep.mubr.msk.f32.mxu0 %vm2305_vm3, %v2299_v19 }
 0x338   : > { %v2300_v36 = vpop.trf.xlu0  ;;  %v2751_v20 = vpop.trf.xlu1 }
 0x339   : > { %5827 = vmatmul.mubr.msk.f32.gmra.mrb[90].mxu0 %vm2305_vm3, %v2300_v36 }
 0x33c   : > { %v2301_v15 = vpop.trf.xlu0  ;;  %v2752_v58 = vpop.trf.xlu1 }
 0x33d   : > { %5829 = vmatprep.mubr.msk.f32.mxu0 %vm2305_vm3, %v2301_v15 }
 0x340   : > { %v2302_v0 = vpop.trf.xlu0  ;;  %v2753_v3 = vpop.trf.xlu1 }
 0x341   : > { %5830 = vmatmul.mubr.msk.f32.gmra.mrb[92].mxu0 %vm2305_vm3, %v2302_v0 }
 0x344   : > { %v2303_v33 = vpop.trf.xlu0  ;;  %v2754_v19 = vpop.trf.xlu1 }
 0x345   : > { %5832 = vmatprep.mubr.msk.f32.mxu0 %vm2305_vm3, %v2303_v33 }
 0x348   : > { %v2304_v60 = vpop.trf.xlu0  ;;  %v2755_v0 = vpop.trf.xlu1 }
 0x349   : > { %5833 = vmatmul.mubr.msk.f32.gmra.mrb[94].mxu0 %vm2305_vm3, %v2304_v60 }
 0x34a   : > { %5875 = vmatprep.mubr.msk.f32.mxu0 %vm2305_vm3, %v2740_v23 }
 0x34d   : > { %5876 = vmatmul.mubr.msk.f32.vlgmr.msra.gmra.mrb[80].mxu0 %vm2305_vm3, %v2741_v24 }
 0x34e   : > { %6242 = vmatpush1.bf16.msra.mxu0 %v7199_v27  ;;  %5878 = vmatprep.mubr.msk.f32.mxu0 %vm2305_vm3, %v2742_v25 }
 0x34f   : > { %6244 = vmatprep.subr.bf16.mxu0 %v7207_v34 }
 0x351   : > { %5879 = vmatmul.mubr.msk.f32.gmra.mrb[82].mxu0 %vm2305_vm3, %v2743_v2 }
 0x352   : > { %6246 = vmatpush1.bf16.msra.mxu0 %v7211_v39  ;;  %5881 = vmatprep.mubr.msk.f32.mxu0 %vm2305_vm3, %v2744_v48 }
 0x353   : > { %6248 = vmatprep.subr.bf16.mxu0 %v7219_v46 }
 0x355   : > { %5882 = vmatmul.mubr.msk.f32.gmra.mrb[84].mxu0 %vm2305_vm3, %v2745_v37  ;;  %v2515_v15 = vpop.trf.xlu0  ;;  %v7787_v23 = vpop.trf.xlu1 }
 0x356   : > { %6250 = vmatpush1.bf16.msra.mxu0 %v7223_v51  ;;  %5884 = vmatprep.mubr.msk.f32.mxu0 %vm2305_vm3, %v2746_v32 }
 0x357   : > { %6252 = vmatprep.subr.bf16.mxu0 %v7231_v18  ;;  %5843 = vmatprep.mubr.msk.f32.mxu1 %vm2305_vm3, %v2515_v15 }
 0x359   : > { %5885 = vmatmul.mubr.msk.f32.gmra.mrb[86].mxu0 %vm2305_vm3, %v2747_v41  ;;  %v2516_v48 = vpop.trf.xlu0  ;;  %v7794_v24 = vpop.trf.xlu1 }
 0x35a   : > { %6254 = vmatpush1.bf16.msra.mxu0 %v7235_v22  ;;  %5887 = vmatprep.mubr.msk.f32.mxu0 %vm2305_vm3, %v2748_v62 }
 0x35b   : > { %6256 = vmatprep.subr.bf16.mxu0 %v7243_v56  ;;  %5844 = vmatmul.mubr.msk.f32.vlgmr.msra.gmra.mrb[80].mxu1 %vm2305_vm3, %v2516_v48 }
 0x35c   : > { %v1131_v25 = vpop.f32.mrb[16].mxu0  ;;  %6234 = vmatpush3.bf16.msra.mxu1 %v7529_v8 }
 0x35d   : > { %5888 = vmatmul.mubr.msk.f32.gmra.mrb[88].mxu0 %vm2305_vm3, %v2749_v17  ;;  %v1244_v2 = vpop.f32.mrb[16].mxu1  ;;  %v1133_v37 = vpop.f32.mrb[17].mxu0  ;;  %6236 = vmatprep.subr.bf16.mxu1 %v7533_v49 }
 0x35e   : > { %6258 = vmatpush1.bf16.msra.mxu0 %v7247_v12  ;;  %v1246_v41 = vpop.f32.mrb[17].mxu1  ;;  %v2517_v32 = vpop.trf.xlu0  ;;  %5890 = vmatprep.mubr.msk.f32.mxu0 %vm2305_vm3, %v2750_v29 }
 0x35f   : > { %6260 = vmatprep.subr.bf16.mxu0 %v7255_v7  ;;  %v7803_v62 = vpop.trf.xlu1  ;;  %5846 = vmatprep.mubr.msk.f32.mxu1 %vm2305_vm3, %v2517_v32 }
 0x360   : > { %6238 = vmatpush3.bf16.msra.mxu1 %v7533_v49 }
 0x361   : > { %5891 = vmatmul.mubr.msk.f32.gmra.mrb[90].mxu0 %vm2305_vm3, %v2751_v20  ;;  %6272 = vmatprep.subr.bf16.mxu1 %v7197_v26 }
 0x362   : > { %6262 = vmatpush1.bf16.msra.mxu0 %v7259_v16  ;;  %v1137_v8 = vpop.f32.mrb[18].mxu0  ;;  %v1250_v17 = vpop.f32.mrb[18].mxu1  ;;  %5893 = vmatprep.mubr.msk.f32.mxu0 %vm2305_vm3, %v2752_v58 }
 0x363   : > { %v2518_v36 = vpop.trf.xlu0  ;;  %v1517_v33 = vmax.f32 %v1131_v25, %v1137_v8  ;;  %v1535_v60 = vmax.f32 %v1244_v2, %v1250_v17  ;;  %v1139_v29 = vpop.f32.mrb[19].mxu0  ;;  %6264 = vmatprep.subr.bf16.mxu0 %v7267_v35 }
 0x364   : > { %5847 = vmatmul.mubr.msk.f32.gmra.mrb[82].mxu1 %vm2305_vm3, %v2518_v36  ;;  %v1526_v15 = vmax.f32 %v1133_v37, %v1139_v29  ;;  %v1252_v49 = vpop.f32.mrb[19].mxu1  ;;  %v7813_v48 = vpop.trf.xlu1 }
 0x365   : > { %v1544_v20 = vmax.f32 %v1246_v41, %v1252_v49  ;;  %5894 = vmatmul.mubr.msk.f32.gmra.mrb[92].mxu0 %vm2305_vm3, %v2753_v3 }
 0x366   : > { %6266 = vmatpush1.bf16.msra.mxu0 %v9579_v31  ;;  %5896 = vmatprep.mubr.msk.f32.mxu0 %vm2305_vm3, %v2754_v19 }
 0x367   : > { %v2519_v58 = vpop.trf.xlu0  ;;  %v1143_v25 = vpop.f32.mrb[20].mxu0  ;;  %6268 = vmatprep.subr.bf16.mxu0 %v9581_v54 }
 0x368   : > { %5849 = vmatprep.mubr.msk.f32.mxu1 %vm2305_vm3, %v2519_v58  ;;  %v1518_v2 = vmax.f32 %v1517_v33, %v1143_v25  ;;  %v1256_v32 = vpop.f32.mrb[20].mxu1  ;;  %v1145_v8 = vpop.f32.mrb[21].mxu0 }
 0x369   : > { %v1536_v37 = vmax.f32 %v1535_v60, %v1256_v32  ;;  %v1527_v17 = vmax.f32 %v1526_v15, %v1145_v8  ;;  %v1258_v36 = vpop.f32.mrb[21].mxu1  ;;  %5897 = vmatmul.mubr.msk.f32.gmra.mrb[94].mxu0 %vm2305_vm3, %v2755_v0  ;;  %v7821_v41 = vpop.trf.xlu1 }
 0x36a   : > { %v1545_v3 = vmax.f32 %v1544_v20, %v1258_v36  ;;  %6270 = vmatpush1.bf16.msra.mxu0 %v9583_v63  ;;  %3243 = vmatprep.mubr.f32.mxu0 %v9552_v13 }
 0x36b   : > { %v2520_v19 = vpop.trf.xlu0  ;;  %6304 = vmatprep.subr.bf16.mxu0 %v9585_v52 }
 0x36c   : > { %5850 = vmatmul.mubr.msk.f32.gmra.mrb[84].mxu1 %vm2305_vm3, %v2520_v19  ;;  %v1149_v33 = vpop.f32.mrb[22].mxu0  ;;  %v1262_v29 = vpop.f32.mrb[22].mxu1 }
 0x36d   : > { %v7827_v49 = vmax.f32 %v1518_v2, %v1149_v33  ;;  %v7829_v60 = vmax.f32 %v1536_v37, %v1262_v29  ;;  %v1151_v15 = vpop.f32.mrb[23].mxu0  ;;  %v1264_v0 = vpop.f32.mrb[23].mxu1  ;;  %3244 = vmatmul.mubr.f32.vlgmr.msra.gmra.mrb[96].mxu0 %v7602_v40 }
 0x36e   : > { %v7832_v20 = vmax.f32 %v1527_v17, %v1151_v15  ;;  %v7834_v58 = vmax.f32 %v1545_v3, %v1264_v0  ;;  %6306 = vmatpush1.bf16.msra.mxu0 %v9588_v10  ;;  %v7837_v25 = vpop.trf.xlu1  ;;  %3385 = vmatprep.mubr.f32.mxu0 %v9552_v13 }
 0x36f   : > { %v2521_v32 = vpop.trf.xlu0  ;;  %6308 = vmatprep.subr.bf16.mxu0 %v9590_v47 }
 0x370   : > { %5852 = vmatprep.mubr.msk.f32.mxu1 %vm2305_vm3, %v2521_v32 }
 0x372   : > { %6310 = vmatpush1.bf16.msra.mxu0 %v9593_v57  ;;  %v7843_v2 = vpop.trf.xlu1 }
 0x373   : > { %v2522_v8 = vpop.trf.xlu0  ;;  %6312 = vmatprep.subr.bf16.mxu0 %v9595_v11 }
 0x374   : > { %5853 = vmatmul.mubr.msk.f32.gmra.mrb[86].mxu1 %vm2305_vm3, %v2522_v8 }
 0x376   : > { %6314 = vmatpush1.bf16.msra.mxu0 %v9597_v6  ;;  %v7848_v37 = vpop.trf.xlu1 }
 0x377   : > { %v2523_v17 = vpop.trf.xlu0  ;;  %6316 = vmatprep.subr.bf16.mxu0 %v9599_v43  ;;  %v1155_v36 = vpop.f32.mrb[24].mxu0 }
 0x378   : > { %5855 = vmatprep.mubr.msk.f32.mxu1 %vm2305_vm3, %v2523_v17  ;;  %v1268_v3 = vpop.f32.mrb[24].mxu1  ;;  %v1157_v19 = vpop.f32.mrb[25].mxu0 }
 0x379   : > { %v1270_v33 = vpop.f32.mrb[25].mxu1 }
 0x37a   : > { %6318 = vmatpush1.bf16.msra.mxu0 %v9601_v21  ;;  %v7855_v15 = vpop.trf.xlu1 }
 0x37b   : > { %v2524_v29 = vpop.trf.xlu0  ;;  %6320 = vmatprep.subr.bf16.mxu0 %v9603_v53  ;;  %v1161_v0 = vpop.f32.mrb[26].mxu0 }
 0x37c   : > { %5856 = vmatmul.mubr.msk.f32.gmra.mrb[88].mxu1 %vm2305_vm3, %v2524_v29  ;;  %v1274_v32 = vpop.f32.mrb[26].mxu1  ;;  %v1589_v8 = vmax.f32 %v1155_v36, %v1161_v0  ;;  %v1163_v43 = vpop.f32.mrb[27].mxu0 }
 0x37d   : > { %v1607_v6 = vmax.f32 %v1268_v3, %v1274_v32  ;;  %v1276_v11 = vpop.f32.mrb[27].mxu1  ;;  %v1598_v57 = vmax.f32 %v1157_v19, %v1163_v43 }
 0x37e   : > { %6322 = vmatpush1.bf16.msra.mxu0 %v9605_v44  ;;  %v1616_v47 = vmax.f32 %v1270_v33, %v1276_v11  ;;  %v7863_v11 = vpop.trf.xlu1 }
 0x37f   : > { %v2525_v17 = vpop.trf.xlu0  ;;  %6324 = vmatprep.subr.bf16.mxu0 %v9607_v1  ;;  %v1167_v53 = vpop.f32.mrb[28].mxu0  ;;  %v9623_v1 = vld [vmem:[#allocation31_spill] sm:$0xff] }
 0x380   : > { %5858 = vmatprep.mubr.msk.f32.mxu1 %vm2305_vm3, %v2525_v17  ;;  %v1280_v21 = vpop.f32.mrb[28].mxu1  ;;  %v1590_v29 = vmax.f32 %v1589_v8, %v1167_v53  ;;  %v1169_v26 = vpop.f32.mrb[29].mxu0 }
 0x381   : > { %v1608_v10 = vmax.f32 %v1607_v6, %v1280_v21  ;;  %v1282_v52 = vpop.f32.mrb[29].mxu1  ;;  %v1599_v3 = vmax.f32 %v1598_v57, %v1169_v26 }
 0x382   : > { %6326 = vmatpush1.bf16.msra.mxu0 %v7486_v4  ;;  %v1617_v0 = vmax.f32 %v1616_v47, %v1282_v52 }
 0x383   : > { %v2526_v36 = vpop.trf.xlu0  ;;  %6328 = vmatprep.subr.bf16.mxu0 %v7492_v28  ;;  %v1173_v43 = vpop.f32.mrb[30].mxu0 }
 0x384   : > { %5859 = vmatmul.mubr.msk.f32.gmra.mrb[90].mxu1 %vm2305_vm3, %v2526_v36  ;;  %v1286_v19 = vpop.f32.mrb[30].mxu1  ;;  %v7865_v33 = vmax.f32 %v1590_v29, %v1173_v43  ;;  %v1175_v21 = vpop.f32.mrb[31].mxu0 }
 0x385   : > { %v7867_v32 = vmax.f32 %v1608_v10, %v1286_v19  ;;  %v1288_v6 = vpop.f32.mrb[31].mxu1  ;;  %v7870_v8 = vmax.f32 %v1599_v3, %v1175_v21  ;;  %v7879_v29 = vpop.trf.xlu1 }
 0x386   : > { %6330 = vmatpush1.bf16.msra.mxu0 %v7496_v9  ;;  %v7872_v26 = vmax.f32 %v1617_v0, %v1288_v6 }
 0x387   : > { %v2527_v53 = vpop.trf.xlu0  ;;  %6332 = vmatprep.subr.bf16.mxu0 %v7521_v5  ;;  %v1357_v52 = vpop.f32.mrb[32].mxu0 }
 0x388   : > { %5861 = vmatprep.mubr.msk.f32.mxu1 %vm2305_vm3, %v2527_v53  ;;  %v1470_v47 = vpop.f32.mrb[32].mxu1  ;;  %v1359_v57 = vpop.f32.mrb[33].mxu0 }
 0x389   : > { %v1472_v17 = vpop.f32.mrb[33].mxu1 }
 0x38a   : > { %6334 = vmatpush1.bf16.msra.mxu0 %v7542_v45 }
 0x38b   : > { %v2528_v10 = vpop.trf.xlu0  ;;  %6368 = vmatprep.subr.bf16.mxu0 %v7195_v14  ;;  %v1363_v36 = vpop.f32.mrb[34].mxu0 }
 0x38c   : > { %5862 = vmatmul.mubr.msk.f32.gmra.mrb[92].mxu1 %vm2305_vm3, %v2528_v10  ;;  %v1476_v3 = vpop.f32.mrb[34].mxu1  ;;  %v1553_v0 = vmax.f32 %v1357_v52, %v1363_v36  ;;  %v1365_v19 = vpop.f32.mrb[35].mxu0 }
 0x38d   : > { %3386 = vmatmul.mubr.f32.vlgmr.msra.gmra.mrb[98].mxu0 %v7602_v40  ;;  %v1571_v43 = vmax.f32 %v1470_v47, %v1476_v3  ;;  %v1478_v21 = vpop.f32.mrb[35].mxu1  ;;  %v1562_v53 = vmax.f32 %v1359_v57, %v1365_v19 }
 0x38e   : > { %6370 = vmatpush1.bf16.msra.mxu0 %v7199_v27  ;;  %v1580_v45 = vmax.f32 %v1472_v17, %v1478_v21  ;;  %3535 = vmatprep.mubr.f32.mxu0 %v9552_v13 }
 0x38f   : > { %v2529_v6 = vpop.trf.xlu0  ;;  %6372 = vmatprep.subr.bf16.mxu0 %v7207_v34  ;;  %v1369_v14 = vpop.f32.mrb[36].mxu0 }
 0x390   : > { %5864 = vmatprep.mubr.msk.f32.mxu1 %vm2305_vm3, %v2529_v6  ;;  %v1482_v10 = vpop.f32.mrb[36].mxu1  ;;  %v1554_v5 = vmax.f32 %v1553_v0, %v1369_v14  ;;  %v1371_v28 = vpop.f32.mrb[37].mxu0 }
 0x391   : > { %v1572_v9 = vmax.f32 %v1571_v43, %v1482_v10  ;;  %v1484_v52 = vpop.f32.mrb[37].mxu1  ;;  %v1563_v36 = vmax.f32 %v1562_v53, %v1371_v28  ;;  %v7889_v34 = vpop.trf.xlu1 }
 0x392   : > { %6374 = vmatpush1.bf16.msra.mxu0 %v7211_v39  ;;  %v1581_v27 = vmax.f32 %v1580_v45, %v1484_v52 }
 0x393   : > { %v2530_v47 = vpop.trf.xlu0  ;;  %6376 = vmatprep.subr.bf16.mxu0 %v7219_v46  ;;  %v1375_v57 = vpop.f32.mrb[38].mxu0 }
 0x394   : > { %5865 = vmatmul.mubr.msk.f32.gmra.mrb[94].mxu1 %vm2305_vm3, %v2530_v47  ;;  %v1488_v17 = vpop.f32.mrb[38].mxu1  ;;  %v7893_v3 = vmax.f32 %v1554_v5, %v1375_v57  ;;  %v1377_v43 = vpop.f32.mrb[39].mxu0 }
 0x395   : > { %5907 = vmatprep.mubr.msk.f32.mxu1 %vm2305_vm3, %v7787_v23  ;;  %v7895_v0 = vmax.f32 %v1572_v9, %v1488_v17  ;;  %v1490_v39 = vpop.f32.mrb[39].mxu1  ;;  %v7898_v28 = vmax.f32 %v1563_v36, %v1377_v43  ;;  %v9611_v43 = vld [vmem:[#allocation9_spill] sm:$0xff] }
 0x396   : > { %6378 = vmatpush1.bf16.msra.mxu0 %v7223_v51  ;;  %v7900_v46 = vmax.f32 %v1581_v27, %v1490_v39  ;;  %v2977_v51 = vpop.trf.xlu1  ;;  %v1520_v39 = vrot.slane %v7827_v49, 4 }
 0x397   : > { %6380 = vmatprep.subr.bf16.mxu0 %v7231_v18  ;;  %v1381_v45 = vpop.f32.mrb[40].mxu0  ;;  %v1494_v5 = vpop.f32.mrb[40].mxu1 }
 0x398   : > { %5908 = vmatmul.mubr.msk.f32.vlgmr.msra.gmra.mrb[80].mxu1 %vm2305_vm3, %v7794_v24  ;;  %v1383_v9 = vpop.f32.mrb[41].mxu0  ;;  %v1496_v23 = vpop.f32.mrb[41].mxu1 }
 0x399   : > { %6274 = vmatpush1.bf16.msra.mxu1 %v7202_v30  ;;  %5910 = vmatprep.mubr.msk.f32.mxu1 %vm2305_vm3, %v7803_v62 }
 0x39a   : > { %6276 = vmatprep.subr.bf16.mxu1 %v7209_v38  ;;  %6382 = vmatpush1.bf16.msra.mxu0 %v7235_v22  ;;  %v2978_v36 = vpop.trf.xlu1 }
 0x39b   : > { %6384 = vmatprep.subr.bf16.mxu0 %v7243_v56  ;;  %v1387_v18 = vpop.f32.mrb[42].mxu0  ;;  %v1500_v24 = vpop.f32.mrb[42].mxu1 }
 0x39c   : > { %5911 = vmatmul.mubr.msk.f32.gmra.mrb[82].mxu1 %vm2305_vm3, %v7813_v48  ;;  %v1625_v62 = vmax.f32 %v1381_v45, %v1387_v18  ;;  %v1643_v19 = vmax.f32 %v1494_v5, %v1500_v24  ;;  %v1389_v21 = vpop.f32.mrb[43].mxu0  ;;  %v1502_v6 = vpop.f32.mrb[43].mxu1  ;;  %v1538_v45 = vrot.slane %v7829_v60, 4  ;;  %v9615_v24 = vld [vmem:[#allocation12_spill] sm:$0xff] }
 0x39d   : > { %6278 = vmatpush1.bf16.msra.mxu1 %v7214_v42  ;;  %5913 = vmatprep.mubr.msk.f32.mxu1 %vm2305_vm3, %v7821_v41  ;;  %v1634_v22 = vmax.f32 %v1383_v9, %v1389_v21  ;;  %v1652_v53 = vmax.f32 %v1496_v23, %v1502_v6  ;;  %v9613_v23 = vld [vmem:[#allocation11_spill] sm:$0xff]  ;;  %v9616_v21 = vld [vmem:[#allocation13_spill] sm:$0xff] }
 0x39e   : > { %6280 = vmatprep.subr.bf16.mxu1 %v7221_v50  ;;  %6386 = vmatpush1.bf16.msra.mxu0 %v7247_v12 }
 0x39f   : > { %6388 = vmatprep.subr.bf16.mxu0 %v7255_v7  ;;  %v1393_v56 = vpop.f32.mrb[44].mxu0  ;;  %v1506_v48 = vpop.f32.mrb[44].mxu1 }
 0x3a0   : > { %5914 = vmatmul.mubr.msk.f32.gmra.mrb[84].mxu1 %vm2305_vm3, %v7837_v25  ;;  %v1626_v41 = vmax.f32 %v1625_v62, %v1393_v56  ;;  %v1644_v14 = vmax.f32 %v1643_v19, %v1506_v48  ;;  %v1395_v10 = vpop.f32.mrb[45].mxu0  ;;  %v1508_v52 = vpop.f32.mrb[45].mxu1  ;;  %v1521_v62 = vmax.f32 %v7827_v49, %v1520_v39  ;;  %v1539_v19 = vmax.f32 %v7829_v60, %v1538_v45  ;;  %v9619_v39 = vld [vmem:[#allocation19_spill] sm:$0xff] }
 0x3a1   : > { %6282 = vmatpush1.bf16.msra.mxu1 %v7226_v55  ;;  %5916 = vmatprep.mubr.msk.f32.mxu1 %vm2305_vm3, %v7843_v2  ;;  %v1635_v47 = vmax.f32 %v1634_v22, %v1395_v10  ;;  %v1653_v12 = vmax.f32 %v1652_v53, %v1508_v52  ;;  %v9617_v10 = vld [vmem:[#allocation15_spill] sm:$0xff] }
 0x3a2   : > { %6284 = vmatprep.subr.bf16.mxu1 %v7233_v59  ;;  %6390 = vmatpush1.bf16.msra.mxu0 %v7259_v16  ;;  %v1522_v60 = vrot.slane %v1521_v62, 2  ;;  %v1540_v52 = vrot.slane %v1539_v19, 2 }
 0x3a3   : > { %6392 = vmatprep.subr.bf16.mxu0 %v7267_v35  ;;  %v1399_v7 = vpop.f32.mrb[46].mxu0  ;;  %v1512_v25 = vpop.f32.mrb[46].mxu1  ;;  %v9612_v35 = vld [vmem:[#allocation10_spill] sm:$0xff] }
 0x3a4   : > { %5917 = vmatmul.mubr.msk.f32.gmra.mrb[86].mxu1 %vm2305_vm3, %v7848_v37  ;;  %v7932_v2 = vmax.f32 %v1626_v41, %v1399_v7  ;;  %v7934_v27 = vmax.f32 %v1644_v14, %v1512_v25  ;;  %v1401_v57 = vpop.f32.mrb[47].mxu0  ;;  %v1514_v17 = vpop.f32.mrb[47].mxu1  ;;  %v1523_v45 = vmax.f32 %v1521_v62, %v1522_v60  ;;  %v9621_v62 = vld [vmem:[#allocation23_spill] sm:$0xff] }
 0x3a5   : > { %6286 = vmatpush1.bf16.msra.mxu1 %v7238_v61  ;;  %5919 = vmatprep.mubr.msk.f32.mxu1 %vm2305_vm3, %v7855_v15  ;;  %v7937_v16 = vmax.f32 %v1635_v47, %v1401_v57  ;;  %v7939_v37 = vmax.f32 %v1653_v12, %v1514_v17  ;;  %v2979_v15 = vpop.trf.xlu1 }
 0x3a6   : > { %6288 = vmatprep.subr.bf16.mxu1 %v9611_v43  ;;  %6394 = vmatpush1.bf16.msra.mxu0 %v9579_v31  ;;  %v1529_v31 = vrot.slane %v7832_v20, 4 }
 0x3a7   : > { %6396 = vmatprep.subr.bf16.mxu0 %v9581_v54 }
 0x3a8   : > { %5920 = vmatmul.mubr.msk.f32.gmra.mrb[88].mxu1 %vm2305_vm3, %v7863_v11  ;;  %v1727_v5 = vpop.f32.mrb[48].mxu0  ;;  %v1840_v9 = vpop.f32.mrb[48].mxu1  ;;  %v1547_v11 = vrot.slane %v7834_v58, 4  ;;  %v1530_v6 = vmax.f32 %v7832_v20, %v1529_v31  ;;  %v9618_v20 = vld [vmem:[#allocation17_spill] sm:$0xff] }
 0x3a9   : > { %6290 = vmatpush1.bf16.msra.mxu1 %v9612_v35  ;;  %5922 = vmatprep.mubr.msk.f32.mxu1 %vm2305_vm3, %v7879_v29  ;;  %v1729_v18 = vpop.f32.mrb[49].mxu0  ;;  %v1842_v54 = vpop.f32.mrb[49].mxu1  ;;  %v9614_v29 = vld [vmem:[#allocation20_spill] sm:$0xff]  ;;  %v9620_v31 = vld [vmem:[#allocation21_spill] sm:$0xff] }
 0x3aa   : > { %6292 = vmatprep.subr.bf16.mxu1 %v9613_v23  ;;  %6398 = vmatpush1.bf16.msra.mxu0 %v9583_v63  ;;  %v1548_v22 = vmax.f32 %v7834_v58, %v1547_v11  ;;  %v2980_v49 = vpop.trf.xlu1  ;;  %v1531_v58 = vrot.slane %v1530_v6, 2 }
 0x3ab   : > { %6432 = vmatprep.subr.bf16.mxu0 %v9614_v29  ;;  %v1610_v29 = vrot.slane %v7867_v32, 4 }
 0x3ac   : > { %5923 = vmatmul.mubr.msk.f32.gmra.mrb[90].mxu1 %vm2305_vm3, %v7889_v34  ;;  %v1549_v47 = vrot.slane %v1548_v22, 2  ;;  %v1532_v11 = vmax.f32 %v1530_v6, %v1531_v58 }
 0x3ad   : > { %6294 = vmatpush1.bf16.msra.mxu1 %v9615_v24  ;;  %5925 = vmatprep.mubr.msk.f32.mxu1 %vm2305_vm3, %v2977_v51  ;;  %v1733_v63 = vpop.f32.mrb[50].mxu0  ;;  %v1846_v53 = vpop.f32.mrb[50].mxu1 }
 0x3ae   : > { %6296 = vmatprep.subr.bf16.mxu1 %v9616_v21  ;;  %v2113_v56 = vmax.f32 %v1727_v5, %v1733_v63  ;;  %v2131_v34 = vmax.f32 %v1840_v9, %v1846_v53  ;;  %v1735_v48 = vpop.f32.mrb[51].mxu0  ;;  %v1848_v41 = vpop.f32.mrb[51].mxu1  ;;  %v1601_v63 = vrot.slane %v7870_v8, 4  ;;  %v1619_v53 = vrot.slane %v7872_v26, 4 }
 0x3af   : > { %v2122_v14 = vmax.f32 %v1729_v18, %v1735_v48  ;;  %v2140_v51 = vmax.f32 %v1842_v54, %v1848_v41  ;;  %v1550_v18 = vmax.f32 %v1548_v22, %v1549_v47  ;;  %v1592_v54 = vrot.slane %v7865_v33, 4 }
 0x3b0   : > { %5926 = vmatmul.mubr.msk.f32.gmra.mrb[92].mxu1 %vm2305_vm3, %v2978_v36  ;;  %v1620_v4 = vmax.f32 %v7872_v26, %v1619_v53 }
 0x3b1   : > { %6298 = vmatpush1.bf16.msra.mxu1 %v9617_v10  ;;  %5928 = vmatprep.mubr.msk.f32.mxu1 %vm2305_vm3, %v2979_v15  ;;  %v1541_v15 = vmax.f32 %v1539_v19, %v1540_v52  ;;  %v1524_v19 = vrot.slane %v1523_v45, 1  ;;  %v1551_v60 = vrot.slane %v1550_v18, 1  ;;  %v1593_v47 = vmax.f32 %v7865_v33, %v1592_v54 }
 0x3b2   : > { %6300 = vmatprep.subr.bf16.mxu1 %v9618_v20  ;;  %v1739_v12 = vpop.f32.mrb[52].mxu0  ;;  %v1852_v7 = vpop.f32.mrb[52].mxu1 }
 0x3b3   : > { %v2114_v25 = vmax.f32 %v2113_v56, %v1739_v12  ;;  %v2132_v57 = vmax.f32 %v2131_v34, %v1852_v7  ;;  %v1741_v36 = vpop.f32.mrb[53].mxu0  ;;  %v1854_v17 = vpop.f32.mrb[53].mxu1  ;;  %v1542_v48 = vrot.slane %v1541_v15, 1  ;;  %v1611_v12 = vmax.f32 %v7867_v32, %v1610_v29  ;;  %v9626_v29 = vld [vmem:[#allocation33_spill] sm:$0xff] }
 0x3b4   : > { %5929 = vmatmul.mubr.msk.f32.gmra.mrb[94].mxu1 %vm2305_vm3, %v2980_v49  ;;  %v2123_v5 = vmax.f32 %v2122_v14, %v1741_v36  ;;  %v2141_v9 = vmax.f32 %v2140_v51, %v1854_v17  ;;  %v9622_v51 = vld [vmem:[#allocation26_spill] sm:$0xff]  ;;  %v1533_v49 = vrot.slane %v1532_v11, 1  ;;  %v1602_v17 = vmax.f32 %v7870_v8, %v1601_v63 }
 0x3b5   : > { %6302 = vmatpush1.bf16.msra.mxu1 %v9619_v39  ;;  %3314 = vmatprep.mubr.f32.mxu1 %v9552_v13  ;;  %v7985_v44 = vmax.f32 %v1523_v45, %v1524_v19  ;;  %v7992_v8 = vmax.f32 %v1550_v18, %v1551_v60  ;;  %v1594_v53 = vrot.slane %v1593_v47, 2  ;;  %v1621_v19 = vrot.slane %v1620_v4, 2 }
 0x3b6   : > { %6336 = vmatprep.subr.bf16.mxu1 %v9620_v31  ;;  %v1603_v45 = vrot.slane %v1602_v17, 2 }
 0x3b7   : > { %v1745_v56 = vpop.f32.mrb[54].mxu0  ;;  %v1858_v34 = vpop.f32.mrb[54].mxu1  ;;  %9624 = vst [vmem:[#allocation14_spill] sm:$0xff] %v7985_v44  ;;  %9628 = vst [vmem:[#allocation24_spill] sm:$0xff] %v7992_v8  ;;  %v1595_v31 = vmax.f32 %v1593_v47, %v1594_v53  ;;  %v1622_v24 = vmax.f32 %v1620_v4, %v1621_v19  ;;  %v9634_v47 = vld [vmem:[#allocation41_spill] sm:$0xff]  ;;  %v1556_v53 = vrot.slane %v7893_v3, 4 }
 0x3b8   : > { %3315 = vmatmul.mubr.f32.vlgmr.msra.gmra.mrb[96].mxu1 %v7602_v40  ;;  %v2115_v6 = vmax.f32 %v2114_v25, %v1745_v56  ;;  %v2133_v22 = vmax.f32 %v2132_v57, %v1858_v34  ;;  %v1747_v41 = vpop.f32.mrb[55].mxu0  ;;  %v1860_v14 = vpop.f32.mrb[55].mxu1  ;;  %v1604_v21 = vmax.f32 %v1602_v17, %v1603_v45  ;;  %v1583_v45 = vrot.slane %v7900_v46, 4 }
 0x3b9   : > { %6338 = vmatpush1.bf16.msra.mxu1 %v9621_v62  ;;  %3456 = vmatprep.mubr.f32.mxu1 %v9552_v13  ;;  %v2124_v52 = vmax.f32 %v2123_v5, %v1747_v41  ;;  %v2142_v58 = vmax.f32 %v2141_v9, %v1860_v14  ;;  %v7987_v5 = vmax.f32 %v1541_v15, %v1542_v48  ;;  %v1612_v14 = vrot.slane %v1611_v12, 2 }
 0x3ba   : > { %6340 = vmatprep.subr.bf16.mxu1 %v9622_v51  ;;  %v2116_v7 = vrot.slane %v2115_v6, 4  ;;  %v2134_v36 = vrot.slane %v2133_v22, 4  ;;  %v7990_v41 = vmax.f32 %v1532_v11, %v1533_v49 }
 0x3bb   : > { %v2125_v25 = vrot.slane %v2124_v52, 4  ;;  %v2143_v57 = vrot.slane %v2142_v58, 4  ;;  %v1751_v56 = vpop.f32.mrb[56].mxu0  ;;  %v1864_v34 = vpop.f32.mrb[56].mxu1  ;;  %9625 = vst [vmem:[#allocation16_spill] sm:$0xff] %v7987_v5  ;;  %v1613_v39 = vmax.f32 %v1611_v12, %v1612_v14  ;;  %v1574_v14 = vrot.slane %v7895_v0, 4 }
 0x3bc   : > { %v2117_v9 = vmax.f32 %v2115_v6, %v2116_v7  ;;  %v2135_v33 = vmax.f32 %v2133_v22, %v2134_v36  ;;  %v1753_v54 = vpop.f32.mrb[57].mxu0  ;;  %v1866_v32 = vpop.f32.mrb[57].mxu1  ;;  %9627 = vst [vmem:[#allocation18_spill] sm:$0xff] %v7990_v41  ;;  %v9629_v7 = vld [vmem:[#allocation35_spill] sm:$0xff] }
 0x3bd   : > { %6342 = vmatpush1.bf16.msra.mxu1 %v9623_v1  ;;  %v2126_v26 = vmax.f32 %v2124_v52, %v2125_v25  ;;  %v2144_v63 = vmax.f32 %v2142_v58, %v2143_v57  ;;  %v9630_v52 = vld [vmem:[#allocation37_spill] sm:$0xff] }
 0x3be   : > { %6344 = vmatprep.subr.bf16.mxu1 %v9626_v29  ;;  %v2118_v51 = vrot.slane %v2117_v9, 2  ;;  %v2136_v1 = vrot.slane %v2135_v33, 2 }
 0x3bf   : > { %v2127_v15 = vrot.slane %v2126_v26, 2  ;;  %v2145_v48 = vrot.slane %v2144_v63, 2  ;;  %v1757_v6 = vpop.f32.mrb[58].mxu0  ;;  %v1870_v22 = vpop.f32.mrb[58].mxu1 }
 0x3c0   : > { %v2119_v36 = vmax.f32 %v2117_v9, %v2118_v51  ;;  %v2137_v29 = vmax.f32 %v2135_v33, %v2136_v1  ;;  %v2185_v11 = vmax.f32 %v1751_v56, %v1757_v6  ;;  %v2203_v49 = vmax.f32 %v1864_v34, %v1870_v22  ;;  %v1759_v18 = vpop.f32.mrb[59].mxu0  ;;  %v1872_v60 = vpop.f32.mrb[59].mxu1  ;;  %v9631_v56 = vld [vmem:[#allocation39_spill] sm:$0xff] }
 0x3c1   : > { %6346 = vmatpush1.bf16.msra.mxu1 %v9629_v7  ;;  %v2128_v58 = vmax.f32 %v2126_v26, %v2127_v15  ;;  %v2146_v25 = vmax.f32 %v2144_v63, %v2145_v48  ;;  %v2194_v57 = vmax.f32 %v1753_v54, %v1759_v18  ;;  %v2212_v62 = vmax.f32 %v1866_v32, %v1872_v60  ;;  %v9637_v15 = vld [vmem:[#allocation43_spill] sm:$0xff]  ;;  %v9638_v18 = vld [vmem:[#allocation45_spill] sm:$0xff] }
 0x3c2   : > { %6348 = vmatprep.subr.bf16.mxu1 %v9630_v52  ;;  %v2120_v20 = vrot.slane %v2119_v36, 1  ;;  %v2138_v10 = vrot.slane %v2137_v29, 1  ;;  %v1596_v6 = vrot.slane %v1595_v31, 1  ;;  %v1614_v22 = vrot.slane %v1613_v39, 1 }
 0x3c3   : > { %v2129_v23 = vrot.slane %v2128_v58, 1  ;;  %v2147_v7 = vrot.slane %v2146_v25, 1  ;;  %v1763_v51 = vpop.f32.mrb[60].mxu0  ;;  %v1876_v1 = vpop.f32.mrb[60].mxu1  ;;  %v1605_v60 = vrot.slane %v1604_v21, 1 }
 0x3c4   : > { %v7997_v34 = vmax.f32 %v2119_v36, %v2120_v20  ;;  %v7999_v9 = vmax.f32 %v2137_v29, %v2138_v10  ;;  %v2186_v33 = vmax.f32 %v2185_v11, %v1763_v51  ;;  %v2204_v26 = vmax.f32 %v2203_v49, %v1876_v1  ;;  %v1765_v54 = vpop.f32.mrb[61].mxu0  ;;  %v1878_v32 = vpop.f32.mrb[61].mxu1 }
 0x3c5   : > { %6350 = vmatpush1.bf16.msra.mxu1 %v9631_v56  ;;  %v8002_v12 = vmax.f32 %v2128_v58, %v2129_v23  ;;  %v8004_v17 = vmax.f32 %v2146_v25, %v2147_v7  ;;  %v2195_v4 = vmax.f32 %v2194_v57, %v1765_v54  ;;  %v2213_v63 = vmax.f32 %v2212_v62, %v1878_v32  ;;  %v9639_v62 = vld [vmem:[#allocation47_spill] sm:$0xff] }
 0x3c6   : > { %9632 = vst [vmem:[#allocation29_spill] sm:$0xff] %v7997_v34  ;;  %9633 = vst [vmem:[#allocation27_spill] sm:$0xff] %v7999_v9  ;;  %6352 = vmatprep.subr.bf16.mxu1 %v9634_v47  ;;  %v1565_v29 = vrot.slane %v7898_v28, 4  ;;  %v1623_v58 = vrot.slane %v1622_v24, 1  ;;  %v1557_v51 = vmax.f32 %v7893_v3, %v1556_v53  ;;  %v1575_v1 = vmax.f32 %v7895_v0, %v1574_v14  ;;  %v9640_v14 = vld [vmem:[#allocation49_spill] sm:$0xff] }
 0x3c7   : > { %9635 = vst [vmem:[#allocation28_spill] sm:$0xff] %v8002_v12  ;;  %9636 = vst [vmem:[#allocation9_spill] sm:$0xff] %v8004_v17  ;;  %v1769_v23 = vpop.f32.mrb[62].mxu0  ;;  %v1882_v19 = vpop.f32.mrb[62].mxu1  ;;  %v1584_v20 = vmax.f32 %v7900_v46, %v1583_v45  ;;  %v8025_v10 = vmax.f32 %v1595_v31, %v1596_v6 }
 0x3c8   : > { %v2187_v7 = vmax.f32 %v2186_v33, %v1769_v23  ;;  %v2205_v36 = vmax.f32 %v2204_v26, %v1882_v19  ;;  %v1771_v11 = vpop.f32.mrb[63].mxu0  ;;  %v1884_v49 = vpop.f32.mrb[63].mxu1  ;;  %v1566_v48 = vmax.f32 %v7898_v28, %v1565_v29  ;;  %v8032_v28 = vmax.f32 %v1622_v24, %v1623_v58 }
 0x3c9   : > { %6354 = vmatpush1.bf16.msra.mxu1 %v9637_v15  ;;  %v2196_v25 = vmax.f32 %v2195_v4, %v1771_v11  ;;  %v2214_v57 = vmax.f32 %v2213_v63, %v1884_v49  ;;  %v8027_v4 = vmax.f32 %v1613_v39, %v1614_v22  ;;  %v8030_v11 = vmax.f32 %v1604_v21, %v1605_v60 }
 0x3ca   : > { %6356 = vmatprep.subr.bf16.mxu1 %v9638_v18  ;;  %v2188_v54 = vrot.slane %v2187_v7, 4  ;;  %v2206_v32 = vrot.slane %v2205_v36, 4  ;;  %v1558_v45 = vrot.slane %v1557_v51, 2  ;;  %v1576_v49 = vrot.slane %v1575_v1, 2 }
 0x3cb   : > { %v2197_v33 = vrot.slane %v2196_v25, 4  ;;  %v2215_v26 = vrot.slane %v2214_v57, 4  ;;  %v1953_v23 = vpop.f32.mrb[64].mxu0  ;;  %v2066_v19 = vpop.f32.mrb[64].mxu1  ;;  %v1567_v31 = vrot.slane %v1566_v48, 2  ;;  %v1585_v6 = vrot.slane %v1584_v20, 2 }
 0x3cc   : > { %v2189_v63 = vmax.f32 %v2187_v7, %v2188_v54  ;;  %v2207_v3 = vmax.f32 %v2205_v36, %v2206_v32  ;;  %v1955_v53 = vpop.f32.mrb[65].mxu0  ;;  %v2068_v0 = vpop.f32.mrb[65].mxu1  ;;  %v9641_v54 = vld [vmem:[#allocation51_spill] sm:$0xff]  ;;  %v1559_v12 = vmax.f32 %v1557_v51, %v1558_v45  ;;  %v1577_v41 = vmax.f32 %v1575_v1, %v1576_v49  ;;  %v9644_v51 = vld [vmem:[#allocation8_spill] sm:$0xff]  ;;  %v9680_v45 = vld [vmem:[#allocation14_spill] sm:$0xff] }
 0x3cd   : > { %6358 = vmatpush1.bf16.msra.mxu1 %v9639_v62  ;;  %v2198_v46 = vmax.f32 %v2196_v25, %v2197_v33  ;;  %v2216_v29 = vmax.f32 %v2214_v57, %v2215_v26  ;;  %v9642_v25 = vld [vmem:[#allocation53_spill] sm:$0xff]  ;;  %v1586_v62 = vmax.f32 %v1584_v20, %v1585_v6 }
 0x3ce   : > { %6360 = vmatprep.subr.bf16.mxu1 %v9640_v14  ;;  %v2190_v17 = vrot.slane %v2189_v63, 2  ;;  %v2208_v8 = vrot.slane %v2207_v3, 2  ;;  %v1568_v14 = vmax.f32 %v1566_v48, %v1567_v31  ;;  %v1578_v31 = vrot.slane %v1577_v41, 1 }
 0x3cf   : > { %v2199_v39 = vrot.slane %v2198_v46, 2  ;;  %v2217_v22 = vrot.slane %v2216_v29, 2  ;;  %v1959_v7 = vpop.f32.mrb[66].mxu0  ;;  %v2072_v36 = vpop.f32.mrb[66].mxu1 }
 0x3d0   : > { %v2191_v32 = vmax.f32 %v2189_v63, %v2190_v17  ;;  %v2209_v9 = vmax.f32 %v2207_v3, %v2208_v8  ;;  %v2149_v21 = vmax.f32 %v1953_v23, %v1959_v7  ;;  %v2167_v60 = vmax.f32 %v2066_v19, %v2072_v36  ;;  %v1961_v24 = vpop.f32.mrb[67].mxu0  ;;  %v2074_v58 = vpop.f32.mrb[67].mxu1  ;;  %v9643_v23 = vld [vmem:[#allocation55_spill] sm:$0xff] }
 0x3d1   : > { %6362 = vmatpush1.bf16.msra.mxu1 %v9641_v54  ;;  %v2200_v57 = vmax.f32 %v2198_v46, %v2199_v39  ;;  %v2218_v33 = vmax.f32 %v2216_v29, %v2217_v22  ;;  %v2158_v26 = vmax.f32 %v1955_v53, %v1961_v24  ;;  %v2176_v5 = vmax.f32 %v2068_v0, %v2074_v58 }
 0x3d2   : > { %6364 = vmatprep.subr.bf16.mxu1 %v9642_v25  ;;  %v2192_v34 = vrot.slane %v2191_v32, 1  ;;  %v2210_v44 = vrot.slane %v2209_v9, 1  ;;  %v1587_v36 = vrot.slane %v1586_v62, 1 }
 0x3d3   : > { %v2201_v18 = vrot.slane %v2200_v57, 1  ;;  %v2219_v54 = vrot.slane %v2218_v33, 1  ;;  %v1965_v17 = vpop.f32.mrb[68].mxu0  ;;  %v2078_v8 = vpop.f32.mrb[68].mxu1 }
 0x3d4   : > { %v8037_v19 = vmax.f32 %v2191_v32, %v2192_v34  ;;  %v8039_v63 = vmax.f32 %v2209_v9, %v2210_v44  ;;  %v2150_v3 = vmax.f32 %v2149_v21, %v1965_v17  ;;  %v2168_v46 = vmax.f32 %v2167_v60, %v2078_v8  ;;  %v1967_v53 = vpop.f32.mrb[69].mxu0  ;;  %v2080_v0 = vpop.f32.mrb[69].mxu1  ;;  %v9673_v9 = vld [vmem:[#allocation50_spill] sm:$0xff] }
 0x3d5   : > { %6366 = vmatpush1.bf16.msra.mxu1 %v9643_v23  ;;  %v8042_v1 = vmax.f32 %v2200_v57, %v2201_v18  ;;  %v8044_v48 = vmax.f32 %v2218_v33, %v2219_v54  ;;  %v2159_v20 = vmax.f32 %v2158_v26, %v1967_v53  ;;  %v2177_v29 = vmax.f32 %v2176_v5, %v2080_v0 }
 0x3d6   : > { %6400 = vmatprep.subr.bf16.mxu1 %v9644_v51  ;;  %v1560_v5 = vrot.slane %v1559_v12, 1  ;;  %v8061_v26 = vmax.f32 %v1577_v41, %v1578_v31  ;;  %v8066_v53 = vmax.f32 %v1586_v62, %v1587_v36  ;;  %v1637_v41 = vrot.slane %v7937_v16, 4 }
 0x3d7   : > { %v1971_v18 = vpop.f32.mrb[70].mxu0  ;;  %v2084_v49 = vpop.f32.mrb[70].mxu1 }
 0x3d8   : > { %3457 = vmatmul.mubr.f32.vlgmr.msra.gmra.mrb[98].mxu1 %v7602_v40  ;;  %v2151_v6 = vmax.f32 %v2150_v3, %v1971_v18  ;;  %v2169_v39 = vmax.f32 %v2168_v46, %v2084_v49  ;;  %v1973_v22 = vpop.f32.mrb[71].mxu0  ;;  %v2086_v7 = vpop.f32.mrb[71].mxu1  ;;  %v1569_v40 = vrot.slane %v1568_v14, 1  ;;  %v8059_v33 = vmax.f32 %v1559_v12, %v1560_v5 }
 0x3d9   : > { %6402 = vmatpush1.bf16.msra.mxu1 %v7202_v30  ;;  %3792 = vmatprep.mubr.f32.mxu1 %v9552_v13  ;;  %v2160_v54 = vmax.f32 %v2159_v20, %v1973_v22  ;;  %v2178_v32 = vmax.f32 %v2177_v29, %v2086_v7  ;;  %v1628_v20 = vrot.slane %v7932_v2, 4  ;;  %v1655_v18 = vrot.slane %v7939_v37, 4 }
 0x3da   : > { %6404 = vmatprep.subr.bf16.mxu1 %v7209_v38  ;;  %v2152_v21 = vrot.slane %v2151_v6, 4  ;;  %v2170_v60 = vrot.slane %v2169_v39, 4  ;;  %v8064_v46 = vmax.f32 %v1568_v14, %v1569_v40 }
 0x3db   : > { %v2161_v24 = vrot.slane %v2160_v54, 4  ;;  %v2179_v58 = vrot.slane %v2178_v32, 4  ;;  %v1977_v57 = vpop.f32.mrb[72].mxu0  ;;  %v2090_v30 = vpop.f32.mrb[72].mxu1 }
 0x3dc   : > { %v2153_v17 = vmax.f32 %v2151_v6, %v2152_v21  ;;  %v2171_v8 = vmax.f32 %v2169_v39, %v2170_v60  ;;  %v1979_v3 = vpop.f32.mrb[73].mxu0  ;;  %v2092_v38 = vpop.f32.mrb[73].mxu1  ;;  %v1629_v21 = vmax.f32 %v7932_v2, %v1628_v20 }
 0x3dd   : > { %6406 = vmatpush1.bf16.msra.mxu1 %v7214_v42  ;;  %v2162_v0 = vmax.f32 %v2160_v54, %v2161_v24  ;;  %v2180_v51 = vmax.f32 %v2178_v32, %v2179_v58  ;;  %v1646_v42 = vrot.slane %v7934_v27, 4 }
 0x3de   : > { %6408 = vmatprep.subr.bf16.mxu1 %v7221_v50  ;;  %v2154_v12 = vrot.slane %v2153_v17, 2  ;;  %v2172_v29 = vrot.slane %v2171_v8, 2 }
 0x3df   : > { %v2163_v49 = vrot.slane %v2162_v0, 2  ;;  %v2181_v5 = vrot.slane %v2180_v51, 2  ;;  %v1983_v31 = vpop.f32.mrb[74].mxu0  ;;  %v2096_v50 = vpop.f32.mrb[74].mxu1  ;;  %v1647_v60 = vmax.f32 %v7934_v27, %v1646_v42 }
 0x3e0   : > { %v2155_v62 = vmax.f32 %v2153_v17, %v2154_v12  ;;  %v2173_v14 = vmax.f32 %v2171_v8, %v2172_v29  ;;  %v2221_v6 = vmax.f32 %v1977_v57, %v1983_v31  ;;  %v2239_v39 = vmax.f32 %v2090_v30, %v2096_v50  ;;  %v1985_v22 = vpop.f32.mrb[75].mxu0  ;;  %v2098_v7 = vpop.f32.mrb[75].mxu1 }
 0x3e1   : > { %6410 = vmatpush1.bf16.msra.mxu1 %v7226_v55  ;;  %v2164_v40 = vmax.f32 %v2162_v0, %v2163_v49  ;;  %v2182_v36 = vmax.f32 %v2180_v51, %v2181_v5  ;;  %v2230_v54 = vmax.f32 %v1979_v3, %v1985_v22  ;;  %v2248_v32 = vmax.f32 %v2092_v38, %v2098_v7 }
 0x3e2   : > { %6412 = vmatprep.subr.bf16.mxu1 %v7233_v59  ;;  %v2156_v24 = vrot.slane %v2155_v62, 1  ;;  %v2174_v58 = vrot.slane %v2173_v14, 1  ;;  %v1638_v55 = vmax.f32 %v7937_v16, %v1637_v41  ;;  %v1656_v17 = vmax.f32 %v7939_v37, %v1655_v18  ;;  %v9677_v18 = vld [vmem:[#allocation54_spill] sm:$0xff] }
 0x3e3   : > { %v2165_v57 = vrot.slane %v2164_v40, 1  ;;  %v2183_v30 = vrot.slane %v2182_v36, 1  ;;  %v1989_v8 = vpop.f32.mrb[76].mxu0  ;;  %v2102_v12 = vpop.f32.mrb[76].mxu1  ;;  %v1630_v49 = vrot.slane %v1629_v21, 2  ;;  %v1648_v5 = vrot.slane %v1647_v60, 2 }
 0x3e4   : > { %v8079_v59 = vmax.f32 %v2155_v62, %v2156_v24  ;;  %v8081_v3 = vmax.f32 %v2173_v14, %v2174_v58  ;;  %v2222_v38 = vmax.f32 %v2221_v6, %v1989_v8  ;;  %v2240_v2 = vmax.f32 %v2239_v39, %v2102_v12  ;;  %v1991_v0 = vpop.f32.mrb[77].mxu0  ;;  %v2104_v27 = vpop.f32.mrb[77].mxu1  ;;  %v9645_v6 = vld [vmem:[#allocation11_spill] sm:$0xff]  ;;  %v9646_v24 = vld [vmem:[#allocation12_spill] sm:$0xff]  ;;  %v9647_v12 = vld [vmem:[#allocation13_spill] sm:$0xff] }
 0x3e5   : > { %6414 = vmatpush1.bf16.msra.mxu1 %v7238_v61  ;;  %v8084_v51 = vmax.f32 %v2164_v40, %v2165_v57  ;;  %v8086_v16 = vmax.f32 %v2182_v36, %v2183_v30  ;;  %v2231_v37 = vmax.f32 %v2230_v54, %v1991_v0  ;;  %v2249_v20 = vmax.f32 %v2248_v32, %v2104_v27 }
 0x3e6   : > { %6416 = vmatprep.subr.bf16.mxu1 %v9611_v43  ;;  %v1639_v39 = vrot.slane %v1638_v55, 2  ;;  %v1657_v22 = vrot.slane %v1656_v17, 2  ;;  %v1631_v58 = vmax.f32 %v1629_v21, %v1630_v49  ;;  %v1649_v57 = vmax.f32 %v1647_v60, %v1648_v5  ;;  %v9649_v21 = vld [vmem:[#allocation17_spill] sm:$0xff] }
 0x3e7   : > { %v1995_v29 = vpop.f32.mrb[78].mxu0  ;;  %v2108_v41 = vpop.f32.mrb[78].mxu1 }
 0x3e8   : > { %v2223_v31 = vmax.f32 %v2222_v38, %v1995_v29  ;;  %v2241_v50 = vmax.f32 %v2240_v2, %v2108_v41  ;;  %v1997_v62 = vpop.f32.mrb[79].mxu0  ;;  %v2110_v14 = vpop.f32.mrb[79].mxu1  ;;  %v1640_v38 = vmax.f32 %v1638_v55, %v1639_v39  ;;  %v1658_v2 = vmax.f32 %v1656_v17, %v1657_v22  ;;  %v9650_v22 = vld [vmem:[#allocation19_spill] sm:$0xff] }
 0x3e9   : > { %6418 = vmatpush1.bf16.msra.mxu1 %v9612_v35  ;;  %v2232_v7 = vmax.f32 %v2231_v37, %v1997_v62  ;;  %v2250_v40 = vmax.f32 %v2249_v20, %v2110_v14  ;;  %v9648_v62 = vld [vmem:[#allocation15_spill] sm:$0xff]  ;;  %v1632_v14 = vrot.slane %v1631_v58, 1 }
 0x3ea   : > { %6420 = vmatprep.subr.bf16.mxu1 %v9645_v6  ;;  %v2224_v36 = vrot.slane %v2223_v31, 4  ;;  %v2242_v35 = vrot.slane %v2241_v50, 4  ;;  %v1650_v6 = vrot.slane %v1649_v57, 1  ;;  %v1641_v60 = vrot.slane %v1640_v38, 1 }
 0x3eb   : > { %v2233_v54 = vrot.slane %v2232_v7, 4  ;;  %v2251_v32 = vrot.slane %v2250_v40, 4  ;;  %v1659_v49 = vrot.slane %v1658_v2, 1 }
 0x3ec   : > { %v2225_v30 = vmax.f32 %v2223_v31, %v2224_v36  ;;  %v2243_v8 = vmax.f32 %v2241_v50, %v2242_v35 }
 0x3ed   : > { %6422 = vmatpush1.bf16.msra.mxu1 %v9646_v24  ;;  %v2234_v0 = vmax.f32 %v2232_v7, %v2233_v54  ;;  %v2252_v27 = vmax.f32 %v2250_v40, %v2251_v32  ;;  %v8103_v7 = vmax.f32 %v1631_v58, %v1632_v14  ;;  %v8105_v40 = vmax.f32 %v1649_v57, %v1650_v6  ;;  %v9651_v54 = vld [vmem:[#allocation21_spill] sm:$0xff]  ;;  %v9655_v14 = vld [vmem:[#allocation30_spill] sm:$0xff]  ;;  %v9671_v57 = vld [vmem:[#allocation48_spill] sm:$0xff] }
 0x3ee   : > { %6424 = vmatprep.subr.bf16.mxu1 %v9647_v12  ;;  %v2226_v29 = vrot.slane %v2225_v30, 2  ;;  %v2244_v41 = vrot.slane %v2243_v8, 2  ;;  %v8112_v32 = vmax.f32 %v1640_v38, %v1641_v60  ;;  %v9656_v6 = vld [vmem:[#allocation26_spill] sm:$0xff]  ;;  %v9658_v60 = vld [vmem:[#allocation31_spill] sm:$0xff] }
 0x3ef   : > { %v2235_v37 = vrot.slane %v2234_v0, 2  ;;  %v2253_v20 = vrot.slane %v2252_v27, 2 }
 0x3f0   : > { %v2227_v43 = vmax.f32 %v2225_v30, %v2226_v29  ;;  %v2245_v24 = vmax.f32 %v2243_v8, %v2244_v41  ;;  %v8114_v30 = vmax.f32 %v1658_v2, %v1659_v49  ;;  %v9653_v41 = vld [vmem:[#allocation25_spill] sm:$0xff] }
 0x3f1   : > { %6426 = vmatpush1.bf16.msra.mxu1 %v9648_v62  ;;  %v2236_v5 = vmax.f32 %v2234_v0, %v2235_v37  ;;  %v2254_v31 = vmax.f32 %v2252_v27, %v2253_v20  ;;  %v9652_v27 = vld [vmem:[#allocation22_spill] sm:$0xff]  ;;  %v9654_v20 = vld [vmem:[#allocation23_spill] sm:$0xff] }
 0x3f2   : > { %6428 = vmatprep.subr.bf16.mxu1 %v9649_v21  ;;  %v2228_v55 = vrot.slane %v2227_v43, 1  ;;  %v2246_v17 = vrot.slane %v2245_v24, 1  ;;  %v9657_v21 = vld [vmem:[#allocation32_spill] sm:$0xff] }
 0x3f3   : > { %v2237_v50 = vrot.slane %v2236_v5, 1  ;;  %v2255_v39 = vrot.slane %v2254_v31, 1 }
 0x3f4   : > { %v8107_v36 = vmax.f32 %v2227_v43, %v2228_v55  ;;  %v8109_v35 = vmax.f32 %v2245_v24, %v2246_v17  ;;  %v9662_v17 = vld [vmem:[#allocation36_spill] sm:$0xff] }
 0x3f5   : > { %6430 = vmatpush1.bf16.msra.mxu1 %v9650_v22  ;;  %v8116_v8 = vmax.f32 %v2236_v5, %v2237_v50  ;;  %v8118_v12 = vmax.f32 %v2254_v31, %v2255_v39  ;;  %v9660_v5 = vld [vmem:[#allocation34_spill] sm:$0xff]  ;;  %v9661_v31 = vld [vmem:[#allocation33_spill] sm:$0xff]  ;;  %v9663_v50 = vld [vmem:[#allocation35_spill] sm:$0xff] }
 0x3f6   : > { %6495 = vmatprep.subr.bf16.mxu1 %v9651_v54  ;;  %v9664_v22 = vld [vmem:[#allocation38_spill] sm:$0xff]  ;;  %v9675_v43 = vld [vmem:[#allocation52_spill] sm:$0xff] }
 0x420   : > { %v8128_v38 = vpop.f32.mrb[80].mxu0 }
 0x421   : > { %v8130_v2 = vpop.f32.mrb[81].mxu0 }
 0x422   : > { %3536 = vmatmul.mubr.f32.vlgmr.msra.gmra.mrb[100].mxu0 %v8130_v2  ;;  %3793 = vmatmul.mubr.f32.vlgmr.msra.gmra.mrb[100].mxu1 %v8130_v2 }
 0x423   : > { %6434 = vmatpush1.bf16.msra.mxu0 %v9652_v27  ;;  %3541 = vmatprep.mubr.f32.mxu0 %v9552_v13 }
 0x424   : > { %v8136_v29 = vpop.f32.mrb[82].mxu0  ;;  %3798 = vmatprep.mubr.f32.mxu1 %v9552_v13  ;;  %6436 = vmatprep.subr.bf16.mxu0 %v9653_v41  ;;  %v9666_v41 = vld [vmem:[#allocation40_spill] sm:$0xff] }
 0x425   : > { %v8140_v37 = vpop.f32.mrb[83].mxu0  ;;  %6503 = vmatpush1.bf16.msra.mxu1 %v9654_v20 }
 0x426   : > { %3542 = vmatmul.mubr.f32.gmra.mrb[102].mxu0 %v8128_v38  ;;  %3799 = vmatmul.mubr.f32.gmra.mrb[102].mxu1 %v8128_v38 }
 0x427   : > { %3547 = vmatprep.mubr.f32.mxu0 %v9552_v13  ;;  %3804 = vmatprep.mubr.f32.mxu1 %v9552_v13 }
 0x428   : > { %v8147_v62 = vpop.f32.mrb[84].mxu0  ;;  %6438 = vmatpush1.bf16.msra.mxu0 %v9655_v14  ;;  %6496 = vmatprep.subr.bf16.mxu1 %v9656_v6 }
 0x429   : > { %v8151_v24 = vpop.f32.mrb[85].mxu0  ;;  %6440 = vmatprep.subr.bf16.mxu0 %v9657_v21  ;;  %6504 = vmatpush1.bf16.msra.mxu1 %v9658_v60  ;;  %v9667_v21 = vld [vmem:[#allocation42_spill] sm:$0xff] }
 0x42a   : > { %3548 = vmatmul.mubr.f32.gmra.mrb[104].mxu0 %v8140_v37  ;;  %3805 = vmatmul.mubr.f32.gmra.mrb[104].mxu1 %v8140_v37 }
 0x42b   : > { %3553 = vmatprep.mubr.f32.mxu0 %v9552_v13  ;;  %3810 = vmatprep.mubr.f32.mxu1 %v9552_v13 }
 0x42c   : > { %v8159_v49 = vpop.f32.mrb[86].mxu0  ;;  %6442 = vmatpush1.bf16.msra.mxu0 %v9660_v5  ;;  %6497 = vmatprep.subr.bf16.mxu1 %v9661_v31 }
 0x42d   : > { %9659 = vst [vmem:[#allocation10_spill] sm:$0xff] %v8159_v49  ;;  %v8163_v55 = vpop.f32.mrb[87].mxu0  ;;  %6444 = vmatprep.subr.bf16.mxu0 %v9662_v17  ;;  %6505 = vmatpush1.bf16.msra.mxu1 %v9663_v50  ;;  %v9668_v17 = vld [vmem:[#allocation44_spill] sm:$0xff] }
 0x42e   : > { %3554 = vmatmul.mubr.f32.gmra.mrb[106].mxu0 %v8136_v29  ;;  %3811 = vmatmul.mubr.f32.gmra.mrb[106].mxu1 %v8136_v29 }
 0x42f   : > { %3559 = vmatprep.mubr.f32.mxu0 %v9552_v13  ;;  %3816 = vmatprep.mubr.f32.mxu1 %v9552_v13 }
 0x430   : > { %v8171_v39 = vpop.f32.mrb[88].mxu0  ;;  %6446 = vmatpush1.bf16.msra.mxu0 %v9664_v22  ;;  %6498 = vmatprep.subr.bf16.mxu1 %v9630_v52 }
 0x431   : > { %v8175_v27 = vpop.f32.mrb[89].mxu0  ;;  %6448 = vmatprep.subr.bf16.mxu0 %v9666_v41  ;;  %6506 = vmatpush1.bf16.msra.mxu1 %v9631_v56  ;;  %v9669_v41 = vld [vmem:[#allocation46_spill] sm:$0xff] }
 0x432   : > { %9665 = vst [vmem:[#allocation20_spill] sm:$0xff] %v8175_v27  ;;  %3560 = vmatmul.mubr.f32.gmra.mrb[108].mxu0 %v8151_v24  ;;  %3817 = vmatmul.mubr.f32.gmra.mrb[108].mxu1 %v8151_v24 }
 0x433   : > { %3565 = vmatprep.mubr.f32.mxu0 %v9552_v13  ;;  %3822 = vmatprep.mubr.f32.mxu1 %v9552_v13 }
 0x434   : > { %v8183_v14 = vpop.f32.mrb[90].mxu0  ;;  %6450 = vmatpush1.bf16.msra.mxu0 %v9667_v21  ;;  %6499 = vmatprep.subr.bf16.mxu1 %v9634_v47  ;;  %v9670_v21 = vld [vmem:[#allocation45_spill] sm:$0xff] }
 0x435   : > { %v8187_v5 = vpop.f32.mrb[91].mxu0  ;;  %6452 = vmatprep.subr.bf16.mxu0 %v9668_v17  ;;  %6507 = vmatpush1.bf16.msra.mxu1 %v9637_v15  ;;  %v9672_v17 = vld [vmem:[#allocation47_spill] sm:$0xff] }
 0x436   : > { %3566 = vmatmul.mubr.f32.gmra.mrb[110].mxu0 %v8147_v62  ;;  %3823 = vmatmul.mubr.f32.gmra.mrb[110].mxu1 %v8147_v62 }
 0x437   : > { %3571 = vmatprep.mubr.f32.mxu0 %v9552_v13  ;;  %3828 = vmatprep.mubr.f32.mxu1 %v9552_v13 }
 0x438   : > { %v8195_v22 = vpop.f32.mrb[92].mxu0  ;;  %6454 = vmatpush1.bf16.msra.mxu0 %v9669_v41  ;;  %6500 = vmatprep.subr.bf16.mxu1 %v9670_v21  ;;  %v9674_v41 = vld [vmem:[#allocation49_spill] sm:$0xff] }
 0x439   : > { %v8199_v0 = vpop.f32.mrb[93].mxu0  ;;  %6456 = vmatprep.subr.bf16.mxu0 %v9671_v57  ;;  %6508 = vmatpush1.bf16.msra.mxu1 %v9672_v17  ;;  %v9676_v57 = vld [vmem:[#allocation51_spill] sm:$0xff] }
 0x43a   : > { %3572 = vmatmul.mubr.f32.gmra.mrb[112].mxu0 %v8163_v55  ;;  %3829 = vmatmul.mubr.f32.gmra.mrb[112].mxu1 %v8163_v55 }
 0x43b   : > { %3577 = vmatprep.mubr.f32.mxu0 %v9552_v13  ;;  %3834 = vmatprep.mubr.f32.mxu1 %v9552_v13 }
 0x43c   : > { %v8207_v61 = vpop.f32.mrb[94].mxu0  ;;  %6458 = vmatpush1.bf16.msra.mxu0 %v9673_v9  ;;  %6501 = vmatprep.subr.bf16.mxu1 %v9674_v41 }
 0x43d   : > { %v8211_v34 = vpop.f32.mrb[95].mxu0  ;;  %6460 = vmatprep.subr.bf16.mxu0 %v9675_v43  ;;  %6509 = vmatpush1.bf16.msra.mxu1 %v9676_v57 }
 0x43e   : > { %3578 = vmatmul.mubr.f32.gmra.mrb[114].mxu0 %v8159_v49  ;;  %3835 = vmatmul.mubr.f32.gmra.mrb[114].mxu1 %v8159_v49 }
 0x43f   : > { %3583 = vmatprep.mubr.f32.mxu0 %v9552_v13  ;;  %3840 = vmatprep.mubr.f32.mxu1 %v9552_v13 }
 0x440   : > { %v3245_v58 = vpop.f32.mrb[96].mxu0  ;;  %6462 = vmatpush1.bf16.msra.mxu0 %v9677_v18  ;;  %6502 = vmatprep.subr.bf16.mxu1 %v9642_v25  ;;  %v9681_v18 = vld [vmem:[#allocation29_spill] sm:$0xff] }
 0x441   : > { %v8221_v9 = vmul.f32 0.015625, %v3245_v58  ;;  %v3247_v42 = vpop.f32.mrb[97].mxu0  ;;  %6510 = vmatpush1.bf16.msra.mxu1 %v9643_v23  ;;  %6464 = vmatprep.subr.bf16.mxu0 %v9651_v54  ;;  %v9682_v57 = vmax.f32 %v9680_v45, %v9681_v18  ;;  %v9685_v58 = vld [vmem:[#allocation28_spill] sm:$0xff]  ;;  %v9690_v45 = vmax.f32 %v8030_v11, %v8042_v1 }
 0x442   : > { %v8225_v43 = vmul.f32 0.015625, %v3247_v42  ;;  %3584 = vmatmul.mubr.f32.gmra.mrb[116].mxu0 %v8175_v27  ;;  %3841 = vmatmul.mubr.f32.gmra.mrb[116].mxu1 %v8175_v27  ;;  %v9684_v42 = vld [vmem:[#allocation18_spill] sm:$0xff]  ;;  %v9688_v27 = vmax.f32 %v8025_v10, %v8037_v19 }
 0x443   : > { %9678 = vst [vmem:[#allocation37_spill] sm:$0xff] %v8221_v9  ;;  %v5187_v44 = vrot.slane %v8221_v9, 1  ;;  %v8234_v25 = vsub.f32 %v9682_v57, %v8221_v9  ;;  %3589 = vmatprep.mubr.f32.mxu0 %v9552_v13  ;;  %3846 = vmatprep.mubr.f32.mxu1 %v9552_v13  ;;  %v9686_v23 = vmax.f32 %v9684_v42, %v9685_v58  ;;  %v9710_v9 = vld [vmem:[#allocation9_spill] sm:$0xff] }
 0x444   : > { %9679 = vst [vmem:[#allocation39_spill] sm:$0xff] %v8225_v43  ;;  %v5188_v54 = vrot.slane %v8225_v43, 1  ;;  %v9698_v58 = vmax.f32 %v8103_v7, %v8107_v36 }
 0x445   : > { %9683 = vst [vmem:[#allocation41_spill] sm:$0xff] %v8234_v25  ;;  %v8243_v49 = vsub.f32 %v9686_v23, %v8225_v43  ;;  %v8248_v41 = vsub.f32 %v9688_v27, %v5187_v44  ;;  %v9694_v44 = vmax.f32 %v8059_v33, %v8079_v59 }
 0x446   : > { %v8253_v57 = vsub.f32 %v9690_v45, %v5188_v54  ;;  %3590 = vmatmul.mubr.f32.gmra.mrb[118].mxu0 %v8171_v39  ;;  %3847 = vmatmul.mubr.f32.gmra.mrb[118].mxu1 %v8171_v39  ;;  %v9696_v54 = vmax.f32 %v8064_v46, %v8084_v51 }
 0x447   : > { %9687 = vst [vmem:[#allocation43_spill] sm:$0xff] %v8243_v49  ;;  %9689 = vst [vmem:[#allocation8_spill] sm:$0xff] %v8248_v41  ;;  %3595 = vmatprep.mubr.f32.mxu0 %v9552_v13  ;;  %3852 = vmatprep.mubr.f32.mxu1 %v9552_v13  ;;  %v9706_v41 = vld [vmem:[#allocation16_spill] sm:$0xff]  ;;  %v9707_v49 = vld [vmem:[#allocation27_spill] sm:$0xff] }
 0x448   : > { %9691 = vst [vmem:[#allocation11_spill] sm:$0xff] %v8253_v57  ;;  %v9708_v25 = vmax.f32 %v9706_v41, %v9707_v49 }
 0x44a   : > { %3596 = vmatmul.mubr.f32.gmra.mrb[120].mxu0 %v8187_v5  ;;  %3853 = vmatmul.mubr.f32.gmra.mrb[120].mxu1 %v8187_v5 }
 0x44b   : > { %3601 = vmatprep.mubr.f32.mxu0 %v9552_v13  ;;  %3858 = vmatprep.mubr.f32.mxu1 %v9552_v13 }
 0x44e   : > { %3602 = vmatmul.mubr.f32.gmra.mrb[122].mxu0 %v8183_v14  ;;  %3859 = vmatmul.mubr.f32.gmra.mrb[122].mxu1 %v8183_v14 }
 0x44f   : > { %3607 = vmatprep.mubr.f32.mxu0 %v9552_v13  ;;  %3864 = vmatprep.mubr.f32.mxu1 %v9552_v13 }
 0x452   : > { %3608 = vmatmul.mubr.f32.gmra.mrb[124].mxu0 %v8199_v0  ;;  %3865 = vmatmul.mubr.f32.gmra.mrb[124].mxu1 %v8199_v0 }
 0x453   : > { %3613 = vmatprep.mubr.f32.mxu0 %v9552_v13  ;;  %3870 = vmatprep.mubr.f32.mxu1 %v9552_v13 }
 0x456   : > { %3614 = vmatmul.mubr.f32.gmra.mrb[126].mxu0 %v8195_v22  ;;  %3871 = vmatmul.mubr.f32.gmra.mrb[126].mxu1 %v8195_v22 }
 0x457   : > { %3619 = vmatprep.mubr.f32.mxu0 %v9552_v13  ;;  %3876 = vmatprep.mubr.f32.mxu1 %v9552_v13 }
 0x45a   : > { %3620 = vmatmul.mubr.f32.gmra.mrb[128].mxu0 %v8211_v34  ;;  %3877 = vmatmul.mubr.f32.gmra.mrb[128].mxu1 %v8211_v34 }
 0x45b   : > { %3625 = vmatprep.mubr.f32.mxu0 %v9552_v13  ;;  %3882 = vmatprep.mubr.f32.mxu1 %v9552_v13 }
 0x45e   : > { %3626 = vmatmul.mubr.f32.gmra.mrb[130].mxu0 %v8207_v61  ;;  %3883 = vmatmul.mubr.f32.gmra.mrb[130].mxu1 %v8207_v61 }
 0x45f   : > { %3631 = vmatprep.mubr.f32.mxu0 %v9552_v13  ;;  %3888 = vmatprep.mubr.f32.mxu1 %v9552_v13 }
 0x460   : > { %v3387_v10 = vpop.f32.mrb[98].mxu0 }
 0x461   : > { %v8283_v11 = vmul.f32 0.015625, %v3387_v10  ;;  %v3389_v23 = vpop.f32.mrb[99].mxu0  ;;  %v9700_v10 = vmax.f32 %v8112_v32, %v8116_v8 }
 0x462   : > { %v8285_v19 = vmul.f32 0.015625, %v3389_v23 }
 0x463   : > { %9692 = vst [vmem:[#allocation12_spill] sm:$0xff] %v8283_v11  ;;  %v5191_v1 = vrot.slane %v8283_v11, 1  ;;  %v8292_v27 = vsub.f32 %v9694_v44, %v8283_v11 }
 0x464   : > { %9693 = vst [vmem:[#allocation13_spill] sm:$0xff] %v8285_v19  ;;  %v5192_v18 = vrot.slane %v8285_v19, 1  ;;  %v8299_v42 = vsub.f32 %v9696_v54, %v8285_v19 }
 0x465   : > { %9695 = vst [vmem:[#allocation15_spill] sm:$0xff] %v8292_v27  ;;  %v8304_v45 = vsub.f32 %v9698_v58, %v5191_v1 }
 0x466   : > { %9697 = vst [vmem:[#allocation17_spill] sm:$0xff] %v8299_v42  ;;  %v8309_v23 = vsub.f32 %v9700_v10, %v5192_v18 }
 0x467   : > { %9699 = vst [vmem:[#allocation19_spill] sm:$0xff] %v8304_v45 }
 0x468   : > { %9701 = vst [vmem:[#allocation21_spill] sm:$0xff] %v8309_v23 }
 0x46b   : > { %v8311_v33 = vpop.f32.mrb[80].mxu1 }
 0x46c   : > { %v8313_v59 = vpop.f32.mrb[81].mxu1 }
 0x46d   : > { %3632 = vmatmul.mubr.f32.gmra.mrb[132].mxu0 %v8313_v59  ;;  %3889 = vmatmul.mubr.f32.gmra.mrb[132].mxu1 %v8313_v59 }
 0x46e   : > { %3637 = vmatprep.mubr.f32.mxu0 %v9552_v13  ;;  %3894 = vmatprep.mubr.f32.mxu1 %v9552_v13 }
 0x46f   : > { %v8319_v46 = vpop.f32.mrb[82].mxu1 }
 0x470   : > { %v8321_v51 = vpop.f32.mrb[83].mxu1 }
 0x471   : > { %3638 = vmatmul.mubr.f32.gmra.mrb[134].mxu0 %v8311_v33  ;;  %3895 = vmatmul.mubr.f32.gmra.mrb[134].mxu1 %v8311_v33 }
 0x472   : > { %3643 = vmatprep.mubr.f32.mxu0 %v9552_v13  ;;  %3900 = vmatprep.mubr.f32.mxu1 %v9552_v13 }
 0x473   : > { %v8327_v7 = vpop.f32.mrb[84].mxu1 }
 0x474   : > { %9702 = vst [vmem:[#allocation22_spill] sm:$0xff] %v8327_v7  ;;  %v8329_v36 = vpop.f32.mrb[85].mxu1 }
 0x475   : > { %3644 = vmatmul.mubr.f32.gmra.mrb[136].mxu0 %v8321_v51  ;;  %3901 = vmatmul.mubr.f32.gmra.mrb[136].mxu1 %v8321_v51 }
 0x476   : > { %3649 = vmatprep.mubr.f32.mxu0 %v9552_v13  ;;  %3906 = vmatprep.mubr.f32.mxu1 %v9552_v13 }
 0x477   : > { %v8335_v32 = vpop.f32.mrb[86].mxu1 }
 0x478   : > { %9703 = vst [vmem:[#allocation25_spill] sm:$0xff] %v8335_v32  ;;  %v8337_v8 = vpop.f32.mrb[87].mxu1 }
 0x479   : > { %9704 = vst [vmem:[#allocation23_spill] sm:$0xff] %v8337_v8  ;;  %3650 = vmatmul.mubr.f32.gmra.mrb[138].mxu0 %v8319_v46  ;;  %3907 = vmatmul.mubr.f32.gmra.mrb[138].mxu1 %v8319_v46 }
 0x47a   : > { %3655 = vmatprep.mubr.f32.mxu0 %v9552_v13  ;;  %3912 = vmatprep.mubr.f32.mxu1 %v9552_v13 }
 0x47b   : > { %v8343_v1 = vpop.f32.mrb[88].mxu1 }
 0x47c   : > { %v8345_v44 = vpop.f32.mrb[89].mxu1 }
 0x47d   : > { %9705 = vst [vmem:[#allocation30_spill] sm:$0xff] %v8345_v44  ;;  %3656 = vmatmul.mubr.f32.gmra.mrb[140].mxu0 %v8329_v36  ;;  %3913 = vmatmul.mubr.f32.gmra.mrb[140].mxu1 %v8329_v36 }
 0x47e   : > { %3661 = vmatprep.mubr.f32.mxu0 %v9552_v13  ;;  %3918 = vmatprep.mubr.f32.mxu1 %v9552_v13 }
 0x47f   : > { %v8351_v18 = vpop.f32.mrb[90].mxu1 }
 0x480   : > { %v8353_v54 = vpop.f32.mrb[91].mxu1 }
 0x481   : > { %3662 = vmatmul.mubr.f32.gmra.mrb[142].mxu0 %v8327_v7  ;;  %3919 = vmatmul.mubr.f32.gmra.mrb[142].mxu1 %v8327_v7 }
 0x482   : > { %3667 = vmatprep.mubr.f32.mxu0 %v9552_v13  ;;  %3924 = vmatprep.mubr.f32.mxu1 %v9552_v13 }
 0x483   : > { %v8359_v58 = vpop.f32.mrb[92].mxu1 }
 0x484   : > { %v8361_v10 = vpop.f32.mrb[93].mxu1 }
 0x485   : > { %3668 = vmatmul.mubr.f32.gmra.mrb[144].mxu0 %v8337_v8  ;;  %3925 = vmatmul.mubr.f32.gmra.mrb[144].mxu1 %v8337_v8 }
 0x486   : > { %3673 = vmatprep.mubr.f32.mxu0 %v9552_v13  ;;  %3930 = vmatprep.mubr.f32.mxu1 %v9552_v13 }
 0x487   : > { %v8367_v23 = vpop.f32.mrb[94].mxu1 }
 0x488   : > { %v8369_v45 = vpop.f32.mrb[95].mxu1 }
 0x489   : > { %3674 = vmatmul.mubr.f32.gmra.mrb[146].mxu0 %v8335_v32  ;;  %3931 = vmatmul.mubr.f32.gmra.mrb[146].mxu1 %v8335_v32 }
 0x48a   : > { %3679 = vmatprep.mubr.f32.mxu0 %v9552_v13  ;;  %3936 = vmatprep.mubr.f32.mxu1 %v9552_v13 }
 0x48b   : > { %v3316_v42 = vpop.f32.mrb[96].mxu1 }
 0x48c   : > { %v8375_v27 = vmul.f32 0.015625, %v3316_v42  ;;  %v3318_v19 = vpop.f32.mrb[97].mxu1 }
 0x48d   : > { %v8377_v11 = vmul.f32 0.015625, %v3318_v19  ;;  %3680 = vmatmul.mubr.f32.gmra.mrb[148].mxu0 %v8345_v44  ;;  %3937 = vmatmul.mubr.f32.gmra.mrb[148].mxu1 %v8345_v44  ;;  %v9709_v19 = vld [vmem:[#allocation24_spill] sm:$0xff]  ;;  %v9712_v44 = vmax.f32 %v8027_v4, %v8039_v63 }
 0x48e   : > { %v5189_v57 = vrot.slane %v8375_v27, 1  ;;  %v8386_v43 = vsub.f32 %v9708_v25, %v8375_v27  ;;  %3685 = vmatprep.mubr.f32.mxu0 %v9552_v13  ;;  %3942 = vmatprep.mubr.f32.mxu1 %v9552_v13  ;;  %v9711_v32 = vmax.f32 %v9709_v19, %v9710_v9  ;;  %v9714_v25 = vmax.f32 %v8032_v28, %v8044_v48 }
 0x48f   : > { %v5190_v42 = vrot.slane %v8377_v11, 1  ;;  %v9718_v9 = vmax.f32 %v8061_v26, %v8081_v3  ;;  %v9722_v26 = vmax.f32 %v8105_v40, %v8109_v35 }
 0x490   : > { %v8395_v8 = vsub.f32 %v9711_v32, %v8377_v11  ;;  %v8400_v7 = vsub.f32 %v9712_v44, %v5189_v57  ;;  %v9720_v44 = vmax.f32 %v8066_v53, %v8086_v16  ;;  %v9730_v53 = vld [vmem:[#allocation20_spill] sm:$0xff]  ;;  %v9731_v16 = vld [vmem:[#allocation55_spill] sm:$0xff] }
 0x491   : > { %v8405_v49 = vsub.f32 %v9714_v25, %v5190_v42  ;;  %3686 = vmatmul.mubr.f32.gmra.mrb[150].mxu0 %v8343_v1  ;;  %3943 = vmatmul.mubr.f32.gmra.mrb[150].mxu1 %v8343_v1 }
 0x492   : > { %9713 = vst [vmem:[#allocation26_spill] sm:$0xff] %v8400_v7  ;;  %3691 = vmatprep.mubr.f32.mxu0 %v9552_v13  ;;  %3948 = vmatprep.mubr.f32.mxu1 %v9552_v13  ;;  %v8698_v7 = vld [vmem:[#allocation2 + $0x240] sm:$0xff] }
 0x493   : > { %9715 = vst [vmem:[#allocation32_spill] sm:$0xff] %v8405_v49  ;;  %9741 = vst [vmem:[#allocation48_spill] sm:$0xff] %v8698_v7 }
 0x495   : > { %3692 = vmatmul.mubr.f32.gmra.mrb[152].mxu0 %v8353_v54  ;;  %3949 = vmatmul.mubr.f32.gmra.mrb[152].mxu1 %v8353_v54 }
 0x496   : > { %3697 = vmatprep.mubr.f32.mxu0 %v9552_v13  ;;  %3954 = vmatprep.mubr.f32.mxu1 %v9552_v13 }
 0x499   : > { %3698 = vmatmul.mubr.f32.gmra.mrb[154].mxu0 %v8351_v18  ;;  %3955 = vmatmul.mubr.f32.gmra.mrb[154].mxu1 %v8351_v18 }
 0x49a   : > { %3703 = vmatprep.mubr.f32.mxu0 %v9552_v13  ;;  %3960 = vmatprep.mubr.f32.mxu1 %v9552_v13 }
 0x49d   : > { %3704 = vmatmul.mubr.f32.gmra.mrb[156].mxu0 %v8361_v10  ;;  %3961 = vmatmul.mubr.f32.gmra.mrb[156].mxu1 %v8361_v10 }
 0x49e   : > { %3709 = vmatprep.mubr.f32.mxu0 %v9552_v13  ;;  %3966 = vmatprep.mubr.f32.mxu1 %v9552_v13 }
 0x4a1   : > { %3710 = vmatmul.mubr.f32.gmra.mrb[158].mxu0 %v8359_v58  ;;  %3967 = vmatmul.mubr.f32.gmra.mrb[158].mxu1 %v8359_v58 }
 0x4a2   : > { %3715 = vmatprep.mubr.f32.mxu0 %v9552_v13  ;;  %3972 = vmatprep.mubr.f32.mxu1 %v9552_v13 }
 0x4a5   : > { %3716 = vmatmul.mubr.f32.gmra.mrb[160].mxu0 %v8369_v45  ;;  %3973 = vmatmul.mubr.f32.gmra.mrb[160].mxu1 %v8369_v45 }
 0x4a6   : > { %3721 = vmatprep.mubr.f32.mxu0 %v9552_v13  ;;  %3978 = vmatprep.mubr.f32.mxu1 %v9552_v13 }
 0x4a9   : > { %3722 = vmatmul.mubr.f32.gmra.mrb[162].mxu0 %v8367_v23  ;;  %3979 = vmatmul.mubr.f32.gmra.mrb[162].mxu1 %v8367_v23 }
 0x4aa   : > { %4049 = vmatprep.mubr.f32.mxu0 %v9552_v13  ;;  %4312 = vmatprep.mubr.f32.mxu1 %v9552_v13 }
 0x4ab   : > { %v3458_v4 = vpop.f32.mrb[98].mxu1 }
 0x4ac   : > { %v8435_v28 = vmul.f32 0.015625, %v3458_v4  ;;  %v3460_v63 = vpop.f32.mrb[99].mxu1 }
 0x4ad   : > { %v8437_v48 = vmul.f32 0.015625, %v3460_v63  ;;  %4050 = vmatmul.mubr.f32.vlgmr.msra.gmra.mrb[164].mxu0 %v8130_v2  ;;  %4313 = vmatmul.mubr.f32.vlgmr.msra.gmra.mrb[164].mxu1 %v8128_v38 }
 0x4ae   : > { %9716 = vst [vmem:[#allocation31_spill] sm:$0xff] %v8435_v28  ;;  %v5193_v41 = vrot.slane %v8435_v28, 1  ;;  %v8446_v57 = vsub.f32 %v9718_v9, %v8435_v28  ;;  %6466 = vmatpush1.bf16.msra.mxu0 %v9654_v20  ;;  %4055 = vmatprep.mubr.f32.mxu0 %v9552_v13  ;;  %v9724_v20 = vmax.f32 %v8114_v30, %v8118_v12  ;;  %v8556_v30 = vld [vmem:[#allocation2] sm:$0xff]  ;;  %v8685_v28 = vld [vmem:[#allocation2 + $0x210] sm:$0xff] }
 0x4af   : > { %9717 = vst [vmem:[#allocation34_spill] sm:$0xff] %v8437_v48  ;;  %v5194_v32 = vrot.slane %v8437_v48, 1  ;;  %v8455_v42 = vsub.f32 %v9720_v44, %v8437_v48  ;;  %4318 = vmatprep.mubr.f32.mxu1 %v9552_v13  ;;  %6468 = vmatprep.subr.bf16.mxu0 %v9656_v6  ;;  %v8586_v9 = vld [vmem:[#allocation2 + $0x80] sm:$0xff]  ;;  %v8589_v44 = vld [vmem:[#allocation2 + $0x90] sm:$0xff]  ;;  %9738 = vst [vmem:[#allocation44_spill] sm:$0xff] %v8685_v28 }
 0x4b0   : > { %9719 = vst [vmem:[#allocation33_spill] sm:$0xff] %v8446_v57  ;;  %v8462_v3 = vsub.f32 %v9722_v26, %v5193_v41  ;;  %v8666_v57 = vld [vmem:[#allocation2 + $0x1c0] sm:$0xff] }
 0x4b1   : > { %9721 = vst [vmem:[#allocation36_spill] sm:$0xff] %v8455_v42  ;;  %v8467_v19 = vsub.f32 %v9724_v20, %v5194_v32  ;;  %4056 = vmatmul.mubr.f32.gmra.mrb[166].mxu0 %v8128_v38  ;;  %4319 = vmatmul.mubr.f32.gmra.mrb[166].mxu1 %v8140_v37  ;;  %v8682_v48 = vld [vmem:[#allocation2 + $0x200] sm:$0xff] }
 0x4b2   : > { %9723 = vst [vmem:[#allocation35_spill] sm:$0xff] %v8462_v3  ;;  %4061 = vmatprep.mubr.f32.mxu0 %v9552_v13  ;;  %4324 = vmatprep.mubr.f32.mxu1 %v9552_v13  ;;  %9737 = vst [vmem:[#allocation42_spill] sm:$0xff] %v8682_v48 }
 0x4b3   : > { %9725 = vst [vmem:[#allocation38_spill] sm:$0xff] %v8467_v19  ;;  %6470 = vmatpush1.bf16.msra.mxu0 %v9658_v60  ;;  %v8669_v19 = vld [vmem:[#allocation2 + $0x1d0] sm:$0xff] }
 0x4b4   : > { %6472 = vmatprep.subr.bf16.mxu0 %v9661_v31 }
 0x4b5   : > { %4062 = vmatmul.mubr.f32.gmra.mrb[168].mxu0 %v8140_v37  ;;  %4325 = vmatmul.mubr.f32.gmra.mrb[168].mxu1 %v8136_v29 }
 0x4b6   : > { %4067 = vmatprep.mubr.f32.mxu0 %v9552_v13  ;;  %4330 = vmatprep.mubr.f32.mxu1 %v9552_v13 }
 0x4b7   : > { %6474 = vmatpush1.bf16.msra.mxu0 %v9663_v50  ;;  %v8570_v50 = vld [vmem:[#allocation2 + $0x8] sm:$0xff] }
 0x4b8   : > { %6476 = vmatprep.subr.bf16.mxu0 %v9630_v52  ;;  %v9726_v52 = vld [vmem:[#allocation49_spill] sm:$0xff] }
 0x4b9   : > { %4068 = vmatmul.mubr.f32.gmra.mrb[170].mxu0 %v8136_v29  ;;  %4331 = vmatmul.mubr.f32.gmra.mrb[170].mxu1 %v8151_v24  ;;  %v8561_v29 = vld [vmem:[#allocation2 + $0x10] sm:$0xff] }
 0x4ba   : > { %4073 = vmatprep.mubr.f32.mxu0 %v9552_v13  ;;  %4336 = vmatprep.mubr.f32.mxu1 %v9552_v13 }
 0x4bb   : > { %6478 = vmatpush1.bf16.msra.mxu0 %v9631_v56  ;;  %v9727_v56 = vld [vmem:[#allocation10_spill] sm:$0xff] }
 0x4bc   : > { %6480 = vmatprep.subr.bf16.mxu0 %v9634_v47  ;;  %v9728_v47 = vld [vmem:[#allocation51_spill] sm:$0xff] }
 0x4bd   : > { %4074 = vmatmul.mubr.f32.gmra.mrb[172].mxu0 %v8151_v24  ;;  %4337 = vmatmul.mubr.f32.gmra.mrb[172].mxu1 %v8147_v62  ;;  %v8567_v24 = vld [vmem:[#allocation2 + $0x50] sm:$0xff] }
 0x4be   : > { %4079 = vmatprep.mubr.f32.mxu0 %v9552_v13  ;;  %4342 = vmatprep.mubr.f32.mxu1 %v9552_v13 }
 0x4bf   : > { %6482 = vmatpush1.bf16.msra.mxu0 %v9637_v15  ;;  %v9729_v15 = vld [vmem:[#allocation53_spill] sm:$0xff] }
 0x4c0   : > { %6484 = vmatprep.subr.bf16.mxu0 %v9670_v21 }
 0x4c1   : > { %4080 = vmatmul.mubr.f32.gmra.mrb[174].mxu0 %v8147_v62  ;;  %4343 = vmatmul.mubr.f32.gmra.mrb[174].mxu1 %v8163_v55  ;;  %v8564_v62 = vld [vmem:[#allocation2 + $0x40] sm:$0xff] }
 0x4c2   : > { %4085 = vmatprep.mubr.f32.mxu0 %v9552_v13  ;;  %4348 = vmatprep.mubr.f32.mxu1 %v9552_v13 }
 0x4c3   : > { %6486 = vmatpush1.bf16.msra.mxu0 %v9672_v17  ;;  %v8579_v17 = vld [vmem:[#allocation2 + $0x58] sm:$0xff] }
 0x4c4   : > { %6488 = vmatprep.subr.bf16.mxu0 %v9726_v52  ;;  %v8592_v52 = vld [vmem:[#allocation2 + $0x88] sm:$0xff] }
 0x4c5   : > { %4086 = vmatmul.mubr.f32.gmra.mrb[176].mxu0 %v8163_v55  ;;  %4349 = vmatmul.mubr.f32.gmra.mrb[176].mxu1 %v9727_v56 }
 0x4c6   : > { %4091 = vmatprep.mubr.f32.mxu0 %v9552_v13  ;;  %4354 = vmatprep.mubr.f32.mxu1 %v9552_v13 }
 0x4c7   : > { %6490 = vmatpush1.bf16.msra.mxu0 %v9728_v47  ;;  %v8595_v47 = vld [vmem:[#allocation2 + $0x98] sm:$0xff] }
 0x4c8   : > { %6492 = vmatprep.subr.bf16.mxu0 %v9729_v15 }
 0x4c9   : > { %4092 = vmatmul.mubr.f32.gmra.mrb[178].mxu0 %v9727_v56  ;;  %4355 = vmatmul.mubr.f32.gmra.mrb[178].mxu1 %v9730_v53 }
 0x4ca   : > { %4097 = vmatprep.mubr.f32.mxu0 %v9552_v13  ;;  %4360 = vmatprep.mubr.f32.mxu1 %v9552_v13 }
 0x4cb   : > { %6494 = vmatpush1.bf16.msra.mxu0 %v9731_v16 }
 0x4cd   : > { %4098 = vmatmul.mubr.f32.gmra.mrb[180].mxu0 %v9730_v53  ;;  %4361 = vmatmul.mubr.f32.gmra.mrb[180].mxu1 %v8171_v39 }
 0x4ce   : > { %4103 = vmatprep.mubr.f32.mxu0 %v9552_v13  ;;  %4366 = vmatprep.mubr.f32.mxu1 %v9552_v13 }
 0x4d1   : > { %4104 = vmatmul.mubr.f32.gmra.mrb[182].mxu0 %v8171_v39  ;;  %4367 = vmatmul.mubr.f32.gmra.mrb[182].mxu1 %v8187_v5 }
 0x4d2   : > { %4109 = vmatprep.mubr.f32.mxu0 %v9552_v13  ;;  %4372 = vmatprep.mubr.f32.mxu1 %v9552_v13 }
 0x4d5   : > { %4110 = vmatmul.mubr.f32.gmra.mrb[184].mxu0 %v8187_v5  ;;  %4373 = vmatmul.mubr.f32.gmra.mrb[184].mxu1 %v8183_v14 }
 0x4d6   : > { %4115 = vmatprep.mubr.f32.mxu0 %v9552_v13  ;;  %4378 = vmatprep.mubr.f32.mxu1 %v9552_v13 }
 0x4d9   : > { %4116 = vmatmul.mubr.f32.gmra.mrb[186].mxu0 %v8183_v14  ;;  %4379 = vmatmul.mubr.f32.gmra.mrb[186].mxu1 %v8199_v0  ;;  %v8573_v14 = vld [vmem:[#allocation2 + $0x18] sm:$0xff] }
 0x4da   : > { %4121 = vmatprep.mubr.f32.mxu0 %v9552_v13  ;;  %4384 = vmatprep.mubr.f32.mxu1 %v9552_v13 }
 0x4dd   : > { %4122 = vmatmul.mubr.f32.gmra.mrb[188].mxu0 %v8199_v0  ;;  %4385 = vmatmul.mubr.f32.gmra.mrb[188].mxu1 %v8195_v22 }
 0x4de   : > { %4127 = vmatprep.mubr.f32.mxu0 %v9552_v13  ;;  %4390 = vmatprep.mubr.f32.mxu1 %v9552_v13 }
 0x4e1   : > { %4128 = vmatmul.mubr.f32.gmra.mrb[190].mxu0 %v8195_v22  ;;  %4391 = vmatmul.mubr.f32.gmra.mrb[190].mxu1 %v8211_v34  ;;  %v8576_v22 = vld [vmem:[#allocation2 + $0x48] sm:$0xff] }
 0x4e2   : > { %4133 = vmatprep.mubr.f32.mxu0 %v9552_v13  ;;  %4396 = vmatprep.mubr.f32.mxu1 %v9552_v13 }
 0x4e5   : > { %4134 = vmatmul.mubr.f32.gmra.mrb[192].mxu0 %v8211_v34  ;;  %4397 = vmatmul.mubr.f32.gmra.mrb[192].mxu1 %v8207_v61 }
 0x4e6   : > { %4139 = vmatprep.mubr.f32.mxu0 %v9552_v13  ;;  %4402 = vmatprep.mubr.f32.mxu1 %v9552_v13 }
 0x4e9   : > { %4140 = vmatmul.mubr.f32.gmra.mrb[194].mxu0 %v8207_v61  ;;  %4403 = vmatmul.mubr.f32.gmra.mrb[194].mxu1 %v8313_v59 }
 0x4ea   : > { %4145 = vmatprep.mubr.f32.mxu0 %v9552_v13  ;;  %4408 = vmatprep.mubr.f32.mxu1 %v9552_v13 }
 0x4ed   : > { %4146 = vmatmul.mubr.f32.gmra.mrb[196].mxu0 %v8313_v59  ;;  %4409 = vmatmul.mubr.f32.gmra.mrb[196].mxu1 %v8311_v33 }
 0x4ee   : > { %4151 = vmatprep.mubr.f32.mxu0 %v9552_v13  ;;  %4414 = vmatprep.mubr.f32.mxu1 %v9552_v13 }
 0x4f1   : > { %4152 = vmatmul.mubr.f32.gmra.mrb[198].mxu0 %v8311_v33  ;;  %4415 = vmatmul.mubr.f32.gmra.mrb[198].mxu1 %v8321_v51 }
 0x4f2   : > { %4157 = vmatprep.mubr.f32.mxu0 %v9552_v13  ;;  %4420 = vmatprep.mubr.f32.mxu1 %v9552_v13 }
 0x4f5   : > { %4158 = vmatmul.mubr.f32.gmra.mrb[200].mxu0 %v8321_v51  ;;  %4421 = vmatmul.mubr.f32.gmra.mrb[200].mxu1 %v8319_v46  ;;  %v3537_v34 = vpop.f32.mrb[100].mxu0  ;;  %v3794_v61 = vpop.f32.mrb[100].mxu1  ;;  %v9732_v51 = vld [vmem:[#allocation22_spill] sm:$0xff] }
 0x4f6   : > { %4163 = vmatprep.mubr.f32.mxu0 %v9552_v13  ;;  %4426 = vmatprep.mubr.f32.mxu1 %v9552_v13  ;;  %v3539_v40 = vpop.f32.mrb[101].mxu0  ;;  %v3796_v35 = vpop.f32.mrb[101].mxu1  ;;  %v4499_v12 = vmul.f32 %v8556_v30, %v3537_v34  ;;  %v4501_v37 = vmul.f32 %v8561_v29, %v3794_v61  ;;  %v9733_v34 = vld [vmem:[#allocation23_spill] sm:$0xff] }
 0x4f7   : > { %v4500_v39 = vmul.f32 %v8570_v50, %v3539_v40  ;;  %v4502_v5 = vmul.f32 %v8573_v14, %v3796_v35 }
 0x4f9   : > { %4164 = vmatmul.mubr.f32.gmra.mrb[202].mxu0 %v8319_v46  ;;  %4427 = vmatmul.mubr.f32.gmra.mrb[202].mxu1 %v8329_v36  ;;  %v3543_v0 = vpop.f32.mrb[102].mxu0  ;;  %v3800_v38 = vpop.f32.mrb[102].mxu1 }
 0x4fa   : > { %4169 = vmatprep.mubr.f32.mxu0 %v9552_v13  ;;  %4432 = vmatprep.mubr.f32.mxu1 %v9552_v13  ;;  %v4507_v6 = vmul.f32 %v8564_v62, %v3543_v0  ;;  %v4509_v60 = vmul.f32 %v8567_v24, %v3800_v38  ;;  %v3545_v31 = vpop.f32.mrb[103].mxu0  ;;  %v3802_v55 = vpop.f32.mrb[103].mxu1  ;;  %v8602_v0 = vld [vmem:[#allocation2 + $0xc0] sm:$0xff] }
 0x4fb   : > { %v4508_v21 = vmul.f32 %v8576_v22, %v3545_v31  ;;  %v4510_v33 = vmul.f32 %v8579_v17, %v3802_v55  ;;  %v8608_v55 = vld [vmem:[#allocation2 + $0xc8] sm:$0xff] }
 0x4fc   : > { %v4755_v59 = vadd.f32 %v4507_v6, %v4499_v12  ;;  %v4797_v46 = vadd.f32 %v4509_v60, %v4501_v37  ;;  %v8605_v37 = vld [vmem:[#allocation2 + $0xd0] sm:$0xff] }
 0x4fd   : > { %4170 = vmatmul.mubr.f32.gmra.mrb[204].mxu0 %v8329_v36  ;;  %4433 = vmatmul.mubr.f32.gmra.mrb[204].mxu1 %v9732_v51  ;;  %v4776_v25 = vadd.f32 %v4508_v21, %v4500_v39  ;;  %v4818_v4 = vadd.f32 %v4510_v33, %v4502_v5  ;;  %v3549_v63 = vpop.f32.mrb[104].mxu0  ;;  %v3806_v41 = vpop.f32.mrb[104].mxu1  ;;  %v8611_v5 = vld [vmem:[#allocation2 + $0xd8] sm:$0xff] }
 0x4fe   : > { %4175 = vmatprep.mubr.f32.mxu0 %v9552_v13  ;;  %4438 = vmatprep.mubr.f32.mxu1 %v9552_v13  ;;  %v4515_v32 = vmul.f32 %v8586_v9, %v3549_v63  ;;  %v4517_v26 = vmul.f32 %v8589_v44, %v3806_v41  ;;  %v3551_v20 = vpop.f32.mrb[105].mxu0  ;;  %v3808_v36 = vpop.f32.mrb[105].mxu1  ;;  %v8618_v41 = vld [vmem:[#allocation2 + $0x100] sm:$0xff] }
 0x4ff   : > { %v4516_v56 = vmul.f32 %v8592_v52, %v3551_v20  ;;  %v4518_v15 = vmul.f32 %v8595_v47, %v3808_v36 }
 0x500   : > { %v4756_v53 = vadd.f32 %v4755_v59, %v4515_v32  ;;  %v4798_v16 = vadd.f32 %v4797_v46, %v4517_v26  ;;  %v9734_v46 = vld [vmem:[#allocation25_spill] sm:$0xff]  ;;  %v8621_v26 = vld [vmem:[#allocation2 + $0x110] sm:$0xff] }
 0x501   : > { %4176 = vmatmul.mubr.f32.gmra.mrb[206].mxu0 %v9732_v51  ;;  %4439 = vmatmul.mubr.f32.gmra.mrb[206].mxu1 %v9733_v34  ;;  %v4777_v61 = vadd.f32 %v4776_v25, %v4516_v56  ;;  %v4819_v40 = vadd.f32 %v4818_v4, %v4518_v15  ;;  %v3555_v35 = vpop.f32.mrb[106].mxu0  ;;  %v3812_v12 = vpop.f32.mrb[106].mxu1  ;;  %v8624_v15 = vld [vmem:[#allocation2 + $0x108] sm:$0xff] }
 0x502   : > { %4181 = vmatprep.mubr.f32.mxu0 %v9552_v13  ;;  %4444 = vmatprep.mubr.f32.mxu1 %v9552_v13  ;;  %v4523_v38 = vmul.f32 %v8602_v0, %v3555_v35  ;;  %v4525_v6 = vmul.f32 %v8605_v37, %v3812_v12  ;;  %v3557_v60 = vpop.f32.mrb[107].mxu0  ;;  %v3814_v31 = vpop.f32.mrb[107].mxu1  ;;  %v9735_v35 = vld [vmem:[#allocation30_spill] sm:$0xff] }
 0x503   : > { %v4524_v39 = vmul.f32 %v8608_v55, %v3557_v60  ;;  %v4526_v21 = vmul.f32 %v8611_v5, %v3814_v31  ;;  %v8634_v31 = vld [vmem:[#allocation2 + $0x140] sm:$0xff] }
 0x504   : > { %v4757_v33 = vadd.f32 %v4756_v53, %v4523_v38  ;;  %v4799_v59 = vadd.f32 %v4798_v16, %v4525_v6  ;;  %v8627_v16 = vld [vmem:[#allocation2 + $0x118] sm:$0xff] }
 0x505   : > { %4182 = vmatmul.mubr.f32.gmra.mrb[208].mxu0 %v9733_v34  ;;  %4445 = vmatmul.mubr.f32.gmra.mrb[208].mxu1 %v9734_v46  ;;  %v4778_v51 = vadd.f32 %v4777_v61, %v4524_v39  ;;  %v4820_v25 = vadd.f32 %v4819_v40, %v4526_v21  ;;  %v3561_v4 = vpop.f32.mrb[108].mxu0  ;;  %v3818_v63 = vpop.f32.mrb[108].mxu1  ;;  %v8637_v21 = vld [vmem:[#allocation2 + $0x150] sm:$0xff] }
 0x506   : > { %4187 = vmatprep.mubr.f32.mxu0 %v9552_v13  ;;  %4450 = vmatprep.mubr.f32.mxu1 %v9552_v13  ;;  %v4531_v32 = vmul.f32 %v8618_v41, %v3561_v4  ;;  %v4533_v20 = vmul.f32 %v8621_v26, %v3818_v63  ;;  %v3563_v36 = vpop.f32.mrb[109].mxu0  ;;  %v3820_v56 = vpop.f32.mrb[109].mxu1  ;;  %v8640_v4 = vld [vmem:[#allocation2 + $0x148] sm:$0xff] }
 0x507   : > { %v4532_v53 = vmul.f32 %v8624_v15, %v3563_v36  ;;  %v4534_v34 = vmul.f32 %v8627_v16, %v3820_v56 }
 0x508   : > { %v4758_v61 = vadd.f32 %v4757_v33, %v4531_v32  ;;  %v4800_v40 = vadd.f32 %v4799_v59, %v4533_v20 }
 0x509   : > { %4188 = vmatmul.mubr.f32.gmra.mrb[210].mxu0 %v9734_v46  ;;  %4451 = vmatmul.mubr.f32.gmra.mrb[210].mxu1 %v9735_v35  ;;  %v4779_v12 = vadd.f32 %v4778_v51, %v4532_v53  ;;  %v4821_v38 = vadd.f32 %v4820_v25, %v4534_v34  ;;  %v3567_v6 = vpop.f32.mrb[110].mxu0  ;;  %v3824_v60 = vpop.f32.mrb[110].mxu1  ;;  %v8643_v25 = vld [vmem:[#allocation2 + $0x158] sm:$0xff] }
 0x50a   : > { %4193 = vmatprep.mubr.f32.mxu0 %v9552_v13  ;;  %4456 = vmatprep.mubr.f32.mxu1 %v9552_v13  ;;  %v4539_v39 = vmul.f32 %v8634_v31, %v3567_v6  ;;  %v4541_v33 = vmul.f32 %v8637_v21, %v3824_v60  ;;  %v3569_v59 = vpop.f32.mrb[111].mxu0  ;;  %v3826_v46 = vpop.f32.mrb[111].mxu1  ;;  %v8650_v6 = vld [vmem:[#allocation2 + $0x180] sm:$0xff] }
 0x50b   : > { %v4540_v51 = vmul.f32 %v8640_v4, %v3569_v59  ;;  %v4542_v63 = vmul.f32 %v8643_v25, %v3826_v46  ;;  %v8653_v59 = vld [vmem:[#allocation2 + $0x190] sm:$0xff] }
 0x50c   : > { %v4759_v32 = vadd.f32 %v4758_v61, %v4539_v39  ;;  %v4801_v20 = vadd.f32 %v4800_v40, %v4541_v33  ;;  %v8656_v39 = vld [vmem:[#allocation2 + $0x188] sm:$0xff] }
 0x50d   : > { %4194 = vmatmul.mubr.f32.gmra.mrb[212].mxu0 %v9735_v35  ;;  %4457 = vmatmul.mubr.f32.gmra.mrb[212].mxu1 %v8343_v1  ;;  %v4780_v36 = vadd.f32 %v4779_v12, %v4540_v51  ;;  %v4822_v56 = vadd.f32 %v4821_v38, %v4542_v63  ;;  %v3573_v53 = vpop.f32.mrb[112].mxu0  ;;  %v3830_v34 = vpop.f32.mrb[112].mxu1  ;;  %v8659_v38 = vld [vmem:[#allocation2 + $0x198] sm:$0xff] }
 0x50e   : > { %4199 = vmatprep.mubr.f32.mxu0 %v9552_v13  ;;  %4462 = vmatprep.mubr.f32.mxu1 %v9552_v13  ;;  %v4547_v60 = vmul.f32 %v8650_v6, %v3573_v53  ;;  %v4549_v61 = vmul.f32 %v8653_v59, %v3830_v34  ;;  %v3575_v40 = vpop.f32.mrb[113].mxu0  ;;  %v3832_v35 = vpop.f32.mrb[113].mxu1 }
 0x50f   : > { %v4548_v12 = vmul.f32 %v8656_v39, %v3575_v40  ;;  %v4550_v33 = vmul.f32 %v8659_v38, %v3832_v35 }
 0x510   : > { %v4760_v46 = vadd.f32 %v4759_v32, %v4547_v60  ;;  %v4802_v51 = vadd.f32 %v4801_v20, %v4549_v61  ;;  %v8672_v60 = vld [vmem:[#allocation2 + $0x1c8] sm:$0xff] }
 0x511   : > { %4200 = vmatmul.mubr.f32.gmra.mrb[214].mxu0 %v8343_v1  ;;  %4463 = vmatmul.mubr.f32.gmra.mrb[214].mxu1 %v8353_v54  ;;  %v4781_v63 = vadd.f32 %v4780_v36, %v4548_v12  ;;  %v4823_v53 = vadd.f32 %v4822_v56, %v4550_v33  ;;  %v3579_v42 = vpop.f32.mrb[114].mxu0  ;;  %v3836_v34 = vpop.f32.mrb[114].mxu1  ;;  %v8675_v56 = vld [vmem:[#allocation2 + $0x1d8] sm:$0xff] }
 0x512   : > { %4205 = vmatprep.mubr.f32.mxu0 %v9552_v13  ;;  %4468 = vmatprep.mubr.f32.mxu1 %v9552_v13  ;;  %v4555_v40 = vmul.f32 %v8666_v57, %v3579_v42  ;;  %v4557_v32 = vmul.f32 %v8669_v19, %v3836_v34  ;;  %v3581_v20 = vpop.f32.mrb[115].mxu0  ;;  %v3838_v1 = vpop.f32.mrb[115].mxu1  ;;  %9736 = vst [vmem:[#allocation40_spill] sm:$0xff] %v8675_v56 }
 0x513   : > { %v4556_v36 = vmul.f32 %v8672_v60, %v3581_v20  ;;  %v4558_v61 = vmul.f32 %v8675_v56, %v3838_v1 }
 0x514   : > { %v4761_v35 = vadd.f32 %v4760_v46, %v4555_v40  ;;  %v4803_v12 = vadd.f32 %v4802_v51, %v4557_v32  ;;  %v8688_v40 = vld [vmem:[#allocation2 + $0x208] sm:$0xff] }
 0x515   : > { %4206 = vmatmul.mubr.f32.gmra.mrb[216].mxu0 %v8353_v54  ;;  %4469 = vmatmul.mubr.f32.gmra.mrb[216].mxu1 %v8351_v18  ;;  %v4782_v42 = vadd.f32 %v4781_v63, %v4556_v36  ;;  %v4824_v33 = vadd.f32 %v4823_v53, %v4558_v61  ;;  %v3585_v3 = vpop.f32.mrb[116].mxu0  ;;  %v3842_v34 = vpop.f32.mrb[116].mxu1  ;;  %9739 = vst [vmem:[#allocation46_spill] sm:$0xff] %v8688_v40  ;;  %v8691_v53 = vld [vmem:[#allocation2 + $0x218] sm:$0xff] }
 0x516   : > { %4211 = vmatprep.mubr.f32.mxu0 %v9552_v13  ;;  %4474 = vmatprep.mubr.f32.mxu1 %v9552_v13  ;;  %v4563_v20 = vmul.f32 %v8682_v48, %v3585_v3  ;;  %v4565_v46 = vmul.f32 %v8685_v28, %v3842_v34  ;;  %v3587_v51 = vpop.f32.mrb[117].mxu0  ;;  %v3844_v54 = vpop.f32.mrb[117].mxu1  ;;  %9740 = vst [vmem:[#allocation45_spill] sm:$0xff] %v8691_v53 }
 0x517   : > { %v4564_v63 = vmul.f32 %v8688_v40, %v3587_v51  ;;  %v4566_v32 = vmul.f32 %v8691_v53, %v3844_v54  ;;  %v8701_v40 = vld [vmem:[#allocation2 + $0x250] sm:$0xff] }
 0x518   : > { %v4762_v1 = vadd.f32 %v4761_v35, %v4563_v20  ;;  %v4804_v36 = vadd.f32 %v4803_v12, %v4565_v46  ;;  %9742 = vst [vmem:[#allocation47_spill] sm:$0xff] %v8701_v40  ;;  %v8704_v20 = vld [vmem:[#allocation2 + $0x248] sm:$0xff] }
 0x519   : > { %4212 = vmatmul.mubr.f32.gmra.mrb[218].mxu0 %v8351_v18  ;;  %4475 = vmatmul.mubr.f32.gmra.mrb[218].mxu1 %v8361_v10  ;;  %v4783_v3 = vadd.f32 %v4782_v42, %v4564_v63  ;;  %v4825_v61 = vadd.f32 %v4824_v33, %v4566_v32  ;;  %v3591_v49 = vpop.f32.mrb[118].mxu0  ;;  %v3848_v34 = vpop.f32.mrb[118].mxu1  ;;  %9743 = vst [vmem:[#allocation50_spill] sm:$0xff] %v8704_v20  ;;  %v8707_v33 = vld [vmem:[#allocation2 + $0x258] sm:$0xff] }
 0x51a   : > { %4217 = vmatprep.mubr.f32.mxu0 %v9552_v13  ;;  %4480 = vmatprep.mubr.f32.mxu1 %v9552_v13  ;;  %v4571_v51 = vmul.f32 %v8698_v7, %v3591_v49  ;;  %v4573_v35 = vmul.f32 %v8701_v40, %v3848_v34  ;;  %v3593_v12 = vpop.f32.mrb[119].mxu0  ;;  %v3850_v18 = vpop.f32.mrb[119].mxu1  ;;  %9744 = vst [vmem:[#allocation52_spill] sm:$0xff] %v8707_v33  ;;  %v8714_v40 = vld [vmem:[#allocation2 + $0x280] sm:$0xff] }
 0x51b   : > { %v4572_v42 = vmul.f32 %v8704_v20, %v3593_v12  ;;  %v4574_v46 = vmul.f32 %v8707_v33, %v3850_v18  ;;  %9745 = vst [vmem:[#allocation54_spill] sm:$0xff] %v8714_v40  ;;  %v8717_v20 = vld [vmem:[#allocation2 + $0x290] sm:$0xff] }
 0x51c   : > { %v4763_v54 = vadd.f32 %v4762_v1, %v4571_v51  ;;  %v4805_v63 = vadd.f32 %v4804_v36, %v4573_v35  ;;  %9746 = vst [vmem:[#allocation14_spill] sm:$0xff] %v8717_v20  ;;  %v8720_v51 = vld [vmem:[#allocation2 + $0x288] sm:$0xff] }
 0x51d   : > { %4218 = vmatmul.mubr.f32.gmra.mrb[220].mxu0 %v8361_v10  ;;  %4481 = vmatmul.mubr.f32.gmra.mrb[220].mxu1 %v8359_v58  ;;  %v4784_v49 = vadd.f32 %v4783_v3, %v4572_v42  ;;  %v4826_v32 = vadd.f32 %v4825_v61, %v4574_v46  ;;  %v3597_v7 = vpop.f32.mrb[120].mxu0  ;;  %v3854_v34 = vpop.f32.mrb[120].mxu1  ;;  %9747 = vst [vmem:[#allocation29_spill] sm:$0xff] %v8720_v51  ;;  %v8723_v61 = vld [vmem:[#allocation2 + $0x298] sm:$0xff] }
 0x51e   : > { %4223 = vmatprep.mubr.f32.mxu0 %v9552_v13  ;;  %4486 = vmatprep.mubr.f32.mxu1 %v9552_v13  ;;  %v4579_v12 = vmul.f32 %v8714_v40, %v3597_v7  ;;  %v4581_v1 = vmul.f32 %v8717_v20, %v3854_v34  ;;  %v3599_v36 = vpop.f32.mrb[121].mxu0  ;;  %v3856_v10 = vpop.f32.mrb[121].mxu1  ;;  %9748 = vst [vmem:[#allocation18_spill] sm:$0xff] %v8723_v61  ;;  %v8730_v20 = vld [vmem:[#allocation2 + $0x2c0] sm:$0xff] }
 0x51f   : > { %v4580_v3 = vmul.f32 %v8720_v51, %v3599_v36  ;;  %v4582_v35 = vmul.f32 %v8723_v61, %v3856_v10  ;;  %9749 = vst [vmem:[#allocation28_spill] sm:$0xff] %v8730_v20  ;;  %v8733_v51 = vld [vmem:[#allocation2 + $0x2d0] sm:$0xff] }
 0x520   : > { %v4764_v18 = vadd.f32 %v4763_v54, %v4579_v12  ;;  %v4806_v42 = vadd.f32 %v4805_v63, %v4581_v1  ;;  %9750 = vst [vmem:[#allocation16_spill] sm:$0xff] %v8733_v51  ;;  %v8736_v12 = vld [vmem:[#allocation2 + $0x2c8] sm:$0xff]  ;;  %v8762_v61 = vld [vmem:[#allocation2 + $0x350] sm:$0xff] }
 0x521   : > { %4224 = vmatmul.mubr.f32.gmra.mrb[222].mxu0 %v8359_v58  ;;  %4487 = vmatmul.mubr.f32.gmra.mrb[222].mxu1 %v8369_v45  ;;  %v4785_v7 = vadd.f32 %v4784_v49, %v4580_v3  ;;  %v4827_v46 = vadd.f32 %v4826_v32, %v4582_v35  ;;  %v3603_v40 = vpop.f32.mrb[122].mxu0  ;;  %v3860_v34 = vpop.f32.mrb[122].mxu1  ;;  %9751 = vst [vmem:[#allocation27_spill] sm:$0xff] %v8736_v12  ;;  %v8739_v32 = vld [vmem:[#allocation2 + $0x2d8] sm:$0xff]  ;;  %9758 = vst [vmem:[#allocation20_spill] sm:$0xff] %v8762_v61 }
 0x522   : > { %4229 = vmatprep.mubr.f32.mxu0 %v9552_v13  ;;  %4492 = vmatprep.mubr.f32.mxu1 %v9552_v13  ;;  %v4587_v36 = vmul.f32 %v8730_v20, %v3603_v40  ;;  %v4589_v54 = vmul.f32 %v8733_v51, %v3860_v34  ;;  %v3605_v63 = vpop.f32.mrb[123].mxu0  ;;  %v3862_v58 = vpop.f32.mrb[123].mxu1  ;;  %9752 = vst [vmem:[#allocation24_spill] sm:$0xff] %v8739_v32  ;;  %v8745_v51 = vld [vmem:[#allocation2 + $0x300] sm:$0xff] }
 0x523   : > { %v4588_v49 = vmul.f32 %v8736_v12, %v3605_v63  ;;  %v4590_v1 = vmul.f32 %v8739_v32, %v3862_v58  ;;  %9753 = vst [vmem:[#allocation9_spill] sm:$0xff] %v8745_v51  ;;  %v8748_v12 = vld [vmem:[#allocation2 + $0x310] sm:$0xff] }
 0x524   : > { %v4765_v10 = vadd.f32 %v4764_v18, %v4587_v36  ;;  %v4807_v3 = vadd.f32 %v4806_v42, %v4589_v54  ;;  %9754 = vst [vmem:[#allocation49_spill] sm:$0xff] %v8748_v12  ;;  %v8751_v36 = vld [vmem:[#allocation2 + $0x308] sm:$0xff] }
 0x525   : > { %4230 = vmatmul.mubr.f32.gmra.mrb[224].mxu0 %v8369_v45  ;;  %4493 = vmatmul.mubr.f32.gmra.mrb[224].mxu1 %v8367_v23  ;;  %v4786_v40 = vadd.f32 %v4785_v7, %v4588_v49  ;;  %v4828_v35 = vadd.f32 %v4827_v46, %v4590_v1  ;;  %v3609_v20 = vpop.f32.mrb[124].mxu0  ;;  %v3866_v34 = vpop.f32.mrb[124].mxu1  ;;  %9755 = vst [vmem:[#allocation10_spill] sm:$0xff] %v8751_v36  ;;  %v8754_v7 = vld [vmem:[#allocation2 + $0x318] sm:$0xff] }
 0x526   : > { %4235 = vmatprep.mubr.f32.mxu0 %v9552_v13  ;;  %v4595_v63 = vmul.f32 %v8745_v51, %v3609_v20  ;;  %v4597_v58 = vmul.f32 %v8748_v12, %v3866_v34  ;;  %v3611_v18 = vpop.f32.mrb[125].mxu0  ;;  %v3868_v42 = vpop.f32.mrb[125].mxu1  ;;  %9756 = vst [vmem:[#allocation51_spill] sm:$0xff] %v8754_v7  ;;  %v8759_v34 = vld [vmem:[#allocation2 + $0x340] sm:$0xff] }
 0x527   : > { %v4596_v45 = vmul.f32 %v8751_v36, %v3611_v18  ;;  %v4598_v46 = vmul.f32 %v8754_v7, %v3868_v42  ;;  %9757 = vst [vmem:[#allocation53_spill] sm:$0xff] %v8759_v34  ;;  %v8778_v7 = vld [vmem:[#allocation2 + $0x388] sm:$0xff] }
 0x528   : > { %v4766_v54 = vadd.f32 %v4765_v10, %v4595_v63  ;;  %v4808_v49 = vadd.f32 %v4807_v3, %v4597_v58  ;;  %v8765_v10 = vld [vmem:[#allocation2 + $0x348] sm:$0xff]  ;;  %v8768_v3 = vld [vmem:[#allocation2 + $0x358] sm:$0xff]  ;;  %9763 = vst [vmem:[#allocation30_spill] sm:$0xff] %v8778_v7 }
 0x529   : > { %4236 = vmatmul.mubr.f32.gmra.mrb[226].mxu0 %v8367_v23  ;;  %v4787_v1 = vadd.f32 %v4786_v40, %v4596_v45  ;;  %v4829_v20 = vadd.f32 %v4828_v35, %v4598_v46  ;;  %v3615_v51 = vpop.f32.mrb[126].mxu0  ;;  %v3872_v32 = vpop.f32.mrb[126].mxu1  ;;  %9759 = vst [vmem:[#allocation55_spill] sm:$0xff] %v8765_v10  ;;  %9760 = vst [vmem:[#allocation22_spill] sm:$0xff] %v8768_v3  ;;  %v8772_v46 = vld [vmem:[#allocation2 + $0x380] sm:$0xff] }
 0x52a   : > { %4306 = vmatprep.mubr.f32.mxu0 %v9552_v13  ;;  %v4603_v12 = vmul.f32 %v8759_v34, %v3615_v51  ;;  %v4605_v18 = vmul.f32 %v8762_v61, %v3872_v32  ;;  %v3617_v36 = vpop.f32.mrb[127].mxu0  ;;  %v3874_v42 = vpop.f32.mrb[127].mxu1  ;;  %9761 = vst [vmem:[#allocation23_spill] sm:$0xff] %v8772_v46  ;;  %v8775_v61 = vld [vmem:[#allocation2 + $0x390] sm:$0xff] }
 0x52b   : > { %v4604_v23 = vmul.f32 %v8765_v10, %v3617_v36  ;;  %v4606_v40 = vmul.f32 %v8768_v3, %v3874_v42  ;;  %9762 = vst [vmem:[#allocation25_spill] sm:$0xff] %v8775_v61 }
 0x52c   : > { %v4767_v35 = vadd.f32 %v4766_v54, %v4603_v12  ;;  %v4809_v13 = vadd.f32 %v4808_v49, %v4605_v18  ;;  %v8781_v54 = vld [vmem:[#allocation2 + $0x398] sm:$0xff] }
 0x52d   : > { %4307 = vmatmul.mubr.f32.vlgmr.msra.gmra.mrb[228].mxu0 %v8130_v2  ;;  %v4788_v63 = vadd.f32 %v4787_v1, %v4604_v23  ;;  %v4830_v51 = vadd.f32 %v4829_v20, %v4606_v40  ;;  %v3621_v58 = vpop.f32.mrb[128].mxu0  ;;  %v3878_v45 = vpop.f32.mrb[128].mxu1  ;;  %9764 = vst [vmem:[#allocation56_spill] sm:$0xff] %v8781_v54  ;;  %v8784_v40 = vld [vmem:[#allocation2 + $0x3c0] sm:$0xff] }
 0x52e   : > { %v4611_v32 = vmul.f32 %v8772_v46, %v3621_v58  ;;  %v4613_v36 = vmul.f32 %v8775_v61, %v3878_v45  ;;  %v3623_v10 = vpop.f32.mrb[129].mxu0  ;;  %v3880_v34 = vpop.f32.mrb[129].mxu1  ;;  %9765 = vst [vmem:[#allocation57_spill] sm:$0xff] %v8784_v40  ;;  %v8787_v45 = vld [vmem:[#allocation2 + $0x3d0] sm:$0xff] }
 0x52f   : > { %v4612_v12 = vmul.f32 %v8778_v7, %v3623_v10  ;;  %v4614_v2 = vmul.f32 %v8781_v54, %v3880_v34  ;;  %9766 = vst [vmem:[#allocation58_spill] sm:$0xff] %v8787_v45  ;;  %v8790_v7 = vld [vmem:[#allocation2 + $0x3c8] sm:$0xff] }
 0x530   : > { %v4768_v49 = vadd.f32 %v4767_v35, %v4611_v32  ;;  %v4810_v1 = vadd.f32 %v4809_v13, %v4613_v36  ;;  %9767 = vst [vmem:[#allocation59_spill] sm:$0xff] %v8790_v7  ;;  %v8793_v35 = vld [vmem:[#allocation2 + $0x3d8] sm:$0xff] }
 0x531   : > { %v4789_v20 = vadd.f32 %v4788_v63, %v4612_v12  ;;  %v4831_v18 = vadd.f32 %v4830_v51, %v4614_v2  ;;  %v3627_v42 = vpop.f32.mrb[130].mxu0  ;;  %v3884_v23 = vpop.f32.mrb[130].mxu1 }
 0x532   : > { %v4619_v58 = vmul.f32 %v8784_v40, %v3627_v42  ;;  %v4621_v61 = vmul.f32 %v8787_v45, %v3884_v23  ;;  %v3629_v46 = vpop.f32.mrb[131].mxu0  ;;  %v3886_v10 = vpop.f32.mrb[131].mxu1 }
 0x533   : > { %v4620_v34 = vmul.f32 %v8790_v7, %v3629_v46  ;;  %v4622_v13 = vmul.f32 %v8793_v35, %v3886_v10 }
 0x534   : > { %v4769_v63 = vadd.f32 %v4768_v49, %v4619_v58  ;;  %v4811_v51 = vadd.f32 %v4810_v1, %v4621_v61 }
 0x535   : > { %v4790_v32 = vadd.f32 %v4789_v20, %v4620_v34  ;;  %v4832_v36 = vadd.f32 %v4831_v18, %v4622_v13 }
 0x536   : > { %v4770_v12 = vrot.slane %v4769_v63, 4  ;;  %v4812_v2 = vrot.slane %v4811_v51, 4 }
 0x537   : > { %v4791_v42 = vrot.slane %v4790_v32, 4  ;;  %v4833_v40 = vrot.slane %v4832_v36, 4 }
 0x538   : > { %v4771_v54 = vadd.f32 %v4770_v12, %v4769_v63  ;;  %v4813_v23 = vadd.f32 %v4812_v2, %v4811_v51  ;;  %v9768_v63 = vld [vmem:[#allocation37_spill] sm:$0xff] }
 0x539   : > { %v4792_v45 = vadd.f32 %v4791_v42, %v4790_v32  ;;  %v4834_v3 = vadd.f32 %v4833_v40, %v4832_v36  ;;  %v8798_v51 = vmul.f32 %v9768_v63, %v9768_v63  ;;  %v9769_v40 = vld [vmem:[#allocation39_spill] sm:$0xff] }
 0x53a   : > { %v4772_v33 = vrot.slane %v4771_v54, 2  ;;  %v4814_v53 = vrot.slane %v4813_v23, 2  ;;  %v8802_v32 = vmul.f32 %v9769_v40, %v9769_v40 }
 0x53b   : > { %v4793_v28 = vrot.slane %v4792_v45, 2  ;;  %v4835_v46 = vrot.slane %v4834_v3, 2 }
 0x53c   : > { %v4773_v7 = vadd.f32 %v4772_v33, %v4771_v54  ;;  %v4815_v48 = vadd.f32 %v4814_v53, %v4813_v23  ;;  %v8806_v54 = vmul.f32 %v8375_v27, %v8375_v27 }
 0x53d   : > { %v4794_v56 = vadd.f32 %v4793_v28, %v4792_v45  ;;  %v4836_v10 = vadd.f32 %v4835_v46, %v4834_v3 }
 0x53e   : > { %v4774_v49 = vrot.slane %v4773_v7, 1  ;;  %v4816_v61 = vrot.slane %v4815_v48, 1 }
 0x53f   : > { %v4795_v1 = vrot.slane %v4794_v56, 1  ;;  %v4837_v20 = vrot.slane %v4836_v10, 1 }
 0x540   : > { %v4775_v18 = vadd.f32 %v4774_v49, %v4773_v7  ;;  %v4817_v58 = vadd.f32 %v4816_v61, %v4815_v48  ;;  %v3633_v34 = vpop.f32.mrb[132].mxu0  ;;  %v3890_v13 = vpop.f32.mrb[132].mxu1  ;;  %v8810_v48 = vmul.f32 %v8377_v11, %v8377_v11 }
 0x541   : > { %v4796_v33 = vadd.f32 %v4795_v1, %v4794_v56  ;;  %v4838_v53 = vadd.f32 %v4837_v20, %v4836_v10  ;;  %v3635_v28 = vpop.f32.mrb[133].mxu0  ;;  %v3892_v3 = vpop.f32.mrb[133].mxu1  ;;  %v4627_v2 = vmul.f32 %v8556_v30, %v3633_v34  ;;  %v4629_v42 = vmul.f32 %v8561_v29, %v3890_v13 }
 0x542   : > { %v5091_v7 = vmul.f32 0.015625, %v4775_v18  ;;  %v5093_v45 = vmul.f32 0.015625, %v4817_v58  ;;  %v4628_v46 = vmul.f32 %v8570_v50, %v3635_v28  ;;  %v4630_v27 = vmul.f32 %v8573_v14, %v3892_v3 }
 0x543   : > { %v5092_v36 = vmul.f32 0.015625, %v4796_v33  ;;  %v5094_v12 = vmul.f32 0.015625, %v4838_v53 }
 0x544   : > { %v5147_v56 = vsub.f32 %v5091_v7, %v8798_v51  ;;  %v5149_v23 = vsub.f32 %v5093_v45, %v8806_v54  ;;  %v3639_v10 = vpop.f32.mrb[134].mxu0  ;;  %v3896_v49 = vpop.f32.mrb[134].mxu1 }
 0x545   : > { %v5148_v11 = vsub.f32 %v5092_v36, %v8802_v32  ;;  %v5150_v61 = vsub.f32 %v5094_v12, %v8810_v48  ;;  %v4635_v1 = vmul.f32 %v8564_v62, %v3639_v10  ;;  %v4637_v30 = vmul.f32 %v8567_v24, %v3896_v49  ;;  %v3641_v20 = vpop.f32.mrb[135].mxu0  ;;  %v3898_v29 = vpop.f32.mrb[135].mxu1 }
 0x546   : > { %v5163_v18 = vmax.f32 %v5147_v56, 0.0  ;;  %v5165_v58 = vmax.f32 %v5149_v23, 0.0  ;;  %v4636_v34 = vmul.f32 %v8576_v22, %v3641_v20  ;;  %v4638_v50 = vmul.f32 %v8579_v17, %v3898_v29 }
 0x547   : > { %v5164_v13 = vmax.f32 %v5148_v11, 0.0  ;;  %v5166_v14 = vmax.f32 %v5150_v61, 0.0  ;;  %v4923_v63 = vadd.f32 %v4635_v1, %v4627_v2  ;;  %v4965_v40 = vadd.f32 %v4637_v30, %v4629_v42 }
 0x548   : > { %v5227_v33 = vadd.f32 1e-05, %v5163_v18  ;;  %v5229_v53 = vadd.f32 1e-05, %v5165_v58  ;;  %v4944_v28 = vadd.f32 %v4636_v34, %v4628_v46  ;;  %v4986_v3 = vadd.f32 %v4638_v50, %v4630_v27  ;;  %v3645_v7 = vpop.f32.mrb[136].mxu0  ;;  %v3902_v62 = vpop.f32.mrb[136].mxu1 }
 0x549   : > { %v5228_v45 = vadd.f32 1e-05, %v5164_v13  ;;  %v5230_v24 = vadd.f32 1e-05, %v5166_v14  ;;  %v4643_v36 = vmul.f32 %v8586_v9, %v3645_v7  ;;  %v4645_v12 = vmul.f32 %v8589_v44, %v3902_v62  ;;  %v3647_v56 = vpop.f32.mrb[137].mxu0  ;;  %v3904_v22 = vpop.f32.mrb[137].mxu1 }
 0x54a   : > { %6607 = vrsqrt.f32 %v5227_v33  ;;  %v4644_v17 = vmul.f32 %v8592_v52, %v3647_v56  ;;  %v4646_v2 = vmul.f32 %v8595_v47, %v3904_v22  ;;  %v6867_v34 = vmov 1966171168  }
 0x54b   : > { %6609 = vrsqrt.f32 %v5229_v53  ;;  %v4924_v42 = vadd.f32 %v4923_v63, %v4643_v36  ;;  %v4966_v23 = vadd.f32 %v4965_v40, %v4645_v12  ;;  %v5312_v50 = vunpack.c.l.s4 %v6867_v34  ;;  %v9770_v36 = vld [vmem:[#allocation41_spill] sm:$0xff] }
 0x54c   : > { %6611 = vrsqrt.f32 %v5228_v45  ;;  %v4945_v46 = vadd.f32 %v4944_v28, %v4644_v17  ;;  %v4987_v27 = vadd.f32 %v4986_v3, %v4646_v2  ;;  %v3651_v10 = vpop.f32.mrb[138].mxu0  ;;  %v3908_v49 = vpop.f32.mrb[138].mxu1  ;;  %v5314_v63 = vlaneseq }
 0x54d   : > { %6613 = vrsqrt.f32 %v5230_v24  ;;  %v4651_v9 = vmul.f32 %v8602_v0, %v3651_v10  ;;  %v4653_v44 = vmul.f32 %v8605_v37, %v3908_v49  ;;  %v3653_v11 = vpop.f32.mrb[139].mxu0  ;;  %v3910_v61 = vpop.f32.mrb[139].mxu1  ;;  %v5313_v45 = vunpack.c.0.s8 %v5312_v50 }
 0x54e   : > { %v4652_v1 = vmul.f32 %v8608_v55, %v3653_v11  ;;  %v4654_v52 = vmul.f32 %v8611_v5, %v3910_v61 }
 0x54f   : > { %v4925_v47 = vadd.f32 %v4924_v42, %v4651_v9  ;;  %v4967_v30 = vadd.f32 %v4966_v23, %v4653_v44 }
 0x550   : > { %v4946_v20 = vadd.f32 %v4945_v46, %v4652_v1  ;;  %v4988_v29 = vadd.f32 %v4987_v27, %v4654_v52  ;;  %v3657_v18 = vpop.f32.mrb[140].mxu0  ;;  %v3914_v58 = vpop.f32.mrb[140].mxu1  ;;  %v9771_v27 = vld [vmem:[#allocation43_spill] sm:$0xff] }
 0x551   : > { %v4659_v13 = vmul.f32 %v8618_v41, %v3657_v18  ;;  %v4661_v0 = vmul.f32 %v8621_v26, %v3914_v58  ;;  %v3659_v14 = vpop.f32.mrb[141].mxu0  ;;  %v3916_v37 = vpop.f32.mrb[141].mxu1 }
 0x552   : > { %v4660_v40 = vmul.f32 %v8624_v15, %v3659_v14  ;;  %v4662_v55 = vmul.f32 %v8627_v16, %v3916_v37  ;;  %v5315_v15 = vshrl.u32 %v5314_v63, 7 }
 0x553   : > { %v4926_v5 = vadd.f32 %v4925_v47, %v4659_v13  ;;  %v4968_v33 = vadd.f32 %v4967_v30, %v4661_v0 }
 0x554   : > { %v6608_v53 = vpop.eup %6607  ;;  %v4947_v28 = vadd.f32 %v4946_v20, %v4660_v40  ;;  %v4989_v3 = vadd.f32 %v4988_v29, %v4662_v55  ;;  %v3663_v7 = vpop.f32.mrb[142].mxu0  ;;  %v8846_v30 = vsub.s32 %v5313_v45, %v5315_v15 }
 0x555   : > { %v3920_v62 = vpop.f32.mrb[142].mxu1  ;;  %v6610_v24 = vpop.eup %6609  ;;  %v5259_v41 = vmul.f32 %v6608_v53, %v9770_v36  ;;  %v4667_v26 = vmul.f32 %v8634_v31, %v3663_v7  ;;  %v9776_v36 = vld [vmem:[#allocation44_spill] sm:$0xff] }
 0x556   : > { %v4669_v12 = vmul.f32 %v8637_v21, %v3920_v62  ;;  %v3665_v56 = vpop.f32.mrb[143].mxu0  ;;  %v3922_v22 = vpop.f32.mrb[143].mxu1  ;;  %v5261_v16 = vmul.f32 %v6610_v24, %v8386_v43  ;;  %9772 = vst [vmem:[#allocation37_spill] sm:$0xff] %v8846_v30 }
 0x557   : > { %v6612_v17 = vpop.eup %6611  ;;  %v4668_v2 = vmul.f32 %v8640_v4, %v3665_v56  ;;  %v4670_v42 = vmul.f32 %v8643_v25, %v3922_v22  ;;  %v5275_v46 = vmax.f32 %v5259_v41, 0.0  ;;  %v4927_v49 = vadd.f32 %v4926_v5, %v4667_v26  ;;  %v9773_v5 = vld [vmem:[#allocation40_spill] sm:$0xff]  ;;  %v9777_v56 = vld [vmem:[#allocation46_spill] sm:$0xff]  ;;  %v9778_v22 = vld [vmem:[#allocation45_spill] sm:$0xff] }
 0x558   : > { %v6614_v23 = vpop.eup %6613  ;;  %v5260_v10 = vmul.f32 %v6612_v17, %v9771_v27  ;;  %v4969_v9 = vadd.f32 %v4968_v33, %v4669_v12  ;;  %v5277_v44 = vmax.f32 %v5261_v16, 0.0  ;;  %v3669_v61 = vpop.f32.mrb[144].mxu0  ;;  %v9779_v27 = vld [vmem:[#allocation48_spill] sm:$0xff] }
 0x559   : > { %v5262_v31 = vmul.f32 %v6614_v23, %v8395_v8  ;;  %v4948_v21 = vadd.f32 %v4947_v28, %v4668_v2  ;;  %v4990_v11 = vadd.f32 %v4989_v3, %v4670_v42  ;;  %v3926_v1 = vpop.f32.mrb[144].mxu1  ;;  %v4675_v43 = vmul.f32 %v8650_v6, %v3669_v61  ;;  %v3671_v47 = vpop.f32.mrb[145].mxu0  ;;  %v9782_v61 = vld [vmem:[#allocation52_spill] sm:$0xff] }
 0x55a   : > { %v5276_v52 = vmax.f32 %v5260_v10, 0.0  ;;  %v4677_v4 = vmul.f32 %v8653_v59, %v3926_v1  ;;  %v3928_v25 = vpop.f32.mrb[145].mxu1  ;;  %v4676_v29 = vmul.f32 %v8656_v39, %v3671_v47 }
 0x55b   : > { %v5278_v20 = vmax.f32 %v5262_v31, 0.0  ;;  %v4678_v18 = vmul.f32 %v8659_v38, %v3928_v25  ;;  %v4928_v8 = vadd.f32 %v4927_v49, %v4675_v43  ;;  %v9780_v49 = vld [vmem:[#allocation47_spill] sm:$0xff] }
 0x55c   : > { %v5307_v58 = vcombine.low %v5275_v46, %v5276_v52  ;;  %v4970_v34 = vadd.f32 %v4969_v9, %v4677_v4  ;;  %v4949_v13 = vadd.f32 %v4948_v21, %v4676_v29  ;;  %v3675_v14 = vpop.f32.mrb[146].mxu0  ;;  %v3932_v37 = vpop.f32.mrb[146].mxu1  ;;  %v9781_v21 = vld [vmem:[#allocation50_spill] sm:$0xff] }
 0x55d   : > { %v5308_v50 = vcombine.low %v5277_v44, %v5278_v20  ;;  %v4991_v0 = vadd.f32 %v4990_v11, %v4678_v18  ;;  %v4683_v6 = vmul.f32 %v8666_v57, %v3675_v14  ;;  %v4685_v59 = vmul.f32 %v8669_v19, %v3932_v37  ;;  %v3677_v63 = vpop.f32.mrb[147].mxu0  ;;  %v3934_v40 = vpop.f32.mrb[147].mxu1  ;;  %v9775_v57 = vld [vmem:[#allocation42_spill] sm:$0xff] }
 0x55e   : > { %v5317_v55 = vrot.slane %v5307_v58, %v8846_v30  ;;  %v4684_v39 = vmul.f32 %v8672_v60, %v3677_v63  ;;  %v4686_v38 = vmul.f32 %v9773_v5, %v3934_v40  ;;  %v9783_v29 = vld [vmem:[#allocation54_spill] sm:$0xff]  ;;  %v9787_v5 = vld [vmem:[#allocation28_spill] sm:$0xff] }
 0x55f   : > { %v5324_v33 = vrot.slane %v5308_v50, %v8846_v30  ;;  %v4929_v53 = vadd.f32 %v4928_v8, %v4683_v6  ;;  %v4971_v28 = vadd.f32 %v4970_v34, %v4685_v59  ;;  %v9784_v58 = vld [vmem:[#allocation14_spill] sm:$0xff] }
 0x560   : > { %v4950_v3 = vadd.f32 %v4949_v13, %v4684_v39  ;;  %v4992_v7 = vadd.f32 %v4991_v0, %v4686_v38  ;;  %v3681_v62 = vpop.f32.mrb[148].mxu0  ;;  %v3938_v45 = vpop.f32.mrb[148].mxu1  ;;  %v9785_v13 = vld [vmem:[#allocation29_spill] sm:$0xff]  ;;  %v9786_v14 = vld [vmem:[#allocation18_spill] sm:$0xff] }
 0x561   : > { %v8856_v24 = vcombine.low %v5317_v55, %v5324_v33  ;;  %v4691_v19 = vmul.f32 %v9775_v57, %v3681_v62  ;;  %v4693_v41 = vmul.f32 %v9776_v36, %v3938_v45  ;;  %v3683_v26 = vpop.f32.mrb[149].mxu0  ;;  %v3940_v12 = vpop.f32.mrb[149].mxu1  ;;  %v9788_v33 = vld [vmem:[#allocation16_spill] sm:$0xff] }
 0x562   : > { %v4692_v60 = vmul.f32 %v9777_v56, %v3683_v26  ;;  %v4694_v15 = vmul.f32 %v9778_v22, %v3940_v12  ;;  %v9790_v45 = vld [vmem:[#allocation24_spill] sm:$0xff] }
 0x563   : > { %9774 = vst [vmem:[#allocation39_spill] sm:$0xff] %v8856_v24  ;;  %v4930_v17 = vadd.f32 %v4929_v53, %v4691_v19  ;;  %v4972_v16 = vadd.f32 %v4971_v28, %v4693_v41 }
 0x564   : > { %v4951_v2 = vadd.f32 %v4950_v3, %v4692_v60  ;;  %v4993_v42 = vadd.f32 %v4992_v7, %v4694_v15  ;;  %v3687_v23 = vpop.f32.mrb[150].mxu0  ;;  %v3944_v46 = vpop.f32.mrb[150].mxu1  ;;  %v9789_v7 = vld [vmem:[#allocation27_spill] sm:$0xff]  ;;  %v9791_v60 = vld [vmem:[#allocation9_spill] sm:$0xff] }
 0x565   : > { %v4699_v10 = vmul.f32 %v9779_v27, %v3687_v23  ;;  %v4701_v9 = vmul.f32 %v9780_v49, %v3944_v46  ;;  %v3689_v44 = vpop.f32.mrb[151].mxu0  ;;  %v3946_v31 = vpop.f32.mrb[151].mxu1  ;;  %v9792_v15 = vld [vmem:[#allocation49_spill] sm:$0xff]  ;;  %v9794_v46 = vld [vmem:[#allocation51_spill] sm:$0xff] }
 0x566   : > { %v4700_v11 = vmul.f32 %v9781_v21, %v3689_v44  ;;  %v4702_v1 = vmul.f32 %v9782_v61, %v3946_v31 }
 0x567   : > { %v4931_v52 = vadd.f32 %v4930_v17, %v4699_v10  ;;  %v4973_v43 = vadd.f32 %v4972_v16, %v4701_v9 }
 0x568   : > { %v4952_v4 = vadd.f32 %v4951_v2, %v4700_v11  ;;  %v4994_v47 = vadd.f32 %v4993_v42, %v4702_v1  ;;  %v3693_v25 = vpop.f32.mrb[152].mxu0  ;;  %v3950_v20 = vpop.f32.mrb[152].mxu1  ;;  %v9793_v42 = vld [vmem:[#allocation10_spill] sm:$0xff]  ;;  %v9795_v11 = vld [vmem:[#allocation53_spill] sm:$0xff]  ;;  %v9796_v1 = vld [vmem:[#allocation20_spill] sm:$0xff] }
 0x569   : > { %v4707_v18 = vmul.f32 %v9783_v29, %v3693_v25  ;;  %v4709_v8 = vmul.f32 %v9784_v58, %v3950_v20  ;;  %v3695_v34 = vpop.f32.mrb[153].mxu0  ;;  %v3952_v50 = vpop.f32.mrb[153].mxu1  ;;  %v9798_v20 = vld [vmem:[#allocation22_spill] sm:$0xff] }
 0x56a   : > { %v4708_v0 = vmul.f32 %v9785_v13, %v3695_v34  ;;  %v4710_v37 = vmul.f32 %v9786_v14, %v3952_v50 }
 0x56b   : > { %v4932_v6 = vadd.f32 %v4931_v52, %v4707_v18  ;;  %v4974_v59 = vadd.f32 %v4973_v43, %v4709_v8 }
 0x56c   : > { %v4953_v63 = vadd.f32 %v4952_v4, %v4708_v0  ;;  %v4995_v40 = vadd.f32 %v4994_v47, %v4710_v37  ;;  %v3699_v55 = vpop.f32.mrb[154].mxu0  ;;  %v3956_v39 = vpop.f32.mrb[154].mxu1  ;;  %v9797_v47 = vld [vmem:[#allocation55_spill] sm:$0xff]  ;;  %v9800_v37 = vld [vmem:[#allocation25_spill] sm:$0xff] }
 0x56d   : > { %v4715_v38 = vmul.f32 %v9787_v5, %v3699_v55  ;;  %v4717_v53 = vmul.f32 %v9788_v33, %v3956_v39  ;;  %v3701_v28 = vpop.f32.mrb[155].mxu0  ;;  %v3958_v3 = vpop.f32.mrb[155].mxu1  ;;  %v9799_v0 = vld [vmem:[#allocation23_spill] sm:$0xff]  ;;  %v9802_v39 = vld [vmem:[#allocation56_spill] sm:$0xff] }
 0x56e   : > { %v4716_v62 = vmul.f32 %v9789_v7, %v3701_v28  ;;  %v4718_v57 = vmul.f32 %v9790_v45, %v3958_v3 }
 0x56f   : > { %v4933_v19 = vadd.f32 %v4932_v6, %v4715_v38  ;;  %v4975_v36 = vadd.f32 %v4974_v59, %v4717_v53 }
 0x570   : > { %v4954_v41 = vadd.f32 %v4953_v63, %v4716_v62  ;;  %v4996_v26 = vadd.f32 %v4995_v40, %v4718_v57  ;;  %v3705_v12 = vpop.f32.mrb[156].mxu0  ;;  %v3962_v56 = vpop.f32.mrb[156].mxu1  ;;  %v9801_v40 = vld [vmem:[#allocation30_spill] sm:$0xff]  ;;  %v9803_v62 = vld [vmem:[#allocation57_spill] sm:$0xff] }
 0x571   : > { %v4723_v22 = vmul.f32 %v9791_v60, %v3705_v12  ;;  %v4725_v17 = vmul.f32 %v9792_v15, %v3962_v56  ;;  %v3707_v16 = vpop.f32.mrb[157].mxu0  ;;  %v3964_v2 = vpop.f32.mrb[157].mxu1  ;;  %v9804_v57 = vld [vmem:[#allocation58_spill] sm:$0xff] }
 0x572   : > { %v4724_v23 = vmul.f32 %v9793_v42, %v3707_v16  ;;  %v4726_v27 = vmul.f32 %v9794_v46, %v3964_v2 }
 0x573   : > { %v4934_v10 = vadd.f32 %v4933_v19, %v4723_v22  ;;  %v4976_v49 = vadd.f32 %v4975_v36, %v4725_v17 }
 0x574   : > { %v4955_v9 = vadd.f32 %v4954_v41, %v4724_v23  ;;  %v4997_v44 = vadd.f32 %v4996_v26, %v4726_v27  ;;  %v3711_v31 = vpop.f32.mrb[158].mxu0  ;;  %v3968_v21 = vpop.f32.mrb[158].mxu1  ;;  %v9805_v26 = vld [vmem:[#allocation59_spill] sm:$0xff] }
 0x575   : > { %v4731_v61 = vmul.f32 %v9795_v11, %v3711_v31  ;;  %v4733_v52 = vmul.f32 %v9796_v1, %v3968_v21  ;;  %v3713_v43 = vpop.f32.mrb[159].mxu0  ;;  %v3970_v4 = vpop.f32.mrb[159].mxu1 }
 0x576   : > { %v4732_v25 = vmul.f32 %v9797_v47, %v3713_v43  ;;  %v4734_v29 = vmul.f32 %v9798_v20, %v3970_v4  ;;  %v8899_v4 = vld [vmem:[#allocation2 + $0x60] sm:$0xff] }
 0x577   : > { %v4935_v18 = vadd.f32 %v4934_v10, %v4731_v61  ;;  %v4977_v58 = vadd.f32 %v4976_v49, %v4733_v52  ;;  %v8896_v52 = vld [vmem:[#allocation2 + $0x20] sm:$0xff] }
 0x578   : > { %v4956_v8 = vadd.f32 %v4955_v9, %v4732_v25  ;;  %v4998_v34 = vadd.f32 %v4997_v44, %v4734_v29  ;;  %v3717_v50 = vpop.f32.mrb[160].mxu0  ;;  %v3974_v13 = vpop.f32.mrb[160].mxu1 }
 0x579   : > { %v4739_v14 = vmul.f32 %v9799_v0, %v3717_v50  ;;  %v4741_v6 = vmul.f32 %v9800_v37, %v3974_v13  ;;  %v3719_v59 = vpop.f32.mrb[161].mxu0  ;;  %v3976_v63 = vpop.f32.mrb[161].mxu1 }
 0x57a   : > { %v4740_v55 = vmul.f32 %v9801_v40, %v3719_v59  ;;  %v4742_v5 = vmul.f32 %v9802_v39, %v3976_v63 }
 0x57b   : > { %v4936_v38 = vadd.f32 %v4935_v18, %v4739_v14  ;;  %v4978_v33 = vadd.f32 %v4977_v58, %v4741_v6  ;;  %v8904_v58 = vld [vmem:[#allocation2 + $0x28] sm:$0xff] }
 0x57c   : > { %v4957_v53 = vadd.f32 %v4956_v8, %v4740_v55  ;;  %v4999_v28 = vadd.f32 %v4998_v34, %v4742_v5  ;;  %v3723_v3 = vpop.f32.mrb[162].mxu0  ;;  %v3980_v7 = vpop.f32.mrb[162].mxu1  ;;  %v8907_v34 = vld [vmem:[#allocation2 + $0x68] sm:$0xff]  ;;  %v8912_v5 = vld [vmem:[#allocation2 + $0xa0] sm:$0xff] }
 0x57d   : > { %v4747_v45 = vmul.f32 %v9803_v62, %v3723_v3  ;;  %v4749_v19 = vmul.f32 %v9804_v57, %v3980_v7  ;;  %v3725_v36 = vpop.f32.mrb[163].mxu0  ;;  %v3982_v41 = vpop.f32.mrb[163].mxu1  ;;  %v8917_v7 = vld [vmem:[#allocation2 + $0xa8] sm:$0xff] }
 0x57e   : > { %v4748_v12 = vmul.f32 %v9805_v26, %v3725_v36  ;;  %v4750_v56 = vmul.f32 %v8793_v35, %v3982_v41  ;;  %v5124_v41 = vrot.slane %v8802_v32, 1 }
 0x57f   : > { %v4937_v60 = vadd.f32 %v4936_v38, %v4747_v45  ;;  %v4979_v22 = vadd.f32 %v4978_v33, %v4749_v19  ;;  %v5123_v45 = vrot.slane %v8798_v51, 1 }
 0x580   : > { %v4958_v15 = vadd.f32 %v4957_v53, %v4748_v12  ;;  %v5000_v17 = vadd.f32 %v4999_v28, %v4750_v56  ;;  %v4051_v16 = vpop.f32.mrb[164].mxu0  ;;  %v8890_v2 = vpop.f32.mrb[164].mxu1 }
 0x581   : > { %v4938_v42 = vrot.slane %v4937_v60, 4  ;;  %v4980_v23 = vrot.slane %v4979_v22, 4  ;;  %v4053_v46 = vpop.f32.mrb[165].mxu0  ;;  %v8892_v27 = vpop.f32.mrb[165].mxu1  ;;  %v4503_v43 = vmul.f32 %v8896_v52, %v4051_v16 }
 0x582   : > { %v4959_v10 = vrot.slane %v4958_v15, 4  ;;  %v5001_v49 = vrot.slane %v5000_v17, 4  ;;  %v4504_v8 = vmul.f32 %v8904_v58, %v4053_v46 }
 0x583   : > { %v4939_v9 = vadd.f32 %v4938_v42, %v4937_v60  ;;  %v4981_v44 = vadd.f32 %v4980_v23, %v4979_v22  ;;  %v8925_v42 = vld [vmem:[#allocation2 + $0xe0] sm:$0xff] }
 0x584   : > { %v4960_v31 = vadd.f32 %v4959_v10, %v4958_v15  ;;  %v5002_v21 = vadd.f32 %v5001_v49, %v5000_v17  ;;  %v4057_v11 = vpop.f32.mrb[166].mxu0  ;;  %v8894_v35 = vpop.f32.mrb[166].mxu1  ;;  %v5125_v15 = vrot.slane %v8806_v54, 1  ;;  %v5126_v10 = vrot.slane %v8810_v48, 1 }
 0x585   : > { %v4940_v61 = vrot.slane %v4939_v9, 2  ;;  %v4982_v1 = vrot.slane %v4981_v44, 2  ;;  %v4511_v47 = vmul.f32 %v8899_v4, %v4057_v11  ;;  %v4059_v25 = vpop.f32.mrb[167].mxu0  ;;  %v8902_v20 = vpop.f32.mrb[167].mxu1 }
 0x586   : > { %9806 = vst [vmem:[#allocation41_spill] sm:$0xff] %v8902_v20  ;;  %v4961_v29 = vrot.slane %v4960_v31, 2  ;;  %v5003_v18 = vrot.slane %v5002_v21, 2  ;;  %v4512_v50 = vmul.f32 %v8907_v34, %v4059_v25 }
 0x587   : > { %v4941_v13 = vadd.f32 %v4940_v61, %v4939_v9  ;;  %v4983_v0 = vadd.f32 %v4982_v1, %v4981_v44  ;;  %v4839_v14 = vadd.f32 %v4511_v47, %v4503_v43  ;;  %v8931_v9 = vld [vmem:[#allocation2 + $0xe8] sm:$0xff] }
 0x588   : > { %v4962_v37 = vadd.f32 %v4961_v29, %v4960_v31  ;;  %v5004_v6 = vadd.f32 %v5003_v18, %v5002_v21  ;;  %v4860_v59 = vadd.f32 %v4512_v50, %v4504_v8  ;;  %v4063_v63 = vpop.f32.mrb[168].mxu0  ;;  %v8910_v40 = vpop.f32.mrb[168].mxu1  ;;  %v8936_v18 = vld [vmem:[#allocation2 + $0x120] sm:$0xff] }
 0x589   : > { %9807 = vst [vmem:[#allocation43_spill] sm:$0xff] %v8910_v40  ;;  %v4942_v55 = vrot.slane %v4941_v13, 1  ;;  %v4984_v39 = vrot.slane %v4983_v0, 1  ;;  %v4519_v38 = vmul.f32 %v8912_v5, %v4063_v63  ;;  %v4065_v33 = vpop.f32.mrb[169].mxu0  ;;  %v8915_v53 = vpop.f32.mrb[169].mxu1 }
 0x58a   : > { %9808 = vst [vmem:[#allocation40_spill] sm:$0xff] %v8915_v53  ;;  %v4963_v28 = vrot.slane %v4962_v37, 1  ;;  %v5005_v3 = vrot.slane %v5004_v6, 1  ;;  %v4520_v62 = vmul.f32 %v8917_v7, %v4065_v33 }
 0x58b   : > { %v4943_v57 = vadd.f32 %v4942_v55, %v4941_v13  ;;  %v4985_v19 = vadd.f32 %v4984_v39, %v4983_v0  ;;  %v4840_v36 = vadd.f32 %v4839_v14, %v4519_v38  ;;  %v8941_v14 = vld [vmem:[#allocation2 + $0x128] sm:$0xff] }
 0x58c   : > { %v4964_v26 = vadd.f32 %v4963_v28, %v4962_v37  ;;  %v5006_v12 = vadd.f32 %v5005_v3, %v5004_v6  ;;  %v4861_v56 = vadd.f32 %v4860_v59, %v4520_v62  ;;  %v4069_v60 = vpop.f32.mrb[170].mxu0  ;;  %v8922_v22 = vpop.f32.mrb[170].mxu1  ;;  %v8946_v3 = vld [vmem:[#allocation2 + $0x160] sm:$0xff] }
 0x58d   : > { %9809 = vst [vmem:[#allocation42_spill] sm:$0xff] %v8922_v22  ;;  %v5099_v17 = vmul.f32 0.015625, %v4943_v57  ;;  %v5101_v16 = vmul.f32 0.015625, %v4985_v19  ;;  %v4527_v23 = vmul.f32 %v8925_v42, %v4069_v60  ;;  %v4071_v51 = vpop.f32.mrb[171].mxu0  ;;  %v8928_v46 = vpop.f32.mrb[171].mxu1  ;;  %v8951_v19 = vld [vmem:[#allocation2 + $0x168] sm:$0xff] }
 0x58e   : > { %9810 = vst [vmem:[#allocation44_spill] sm:$0xff] %v8928_v46  ;;  %v5100_v32 = vmul.f32 0.015625, %v4964_v26  ;;  %v5102_v49 = vmul.f32 0.015625, %v5006_v12  ;;  %v4528_v44 = vmul.f32 %v8931_v9, %v4071_v51  ;;  %v8956_v60 = vld [vmem:[#allocation2 + $0x1a0] sm:$0xff]  ;;  %v9072_v22 = vld [vmem:[#allocation2 + $0xb0] sm:$0xff] }
 0x58f   : > { %v5155_v31 = vsub.f32 %v5099_v17, %v5123_v45  ;;  %v5157_v21 = vsub.f32 %v5101_v16, %v5125_v15  ;;  %v4841_v54 = vadd.f32 %v4840_v36, %v4527_v23  ;;  %v8961_v23 = vld [vmem:[#allocation2 + $0x1a8] sm:$0xff]  ;;  %9838 = vst [vmem:[#allocation25_spill] sm:$0xff] %v9072_v22 }
 0x590   : > { %v5156_v11 = vsub.f32 %v5100_v32, %v5124_v41  ;;  %v5158_v61 = vsub.f32 %v5102_v49, %v5126_v10  ;;  %v4862_v1 = vadd.f32 %v4861_v56, %v4528_v44  ;;  %v4075_v43 = vpop.f32.mrb[172].mxu0  ;;  %v8934_v47 = vpop.f32.mrb[172].mxu1 }
 0x591   : > { %9811 = vst [vmem:[#allocation46_spill] sm:$0xff] %v8934_v47  ;;  %v5171_v25 = vmax.f32 %v5155_v31, 0.0  ;;  %v5173_v29 = vmax.f32 %v5157_v21, 0.0  ;;  %v4535_v48 = vmul.f32 %v8936_v18, %v4075_v43  ;;  %v4077_v8 = vpop.f32.mrb[173].mxu0  ;;  %v8939_v50 = vpop.f32.mrb[173].mxu1  ;;  %v8966_v31 = vld [vmem:[#allocation2 + $0x1e0] sm:$0xff] }
 0x592   : > { %9812 = vst [vmem:[#allocation45_spill] sm:$0xff] %v8939_v50  ;;  %v5172_v13 = vmax.f32 %v5156_v11, 0.0  ;;  %v5174_v0 = vmax.f32 %v5158_v61, 0.0  ;;  %v4536_v37 = vmul.f32 %v8941_v14, %v4077_v8  ;;  %v8971_v61 = vld [vmem:[#allocation2 + $0x1e8] sm:$0xff] }
 0x593   : > { %v5235_v6 = vadd.f32 1e-05, %v5171_v25  ;;  %v5237_v59 = vadd.f32 1e-05, %v5173_v29  ;;  %v4842_v63 = vadd.f32 %v4841_v54, %v4535_v48  ;;  %v9819_v48 = vld [vmem:[#allocation8_spill] sm:$0xff] }
 0x594   : > { %v5236_v55 = vadd.f32 1e-05, %v5172_v13  ;;  %v5238_v39 = vadd.f32 1e-05, %v5174_v0  ;;  %v4863_v38 = vadd.f32 %v4862_v1, %v4536_v37  ;;  %v4081_v33 = vpop.f32.mrb[174].mxu0  ;;  %v8944_v28 = vpop.f32.mrb[174].mxu1 }
 0x595   : > { %9813 = vst [vmem:[#allocation48_spill] sm:$0xff] %v8944_v28  ;;  %6615 = vrsqrt.f32 %v5235_v6  ;;  %v4543_v62 = vmul.f32 %v8946_v3, %v4081_v33  ;;  %v4083_v45 = vpop.f32.mrb[175].mxu0  ;;  %v8949_v57 = vpop.f32.mrb[175].mxu1 }
 0x596   : > { %9814 = vst [vmem:[#allocation47_spill] sm:$0xff] %v8949_v57  ;;  %6617 = vrsqrt.f32 %v5237_v59  ;;  %v4544_v36 = vmul.f32 %v8951_v19, %v4083_v45  ;;  %v9821_v59 = vld [vmem:[#allocation26_spill] sm:$0xff] }
 0x597   : > { %6619 = vrsqrt.f32 %v5236_v55  ;;  %v4843_v41 = vadd.f32 %v4842_v63, %v4543_v62  ;;  %v8978_v55 = vld [vmem:[#allocation2 + $0x220] sm:$0xff] }
 0x598   : > { %6621 = vrsqrt.f32 %v5238_v39  ;;  %v4864_v26 = vadd.f32 %v4863_v38, %v4544_v36  ;;  %v4087_v12 = vpop.f32.mrb[176].mxu0  ;;  %v8954_v56 = vpop.f32.mrb[176].mxu1  ;;  %v9823_v36 = vld [vmem:[#allocation11_spill] sm:$0xff] }
 0x599   : > { %9815 = vst [vmem:[#allocation50_spill] sm:$0xff] %v8954_v56  ;;  %v4551_v15 = vmul.f32 %v8956_v60, %v4087_v12  ;;  %v4089_v17 = vpop.f32.mrb[177].mxu0  ;;  %v8959_v16 = vpop.f32.mrb[177].mxu1  ;;  %v9064_v56 = vld [vmem:[#allocation2 + $0x38] sm:$0xff] }
 0x59a   : > { %9816 = vst [vmem:[#allocation52_spill] sm:$0xff] %v8959_v16  ;;  %v4552_v51 = vmul.f32 %v8961_v23, %v4089_v17  ;;  %v9824_v17 = vld [vmem:[#allocation32_spill] sm:$0xff] }
 0x59b   : > { %v4844_v10 = vadd.f32 %v4843_v41, %v4551_v15 }
 0x59c   : > { %v4865_v32 = vadd.f32 %v4864_v26, %v4552_v51  ;;  %v4093_v49 = vpop.f32.mrb[178].mxu0  ;;  %v8964_v44 = vpop.f32.mrb[178].mxu1  ;;  %v8984_v26 = vld [vmem:[#allocation2 + $0x228] sm:$0xff] }
 0x59d   : > { %9817 = vst [vmem:[#allocation54_spill] sm:$0xff] %v8964_v44  ;;  %v4559_v21 = vmul.f32 %v8966_v31, %v4093_v49  ;;  %v4095_v54 = vpop.f32.mrb[179].mxu0  ;;  %v8969_v11 = vpop.f32.mrb[179].mxu1 }
 0x59e   : > { %9818 = vst [vmem:[#allocation14_spill] sm:$0xff] %v8969_v11  ;;  %v4560_v1 = vmul.f32 %v8971_v61, %v4095_v54 }
 0x59f   : > { %v6616_v43 = vpop.eup %6615  ;;  %v4845_v25 = vadd.f32 %v4844_v10, %v4559_v21 }
 0x5a0   : > { %v6618_v29 = vpop.eup %6617  ;;  %v5267_v8 = vmul.f32 %v6616_v43, %v9819_v48  ;;  %v4866_v13 = vadd.f32 %v4865_v32, %v4560_v1  ;;  %v4099_v0 = vpop.f32.mrb[180].mxu0  ;;  %v8990_v43 = vld [vmem:[#allocation2 + $0x260] sm:$0xff] }
 0x5a1   : > { %v8975_v37 = vpop.f32.mrb[180].mxu1  ;;  %v6620_v6 = vpop.eup %6619  ;;  %v5269_v63 = vmul.f32 %v6618_v29, %v9821_v59  ;;  %v4567_v39 = vmul.f32 %v8978_v55, %v4099_v0 }
 0x5a2   : > { %9820 = vst [vmem:[#allocation29_spill] sm:$0xff] %v8975_v37  ;;  %v4101_v38 = vpop.f32.mrb[181].mxu0  ;;  %v8981_v33 = vpop.f32.mrb[181].mxu1  ;;  %v5283_v45 = vmax.f32 %v5267_v8, 0.0  ;;  %v5268_v41 = vmul.f32 %v6620_v6, %v9823_v36  ;;  %v8995_v6 = vld [vmem:[#allocation2 + $0x268] sm:$0xff]  ;;  %v9001_v36 = vld [vmem:[#allocation2 + $0x2a0] sm:$0xff] }
 0x5a3   : > { %9822 = vst [vmem:[#allocation18_spill] sm:$0xff] %v8981_v33  ;;  %v6622_v62 = vpop.eup %6621  ;;  %v4568_v12 = vmul.f32 %v8984_v26, %v4101_v38  ;;  %v5285_v15 = vmax.f32 %v5269_v63, 0.0  ;;  %v4846_v10 = vadd.f32 %v4845_v25, %v4567_v39 }
 0x5a4   : > { %v5270_v51 = vmul.f32 %v6622_v62, %v9824_v17  ;;  %v5284_v32 = vmax.f32 %v5268_v41, 0.0  ;;  %v4105_v21 = vpop.f32.mrb[182].mxu0  ;;  %v8988_v54 = vpop.f32.mrb[182].mxu1 }
 0x5a5   : > { %v4867_v49 = vadd.f32 %v4866_v13, %v4568_v12  ;;  %9825 = vst [vmem:[#allocation28_spill] sm:$0xff] %v8988_v54  ;;  %v4575_v29 = vmul.f32 %v8990_v43, %v4105_v21  ;;  %v4107_v48 = vpop.f32.mrb[183].mxu0  ;;  %v8993_v8 = vpop.f32.mrb[183].mxu1 }
 0x5a6   : > { %v5286_v1 = vmax.f32 %v5270_v51, 0.0  ;;  %9826 = vst [vmem:[#allocation16_spill] sm:$0xff] %v8993_v8  ;;  %v5356_v0 = vcombine.low %v5283_v45, %v5284_v32  ;;  %v4576_v59 = vmul.f32 %v8995_v6, %v4107_v48  ;;  %v9007_v51 = vld [vmem:[#allocation2 + $0x2a8] sm:$0xff] }
 0x5a7   : > { %v4847_v25 = vadd.f32 %v4846_v10, %v4575_v29  ;;  %v9014_v29 = vld [vmem:[#allocation2 + $0x2e0] sm:$0xff] }
 0x5a8   : > { %v5357_v63 = vcombine.low %v5285_v15, %v5286_v1  ;;  %v4868_v39 = vadd.f32 %v4867_v49, %v4576_v59  ;;  %v4111_v13 = vpop.f32.mrb[184].mxu0  ;;  %v8998_v38 = vpop.f32.mrb[184].mxu1  ;;  %v5366_v62 = vrot.slane %v5356_v0, %v8846_v30 }
 0x5a9   : > { %9827 = vst [vmem:[#allocation27_spill] sm:$0xff] %v8998_v38  ;;  %v4583_v41 = vmul.f32 %v9001_v36, %v4111_v13  ;;  %v4113_v12 = vpop.f32.mrb[185].mxu0  ;;  %v9004_v17 = vpop.f32.mrb[185].mxu1  ;;  %v9019_v13 = vld [vmem:[#allocation2 + $0x2e8] sm:$0xff] }
 0x5aa   : > { %9828 = vst [vmem:[#allocation24_spill] sm:$0xff] %v9004_v17  ;;  %v5373_v45 = vrot.slane %v5357_v63, %v8846_v30  ;;  %v4584_v15 = vmul.f32 %v9007_v51, %v4113_v12 }
 0x5ab   : > { %v4848_v10 = vadd.f32 %v4847_v25, %v4583_v41 }
 0x5ac   : > { %v9010_v32 = vcombine.low %v5366_v62, %v5373_v45  ;;  %v4869_v49 = vadd.f32 %v4868_v39, %v4584_v15  ;;  %v4117_v21 = vpop.f32.mrb[186].mxu0  ;;  %v9012_v1 = vpop.f32.mrb[186].mxu1  ;;  %v9024_v39 = vld [vmem:[#allocation2 + $0x320] sm:$0xff] }
 0x5ad   : > { %9830 = vst [vmem:[#allocation49_spill] sm:$0xff] %v9012_v1  ;;  %v4591_v48 = vmul.f32 %v9014_v29, %v4117_v21  ;;  %v4119_v0 = vpop.f32.mrb[187].mxu0  ;;  %v9017_v59 = vpop.f32.mrb[187].mxu1  ;;  %v9029_v21 = vld [vmem:[#allocation2 + $0x328] sm:$0xff] }
 0x5ae   : > { %9829 = vst [vmem:[#allocation9_spill] sm:$0xff] %v9010_v32  ;;  %9831 = vst [vmem:[#allocation10_spill] sm:$0xff] %v9017_v59  ;;  %v4592_v63 = vmul.f32 %v9019_v13, %v4119_v0 }
 0x5af   : > { %v4849_v24 = vadd.f32 %v4848_v10, %v4591_v48  ;;  %v9034_v10 = vld [vmem:[#allocation2 + $0x360] sm:$0xff] }
 0x5b0   : > { %v4870_v12 = vadd.f32 %v4869_v49, %v4592_v63  ;;  %v4123_v25 = vpop.f32.mrb[188].mxu0  ;;  %v9022_v62 = vpop.f32.mrb[188].mxu1 }
 0x5b1   : > { %9832 = vst [vmem:[#allocation51_spill] sm:$0xff] %v9022_v62  ;;  %v4599_v41 = vmul.f32 %v9024_v39, %v4123_v25  ;;  %v4125_v45 = vpop.f32.mrb[189].mxu0  ;;  %v9027_v15 = vpop.f32.mrb[189].mxu1  ;;  %v9039_v25 = vld [vmem:[#allocation2 + $0x368] sm:$0xff] }
 0x5b2   : > { %9833 = vst [vmem:[#allocation53_spill] sm:$0xff] %v9027_v15  ;;  %v4600_v32 = vmul.f32 %v9029_v21, %v4125_v45 }
 0x5b3   : > { %v4850_v30 = vadd.f32 %v4849_v24, %v4599_v41  ;;  %v9044_v24 = vld [vmem:[#allocation2 + $0x3a0] sm:$0xff] }
 0x5b4   : > { %v4871_v59 = vadd.f32 %v4870_v12, %v4600_v32  ;;  %v4129_v1 = vpop.f32.mrb[190].mxu0  ;;  %v9032_v0 = vpop.f32.mrb[190].mxu1 }
 0x5b5   : > { %9834 = vst [vmem:[#allocation20_spill] sm:$0xff] %v9032_v0  ;;  %v4607_v49 = vmul.f32 %v9034_v10, %v4129_v1  ;;  %v4131_v48 = vpop.f32.mrb[191].mxu0  ;;  %v9037_v63 = vpop.f32.mrb[191].mxu1  ;;  %v9049_v1 = vld [vmem:[#allocation2 + $0x3a8] sm:$0xff] }
 0x5b6   : > { %9835 = vst [vmem:[#allocation55_spill] sm:$0xff] %v9037_v63  ;;  %v4608_v15 = vmul.f32 %v9039_v25, %v4131_v48 }
 0x5b7   : > { %v4851_v62 = vadd.f32 %v4850_v30, %v4607_v49  ;;  %v9052_v30 = vld [vmem:[#allocation2 + $0x3e0] sm:$0xff] }
 0x5b8   : > { %v4872_v17 = vadd.f32 %v4871_v59, %v4608_v15  ;;  %v4135_v38 = vpop.f32.mrb[192].mxu0  ;;  %v9042_v45 = vpop.f32.mrb[192].mxu1 }
 0x5b9   : > { %9836 = vst [vmem:[#allocation22_spill] sm:$0xff] %v9042_v45  ;;  %v4615_v32 = vmul.f32 %v9044_v24, %v4135_v38  ;;  %v4137_v12 = vpop.f32.mrb[193].mxu0  ;;  %v9047_v41 = vpop.f32.mrb[193].mxu1  ;;  %v9055_v45 = vld [vmem:[#allocation2 + $0x3e8] sm:$0xff] }
 0x5ba   : > { %9837 = vst [vmem:[#allocation23_spill] sm:$0xff] %v9047_v41  ;;  %v4616_v63 = vmul.f32 %v9049_v1, %v4137_v12  ;;  %v9058_v12 = vld [vmem:[#allocation2 + $0x30] sm:$0xff] }
 0x5bb   : > { %v4852_v0 = vadd.f32 %v4851_v62, %v4615_v32  ;;  %v9061_v62 = vld [vmem:[#allocation2 + $0x70] sm:$0xff] }
 0x5bc   : > { %v4873_v8 = vadd.f32 %v4872_v17, %v4616_v63  ;;  %v4141_v54 = vpop.f32.mrb[194].mxu0  ;;  %v4404_v48 = vpop.f32.mrb[194].mxu1 }
 0x5bd   : > { %v4623_v59 = vmul.f32 %v9052_v30, %v4141_v54  ;;  %v4143_v15 = vpop.f32.mrb[195].mxu0  ;;  %v4406_v49 = vpop.f32.mrb[195].mxu1  ;;  %v4633_v17 = vmul.f32 %v9058_v12, %v4404_v48 }
 0x5be   : > { %v4624_v38 = vmul.f32 %v9055_v45, %v4143_v15  ;;  %v4634_v15 = vmul.f32 %v9064_v56, %v4406_v49 }
 0x5bf   : > { %v4853_v33 = vadd.f32 %v4852_v0, %v4623_v59  ;;  %v9067_v0 = vld [vmem:[#allocation2 + $0x78] sm:$0xff] }
 0x5c0   : > { %v4874_v41 = vadd.f32 %v4873_v8, %v4624_v38  ;;  %v4147_v37 = vpop.f32.mrb[196].mxu0  ;;  %v4410_v11 = vpop.f32.mrb[196].mxu1 }
 0x5c1   : > { %v4854_v44 = vrot.slane %v4853_v33, 4  ;;  %v4641_v63 = vmul.f32 %v9061_v62, %v4410_v11  ;;  %v4149_v54 = vpop.f32.mrb[197].mxu0  ;;  %v4412_v32 = vpop.f32.mrb[197].mxu1  ;;  %v4631_v11 = vmul.f32 %v8896_v52, %v4147_v37 }
 0x5c2   : > { %v4875_v16 = vrot.slane %v4874_v41, 4  ;;  %v4642_v8 = vmul.f32 %v9067_v0, %v4412_v32  ;;  %v4632_v32 = vmul.f32 %v8904_v58, %v4149_v54 }
 0x5c3   : > { %v4855_v59 = vadd.f32 %v4854_v44, %v4853_v33  ;;  %v5049_v38 = vadd.f32 %v4641_v63, %v4633_v17 }
 0x5c4   : > { %v4876_v57 = vadd.f32 %v4875_v16, %v4874_v41  ;;  %v5070_v28 = vadd.f32 %v4642_v8, %v4634_v15  ;;  %v4153_v48 = vpop.f32.mrb[198].mxu0  ;;  %v4416_v50 = vpop.f32.mrb[198].mxu1  ;;  %v9077_v16 = vld [vmem:[#allocation2 + $0xb8] sm:$0xff] }
 0x5c5   : > { %v4856_v47 = vrot.slane %v4855_v59, 2  ;;  %v4639_v46 = vmul.f32 %v8899_v4, %v4153_v48  ;;  %v4649_v53 = vmul.f32 %v9072_v22, %v4416_v50  ;;  %v4155_v49 = vpop.f32.mrb[199].mxu0  ;;  %v4418_v40 = vpop.f32.mrb[199].mxu1  ;;  %v9081_v22 = vld [vmem:[#allocation2 + $0xf0] sm:$0xff] }
 0x5c6   : > { %v4877_v20 = vrot.slane %v4876_v57, 2  ;;  %v4640_v44 = vmul.f32 %v8907_v34, %v4155_v49  ;;  %v4650_v33 = vmul.f32 %v9077_v16, %v4418_v40 }
 0x5c7   : > { %v4857_v41 = vadd.f32 %v4856_v47, %v4855_v59  ;;  %v5007_v17 = vadd.f32 %v4639_v46, %v4631_v11  ;;  %v5050_v52 = vadd.f32 %v5049_v38, %v4649_v53  ;;  %v9085_v47 = vld [vmem:[#allocation2 + $0xf8] sm:$0xff] }
 0x5c8   : > { %v4878_v37 = vadd.f32 %v4877_v20, %v4876_v57  ;;  %v5028_v4 = vadd.f32 %v4640_v44, %v4632_v32  ;;  %v5071_v63 = vadd.f32 %v5070_v28, %v4650_v33  ;;  %v4159_v15 = vpop.f32.mrb[200].mxu0  ;;  %v4422_v8 = vpop.f32.mrb[200].mxu1  ;;  %v9839_v32 = vld [vmem:[#allocation12_spill] sm:$0xff] }
 0x5c9   : > { %v4858_v50 = vrot.slane %v4857_v41, 1  ;;  %v4647_v48 = vmul.f32 %v8912_v5, %v4159_v15  ;;  %v4657_v58 = vmul.f32 %v9081_v22, %v4422_v8  ;;  %v4161_v34 = vpop.f32.mrb[201].mxu0  ;;  %v4424_v54 = vpop.f32.mrb[201].mxu1  ;;  %v9090_v44 = vmul.f32 %v9839_v32, %v9839_v32 }
 0x5ca   : > { %v4879_v49 = vrot.slane %v4878_v37, 1  ;;  %v4648_v40 = vmul.f32 %v8917_v7, %v4161_v34  ;;  %v4658_v20 = vmul.f32 %v9085_v47, %v4424_v54  ;;  %v9093_v7 = vld [vmem:[#allocation2 + $0x130] sm:$0xff] }
 0x5cb   : > { %v4859_v53 = vadd.f32 %v4858_v50, %v4857_v41  ;;  %v5008_v46 = vadd.f32 %v5007_v17, %v4647_v48  ;;  %v5051_v28 = vadd.f32 %v5050_v52, %v4657_v58  ;;  %v9840_v17 = vld [vmem:[#allocation13_spill] sm:$0xff] }
 0x5cc   : > { %v4880_v57 = vadd.f32 %v4879_v49, %v4878_v37  ;;  %v5029_v59 = vadd.f32 %v5028_v4, %v4648_v40  ;;  %v5072_v38 = vadd.f32 %v5071_v63, %v4658_v20  ;;  %v4165_v5 = vpop.f32.mrb[202].mxu0  ;;  %v4428_v11 = vpop.f32.mrb[202].mxu1  ;;  %v9098_v52 = vmul.f32 %v9840_v17, %v9840_v17  ;;  %v9101_v63 = vld [vmem:[#allocation2 + $0x138] sm:$0xff] }
 0x5cd   : > { %v5095_v33 = vmul.f32 0.015625, %v4859_v53  ;;  %v4655_v15 = vmul.f32 %v8925_v42, %v4165_v5  ;;  %v4665_v8 = vmul.f32 %v9093_v7, %v4428_v11  ;;  %v4167_v34 = vpop.f32.mrb[203].mxu0  ;;  %v4430_v41 = vpop.f32.mrb[203].mxu1 }
 0x5ce   : > { %v5096_v37 = vmul.f32 0.015625, %v4880_v57  ;;  %v4656_v4 = vmul.f32 %v8931_v9, %v4167_v34  ;;  %v4666_v50 = vmul.f32 %v9101_v63, %v4430_v41  ;;  %v9107_v57 = vld [vmem:[#allocation2 + $0x170] sm:$0xff] }
 0x5cf   : > { %v5151_v48 = vsub.f32 %v5095_v33, %v9090_v44  ;;  %v5009_v42 = vadd.f32 %v5008_v46, %v4655_v15  ;;  %v5052_v58 = vadd.f32 %v5051_v28, %v4665_v8  ;;  %v9111_v46 = vld [vmem:[#allocation2 + $0x178] sm:$0xff] }
 0x5d0   : > { %v5152_v54 = vsub.f32 %v5096_v37, %v9098_v52  ;;  %v5030_v49 = vadd.f32 %v5029_v59, %v4656_v4  ;;  %v5073_v40 = vadd.f32 %v5072_v38, %v4666_v50  ;;  %v4171_v20 = vpop.f32.mrb[204].mxu0  ;;  %v4434_v53 = vpop.f32.mrb[204].mxu1 }
 0x5d1   : > { %v5167_v5 = vmax.f32 %v5151_v48, 0.0  ;;  %v4663_v11 = vmul.f32 %v8936_v18, %v4171_v20  ;;  %v4673_v9 = vmul.f32 %v9107_v57, %v4434_v53  ;;  %v4173_v32 = vpop.f32.mrb[205].mxu0  ;;  %v4436_v34 = vpop.f32.mrb[205].mxu1  ;;  %v9115_v48 = vld [vmem:[#allocation2 + $0x1b0] sm:$0xff] }
 0x5d2   : > { %v5168_v41 = vmax.f32 %v5152_v54, 0.0  ;;  %v4664_v33 = vmul.f32 %v8941_v14, %v4173_v32  ;;  %v4674_v28 = vmul.f32 %v9111_v46, %v4436_v34  ;;  %v9123_v34 = vld [vmem:[#allocation2 + $0x1f0] sm:$0xff] }
 0x5d3   : > { %v5231_v59 = vadd.f32 1e-05, %v5167_v5  ;;  %v5010_v38 = vadd.f32 %v5009_v42, %v4663_v11  ;;  %v5053_v15 = vadd.f32 %v5052_v58, %v4673_v9  ;;  %v9119_v5 = vld [vmem:[#allocation2 + $0x1b8] sm:$0xff] }
 0x5d4   : > { %v5232_v8 = vadd.f32 1e-05, %v5168_v41  ;;  %v5031_v17 = vadd.f32 %v5030_v49, %v4664_v33  ;;  %v5074_v37 = vadd.f32 %v5073_v40, %v4674_v28  ;;  %v4177_v18 = vpop.f32.mrb[206].mxu0  ;;  %v4440_v4 = vpop.f32.mrb[206].mxu1 }
 0x5d5   : > { %6623 = vrsqrt.f32 %v5231_v59  ;;  %v4671_v50 = vmul.f32 %v8946_v3, %v4177_v18  ;;  %v4681_v54 = vmul.f32 %v9115_v48, %v4440_v4  ;;  %v4179_v14 = vpop.f32.mrb[207].mxu0  ;;  %v4442_v20 = vpop.f32.mrb[207].mxu1  ;;  %v9127_v59 = vld [vmem:[#allocation2 + $0x1f8] sm:$0xff] }
 0x5d6   : > { %6625 = vrsqrt.f32 %v5232_v8  ;;  %v4672_v53 = vmul.f32 %v8951_v19, %v4179_v14  ;;  %v4682_v42 = vmul.f32 %v9119_v5, %v4442_v20 }
 0x5d7   : > { %v5011_v58 = vadd.f32 %v5010_v38, %v4671_v50  ;;  %v5054_v49 = vadd.f32 %v5053_v15, %v4681_v54  ;;  %v9131_v50 = vld [vmem:[#allocation2 + $0x230] sm:$0xff] }
 0x5d8   : > { %v5032_v40 = vadd.f32 %v5031_v17, %v4672_v53  ;;  %v5075_v11 = vadd.f32 %v5074_v37, %v4682_v42  ;;  %v4183_v9 = vpop.f32.mrb[208].mxu0  ;;  %v4446_v32 = vpop.f32.mrb[208].mxu1  ;;  %v9135_v53 = vld [vmem:[#allocation2 + $0x238] sm:$0xff] }
 0x5d9   : > { %v4679_v3 = vmul.f32 %v8956_v60, %v4183_v9  ;;  %v4689_v41 = vmul.f32 %v9123_v34, %v4446_v32  ;;  %v4185_v33 = vpop.f32.mrb[209].mxu0  ;;  %v4448_v28 = vpop.f32.mrb[209].mxu1  ;;  %v9841_v9 = vld [vmem:[#allocation15_spill] sm:$0xff] }
 0x5da   : > { %v4680_v19 = vmul.f32 %v8961_v23, %v4185_v33  ;;  %v4690_v8 = vmul.f32 %v9127_v59, %v4448_v28  ;;  %v9842_v28 = vld [vmem:[#allocation17_spill] sm:$0xff] }
 0x5db   : > { %v5012_v38 = vadd.f32 %v5011_v58, %v4679_v3  ;;  %v5055_v15 = vadd.f32 %v5054_v49, %v4689_v41 }
 0x5dc   : > { %v5033_v17 = vadd.f32 %v5032_v40, %v4680_v19  ;;  %v5076_v37 = vadd.f32 %v5075_v11, %v4690_v8  ;;  %v4189_v18 = vpop.f32.mrb[210].mxu0  ;;  %v4452_v4 = vpop.f32.mrb[210].mxu1 }
 0x5dd   : > { %v4687_v60 = vmul.f32 %v8966_v31, %v4189_v18  ;;  %v4697_v54 = vmul.f32 %v9131_v50, %v4452_v4  ;;  %v4191_v14 = vpop.f32.mrb[211].mxu0  ;;  %v4454_v20 = vpop.f32.mrb[211].mxu1  ;;  %v9141_v18 = vld [vmem:[#allocation2 + $0x270] sm:$0xff] }
 0x5de   : > { %v4688_v23 = vmul.f32 %v8971_v61, %v4191_v14  ;;  %v4698_v42 = vmul.f32 %v9135_v53, %v4454_v20 }
 0x5df   : > { %v6624_v58 = vpop.eup %6623  ;;  %v5013_v49 = vadd.f32 %v5012_v38, %v4687_v60  ;;  %v5056_v40 = vadd.f32 %v5055_v15, %v4697_v54  ;;  %v9145_v15 = vld [vmem:[#allocation2 + $0x278] sm:$0xff] }
 0x5e0   : > { %v6626_v11 = vpop.eup %6625  ;;  %v5263_v32 = vmul.f32 %v6624_v58, %v9841_v9  ;;  %v5034_v3 = vadd.f32 %v5033_v17, %v4688_v23  ;;  %v5077_v31 = vadd.f32 %v5076_v37, %v4698_v42  ;;  %v4195_v41 = vpop.f32.mrb[212].mxu0 }
 0x5e1   : > { %v4458_v33 = vpop.f32.mrb[212].mxu1  ;;  %v5264_v19 = vmul.f32 %v6626_v11, %v9842_v28  ;;  %v4695_v8 = vmul.f32 %v8978_v55, %v4195_v41  ;;  %v4197_v4 = vpop.f32.mrb[213].mxu0  ;;  %v9151_v41 = vld [vmem:[#allocation2 + $0x2b0] sm:$0xff] }
 0x5e2   : > { %v4705_v61 = vmul.f32 %v9141_v18, %v4458_v33  ;;  %v4460_v14 = vpop.f32.mrb[213].mxu1  ;;  %v5279_v20 = vmax.f32 %v5263_v32, 0.0  ;;  %v4696_v38 = vmul.f32 %v8984_v26, %v4197_v4  ;;  %v9155_v4 = vld [vmem:[#allocation2 + $0x2b8] sm:$0xff] }
 0x5e3   : > { %v4706_v17 = vmul.f32 %v9145_v15, %v4460_v14  ;;  %v5280_v37 = vmax.f32 %v5264_v19, 0.0  ;;  %v5014_v60 = vadd.f32 %v5013_v49, %v4695_v8  ;;  %v9159_v14 = vld [vmem:[#allocation2 + $0x2f0] sm:$0xff] }
 0x5e4   : > { %v5057_v54 = vadd.f32 %v5056_v40, %v4705_v61  ;;  %v5035_v23 = vadd.f32 %v5034_v3, %v4696_v38  ;;  %v4201_v58 = vpop.f32.mrb[214].mxu0  ;;  %v4464_v55 = vpop.f32.mrb[214].mxu1 }
 0x5e5   : > { %v5078_v42 = vadd.f32 %v5077_v31, %v4706_v17  ;;  %v9148_v11 = vcombine.low %v5279_v20, %v5280_v37  ;;  %v4703_v9 = vmul.f32 %v8990_v43, %v4201_v58  ;;  %v4713_v32 = vmul.f32 %v9151_v41, %v4464_v55  ;;  %v4203_v26 = vpop.f32.mrb[215].mxu0  ;;  %v4466_v33 = vpop.f32.mrb[215].mxu1  ;;  %v9163_v37 = vld [vmem:[#allocation2 + $0x2f8] sm:$0xff] }
 0x5e6   : > { %v4704_v28 = vmul.f32 %v8995_v6, %v4203_v26  ;;  %v4714_v49 = vmul.f32 %v9155_v4, %v4466_v33 }
 0x5e7   : > { %9843 = vst [vmem:[#allocation30_spill] sm:$0xff] %v9148_v11  ;;  %v5015_v40 = vadd.f32 %v5014_v60, %v4703_v9  ;;  %v5058_v3 = vadd.f32 %v5057_v54, %v4713_v32  ;;  %v9167_v32 = vld [vmem:[#allocation2 + $0x330] sm:$0xff]  ;;  %v9849_v11 = vld [vmem:[#allocation40_spill] sm:$0xff] }
 0x5e8   : > { %v5036_v31 = vadd.f32 %v5035_v23, %v4704_v28  ;;  %v5079_v19 = vadd.f32 %v5078_v42, %v4714_v49  ;;  %v4207_v8 = vpop.f32.mrb[216].mxu0  ;;  %v4470_v61 = vpop.f32.mrb[216].mxu1  ;;  %v9171_v49 = vld [vmem:[#allocation2 + $0x338] sm:$0xff] }
 0x5e9   : > { %v4711_v43 = vmul.f32 %v9001_v36, %v4207_v8  ;;  %v4721_v20 = vmul.f32 %v9159_v14, %v4470_v61  ;;  %v4209_v38 = vpop.f32.mrb[217].mxu0  ;;  %v4472_v17 = vpop.f32.mrb[217].mxu1 }
 0x5ea   : > { %v4712_v6 = vmul.f32 %v9007_v51, %v4209_v38  ;;  %v4722_v58 = vmul.f32 %v9163_v37, %v4472_v17 }
 0x5eb   : > { %v5016_v60 = vadd.f32 %v5015_v40, %v4711_v43  ;;  %v5059_v54 = vadd.f32 %v5058_v3, %v4721_v20  ;;  %v9175_v20 = vld [vmem:[#allocation2 + $0x370] sm:$0xff] }
 0x5ec   : > { %v5037_v23 = vadd.f32 %v5036_v31, %v4712_v6  ;;  %v5080_v42 = vadd.f32 %v5079_v19, %v4722_v58  ;;  %v4213_v55 = vpop.f32.mrb[218].mxu0  ;;  %v4476_v9 = vpop.f32.mrb[218].mxu1  ;;  %v9179_v58 = vld [vmem:[#allocation2 + $0x378] sm:$0xff] }
 0x5ed   : > { %v4719_v36 = vmul.f32 %v9014_v29, %v4213_v55  ;;  %v4729_v26 = vmul.f32 %v9167_v32, %v4476_v9  ;;  %v4215_v33 = vpop.f32.mrb[219].mxu0  ;;  %v4478_v28 = vpop.f32.mrb[219].mxu1 }
 0x5ee   : > { %v4720_v51 = vmul.f32 %v9019_v13, %v4215_v33  ;;  %v4730_v8 = vmul.f32 %v9171_v49, %v4478_v28 }
 0x5ef   : > { %v5017_v40 = vadd.f32 %v5016_v60, %v4719_v36  ;;  %v5060_v3 = vadd.f32 %v5059_v54, %v4729_v26  ;;  %v9183_v26 = vld [vmem:[#allocation2 + $0x3b0] sm:$0xff] }
 0x5f0   : > { %v5038_v31 = vadd.f32 %v5037_v23, %v4720_v51  ;;  %v5081_v19 = vadd.f32 %v5080_v42, %v4730_v8  ;;  %v4219_v61 = vpop.f32.mrb[220].mxu0  ;;  %v4482_v43 = vpop.f32.mrb[220].mxu1  ;;  %v9187_v8 = vld [vmem:[#allocation2 + $0x3b8] sm:$0xff] }
 0x5f1   : > { %v4727_v29 = vmul.f32 %v9024_v39, %v4219_v61  ;;  %v4737_v38 = vmul.f32 %v9175_v20, %v4482_v43  ;;  %v4221_v17 = vpop.f32.mrb[221].mxu0  ;;  %v4484_v6 = vpop.f32.mrb[221].mxu1 }
 0x5f2   : > { %v4728_v13 = vmul.f32 %v9029_v21, %v4221_v17  ;;  %v4738_v55 = vmul.f32 %v9179_v58, %v4484_v6 }
 0x5f3   : > { %v5018_v60 = vadd.f32 %v5017_v40, %v4727_v29  ;;  %v5061_v54 = vadd.f32 %v5060_v3, %v4737_v38  ;;  %v9191_v38 = vld [vmem:[#allocation2 + $0x3f0] sm:$0xff] }
 0x5f4   : > { %v5039_v23 = vadd.f32 %v5038_v31, %v4728_v13  ;;  %v5082_v42 = vadd.f32 %v5081_v19, %v4738_v55  ;;  %v4225_v9 = vpop.f32.mrb[222].mxu0  ;;  %v4488_v36 = vpop.f32.mrb[222].mxu1  ;;  %v9195_v55 = vld [vmem:[#allocation2 + $0x3f8] sm:$0xff] }
 0x5f5   : > { %v4735_v39 = vmul.f32 %v9034_v10, %v4225_v9  ;;  %v4745_v33 = vmul.f32 %v9183_v26, %v4488_v36  ;;  %v4227_v28 = vpop.f32.mrb[223].mxu0  ;;  %v4490_v51 = vpop.f32.mrb[223].mxu1  ;;  %v9845_v36 = vld [vmem:[#allocation34_spill] sm:$0xff] }
 0x5f6   : > { %v4736_v21 = vmul.f32 %v9039_v25, %v4227_v28  ;;  %v4746_v61 = vmul.f32 %v9187_v8, %v4490_v51 }
 0x5f7   : > { %v5019_v40 = vadd.f32 %v5018_v60, %v4735_v39  ;;  %v5062_v3 = vadd.f32 %v5061_v54, %v4745_v33 }
 0x5f8   : > { %v5040_v31 = vadd.f32 %v5039_v23, %v4736_v21  ;;  %v5083_v19 = vadd.f32 %v5082_v42, %v4746_v61  ;;  %v4231_v43 = vpop.f32.mrb[224].mxu0  ;;  %v4494_v29 = vpop.f32.mrb[224].mxu1  ;;  %v9844_v23 = vld [vmem:[#allocation31_spill] sm:$0xff] }
 0x5f9   : > { %v4743_v10 = vmul.f32 %v9044_v24, %v4231_v43  ;;  %v4753_v17 = vmul.f32 %v9191_v38, %v4494_v29  ;;  %v4233_v6 = vpop.f32.mrb[225].mxu0  ;;  %v4496_v13 = vpop.f32.mrb[225].mxu1  ;;  %v9200_v42 = vmul.f32 %v9844_v23, %v9844_v23  ;;  %v9204_v24 = vmul.f32 %v9845_v36, %v9845_v36 }
 0x5fa   : > { %v4744_v25 = vmul.f32 %v9049_v1, %v4233_v6  ;;  %v4754_v9 = vmul.f32 %v9195_v55, %v4496_v13  ;;  %v4514_v36 = vmul.f32 %v9067_v0, %v8892_v27 }
 0x5fb   : > { %v5020_v60 = vadd.f32 %v5019_v40, %v4743_v10  ;;  %v5063_v54 = vadd.f32 %v5062_v3, %v4753_v17  ;;  %v5129_v17 = vrot.slane %v9200_v42, 1  ;;  %v5130_v6 = vrot.slane %v9204_v24, 1 }
 0x5fc   : > { %v5041_v39 = vadd.f32 %v5040_v31, %v4744_v25  ;;  %v5084_v33 = vadd.f32 %v5083_v19, %v4754_v9  ;;  %v4237_v28 = vpop.f32.mrb[226].mxu0 }
 0x5fd   : > { %v5064_v51 = vrot.slane %v5063_v54, 4  ;;  %v4751_v1 = vmul.f32 %v9052_v30, %v4237_v28  ;;  %v4239_v21 = vpop.f32.mrb[227].mxu0  ;;  %v4513_v30 = vmul.f32 %v9061_v62, %v8890_v2 }
 0x5fe   : > { %v5085_v61 = vrot.slane %v5084_v33, 4  ;;  %v4752_v43 = vmul.f32 %v9055_v45, %v4239_v21 }
 0x5ff   : > { %v5065_v29 = vadd.f32 %v5064_v51, %v5063_v54  ;;  %v5021_v10 = vadd.f32 %v5020_v60, %v4751_v1  ;;  %v9846_v51 = vld [vmem:[#allocation25_spill] sm:$0xff] }
 0x600   : > { %v5086_v31 = vadd.f32 %v5085_v61, %v5084_v33  ;;  %v5042_v19 = vadd.f32 %v5041_v39, %v4752_v43  ;;  %v4308_v13 = vpop.f32.mrb[228].mxu0  ;;  %v4521_v33 = vmul.f32 %v9846_v51, %v8894_v35  ;;  %v9847_v61 = vld [vmem:[#allocation41_spill] sm:$0xff] }
 0x601   : > { %v5066_v25 = vrot.slane %v5065_v29, 2  ;;  %v5022_v9 = vrot.slane %v5021_v10, 4  ;;  %v4505_v45 = vmul.f32 %v9058_v12, %v4308_v13  ;;  %v4310_v23 = vpop.f32.mrb[229].mxu0  ;;  %v4522_v2 = vmul.f32 %v9077_v16, %v9847_v61  ;;  %v9848_v13 = vld [vmem:[#allocation43_spill] sm:$0xff]  ;;  %v9853_v51 = vld [vmem:[#allocation45_spill] sm:$0xff] }
 0x602   : > { %v5087_v54 = vrot.slane %v5086_v31, 2  ;;  %v5043_v60 = vrot.slane %v5042_v19, 4  ;;  %v4506_v28 = vmul.f32 %v9064_v56, %v4310_v23  ;;  %v4529_v3 = vmul.f32 %v9081_v22, %v9848_v13  ;;  %v9856_v13 = vld [vmem:[#allocation50_spill] sm:$0xff] }
 0x603   : > { %v5067_v39 = vadd.f32 %v5066_v25, %v5065_v29  ;;  %v5023_v1 = vadd.f32 %v5022_v9, %v5021_v10  ;;  %v4881_v21 = vadd.f32 %v4513_v30, %v4505_v45  ;;  %v4530_v56 = vmul.f32 %v9085_v47, %v9849_v11  ;;  %v9850_v10 = vld [vmem:[#allocation42_spill] sm:$0xff] }
 0x604   : > { %v5088_v62 = vadd.f32 %v5087_v54, %v5086_v31  ;;  %v5044_v43 = vadd.f32 %v5043_v60, %v5042_v19  ;;  %v4902_v12 = vadd.f32 %v4514_v36, %v4506_v28  ;;  %v4537_v30 = vmul.f32 %v9093_v7, %v9850_v10  ;;  %v9851_v19 = vld [vmem:[#allocation44_spill] sm:$0xff]  ;;  %v9852_v54 = vld [vmem:[#allocation46_spill] sm:$0xff] }
 0x605   : > { %v5068_v27 = vrot.slane %v5067_v39, 1  ;;  %v5024_v0 = vrot.slane %v5023_v1, 2  ;;  %v4882_v40 = vadd.f32 %v4881_v21, %v4521_v33  ;;  %v4538_v9 = vmul.f32 %v9101_v63, %v9851_v19  ;;  %v9858_v10 = vld [vmem:[#allocation54_spill] sm:$0xff] }
 0x606   : > { %v5089_v23 = vrot.slane %v5088_v62, 1  ;;  %v5045_v35 = vrot.slane %v5044_v43, 2  ;;  %v4903_v29 = vadd.f32 %v4902_v12, %v4522_v2  ;;  %v4545_v60 = vmul.f32 %v9107_v57, %v9852_v54  ;;  %v9855_v2 = vld [vmem:[#allocation47_spill] sm:$0xff] }
 0x607   : > { %v5069_v25 = vadd.f32 %v5068_v27, %v5067_v39  ;;  %v5025_v16 = vadd.f32 %v5024_v0, %v5023_v1  ;;  %v4883_v31 = vadd.f32 %v4882_v40, %v4529_v3  ;;  %v4546_v33 = vmul.f32 %v9111_v46, %v9853_v51  ;;  %v9854_v1 = vld [vmem:[#allocation48_spill] sm:$0xff] }
 0x608   : > { %v5090_v45 = vadd.f32 %v5089_v23, %v5088_v62  ;;  %v5046_v22 = vadd.f32 %v5045_v35, %v5044_v43  ;;  %v4904_v36 = vadd.f32 %v4903_v29, %v4530_v56  ;;  %v4553_v40 = vmul.f32 %v9115_v48, %v9854_v1  ;;  %v9857_v23 = vld [vmem:[#allocation52_spill] sm:$0xff] }
 0x609   : > { %v5105_v28 = vmul.f32 0.015625, %v5069_v25  ;;  %v5026_v47 = vrot.slane %v5025_v16, 1  ;;  %v4884_v11 = vadd.f32 %v4883_v31, %v4537_v30  ;;  %v4554_v62 = vmul.f32 %v9119_v5, %v9855_v2  ;;  %v9860_v31 = vld [vmem:[#allocation14_spill] sm:$0xff] }
 0x60a   : > { %v5106_v21 = vmul.f32 0.015625, %v5090_v45  ;;  %v5047_v7 = vrot.slane %v5046_v22, 1  ;;  %v4905_v39 = vadd.f32 %v4904_v36, %v4538_v9  ;;  %v4561_v27 = vmul.f32 %v9123_v34, %v9856_v13 }
 0x60b   : > { %v5161_v3 = vsub.f32 %v5105_v28, %v5129_v17  ;;  %v5027_v63 = vadd.f32 %v5026_v47, %v5025_v16  ;;  %v4885_v61 = vadd.f32 %v4884_v11, %v4545_v60  ;;  %v4562_v35 = vmul.f32 %v9127_v59, %v9857_v23  ;;  %v9862_v59 = vld [vmem:[#allocation29_spill] sm:$0xff]  ;;  %v9864_v11 = vld [vmem:[#allocation28_spill] sm:$0xff] }
 0x60c   : > { %v5162_v43 = vsub.f32 %v5106_v21, %v5130_v6  ;;  %v5048_v57 = vadd.f32 %v5047_v7, %v5046_v22  ;;  %v4906_v12 = vadd.f32 %v4905_v39, %v4546_v33  ;;  %v4569_v30 = vmul.f32 %v9131_v50, %v9858_v10  ;;  %v9863_v50 = vld [vmem:[#allocation18_spill] sm:$0xff] }
 0x60d   : > { %v5177_v0 = vmax.f32 %v5161_v3, 0.0  ;;  %v5103_v46 = vmul.f32 0.015625, %v5027_v63  ;;  %v4886_v56 = vadd.f32 %v4885_v61, %v4553_v40  ;;  %v9859_v5 = vrot.slane %v9090_v44, 1  ;;  %v9867_v3 = vld [vmem:[#allocation24_spill] sm:$0xff]  ;;  %v9868_v61 = vld [vmem:[#allocation49_spill] sm:$0xff]  ;;  %v9875_v10 = vld [vmem:[#allocation22_spill] sm:$0xff] }
 0x60e   : > { %v5178_v29 = vmax.f32 %v5162_v43, 0.0  ;;  %v5104_v48 = vmul.f32 0.015625, %v5048_v57  ;;  %v4907_v17 = vadd.f32 %v4906_v12, %v4554_v62  ;;  %v4570_v34 = vmul.f32 %v9135_v53, %v9860_v31  ;;  %v9869_v62 = vld [vmem:[#allocation10_spill] sm:$0xff]  ;;  %v9870_v57 = vld [vmem:[#allocation51_spill] sm:$0xff] }
 0x60f   : > { %v5241_v25 = vadd.f32 1e-05, %v5177_v0  ;;  %v5159_v6 = vsub.f32 %v5103_v46, %v9859_v5  ;;  %v4887_v16 = vadd.f32 %v4886_v56, %v4561_v27  ;;  %v9861_v9 = vrot.slane %v9098_v52, 1  ;;  %v9865_v52 = vld [vmem:[#allocation16_spill] sm:$0xff] }
 0x610   : > { %v5242_v19 = vadd.f32 1e-05, %v5178_v29  ;;  %v4908_v22 = vadd.f32 %v4907_v17, %v4562_v35  ;;  %v4577_v36 = vmul.f32 %v9141_v18, %v9862_v59  ;;  %v4578_v28 = vmul.f32 %v9145_v15, %v9863_v50  ;;  %v9866_v18 = vld [vmem:[#allocation27_spill] sm:$0xff] }
 0x611   : > { %v5160_v45 = vsub.f32 %v5104_v48, %v9861_v9  ;;  %6627 = vrsqrt.f32 %v5241_v25  ;;  %v5175_v54 = vmax.f32 %v5159_v6, 0.0  ;;  %v4888_v60 = vadd.f32 %v4887_v16, %v4569_v30  ;;  %v9874_v48 = vld [vmem:[#allocation35_spill] sm:$0xff]  ;;  %v9876_v30 = vld [vmem:[#allocation38_spill] sm:$0xff] }
 0x612   : > { %6629 = vrsqrt.f32 %v5242_v19  ;;  %v4909_v47 = vadd.f32 %v4908_v22, %v4570_v34  ;;  %v4585_v53 = vmul.f32 %v9151_v41, %v9864_v11  ;;  %v4586_v21 = vmul.f32 %v9155_v4, %v9865_v52 }
 0x613   : > { %v5176_v44 = vmax.f32 %v5160_v45, 0.0  ;;  %v5239_v51 = vadd.f32 1e-05, %v5175_v54  ;;  %v4889_v33 = vadd.f32 %v4888_v60, %v4577_v36  ;;  %v4593_v1 = vmul.f32 %v9159_v14, %v9866_v18  ;;  %v9871_v14 = vld [vmem:[#allocation53_spill] sm:$0xff] }
 0x614   : > { %v4910_v39 = vadd.f32 %v4909_v47, %v4578_v28  ;;  %v4594_v15 = vmul.f32 %v9163_v37, %v9867_v3  ;;  %v4601_v41 = vmul.f32 %v9167_v32, %v9868_v61  ;;  %v4602_v43 = vmul.f32 %v9171_v49, %v9869_v62  ;;  %v9872_v37 = vld [vmem:[#allocation20_spill] sm:$0xff]  ;;  %v9873_v32 = vld [vmem:[#allocation55_spill] sm:$0xff]  ;;  %v9879_v36 = vld [vmem:[#allocation21_spill] sm:$0xff] }
 0x615   : > { %v5240_v7 = vadd.f32 1e-05, %v5176_v44  ;;  %6631 = vrsqrt.f32 %v5239_v51  ;;  %v4890_v40 = vadd.f32 %v4889_v33, %v4585_v53  ;;  %v4609_v12 = vmul.f32 %v9175_v20, %v9870_v57  ;;  %v9880_v33 = vld [vmem:[#allocation37_spill] sm:$0xff] }
 0x616   : > { %v4911_v63 = vadd.f32 %v4910_v39, %v4586_v21  ;;  %v4610_v27 = vmul.f32 %v9179_v58, %v9871_v14  ;;  %v4617_v56 = vmul.f32 %v9183_v26, %v9872_v37  ;;  %v4618_v29 = vmul.f32 %v9187_v8, %v9873_v32  ;;  %v9877_v58 = vld [vmem:[#allocation23_spill] sm:$0xff]  ;;  %v9881_v3 = vld [vmem:[#allocation9_spill] sm:$0xff] }
 0x617   : > { %6633 = vrsqrt.f32 %v5240_v7  ;;  %v4891_v2 = vadd.f32 %v4890_v40, %v4593_v1  ;;  %v4625_v20 = vmul.f32 %v9191_v38, %v9875_v10  ;;  %v4626_v6 = vmul.f32 %v9195_v55, %v9877_v58  ;;  %v9878_v8 = vld [vmem:[#allocation19_spill] sm:$0xff] }
 0x618   : > { %v4912_v4 = vadd.f32 %v4911_v63, %v4594_v15  ;;  %v5396_v15 = vrot.slane %v9881_v3, %v9880_v33 }
 0x619   : > { %v4892_v13 = vadd.f32 %v4891_v2, %v4601_v41 }
 0x61a   : > { %v4913_v0 = vadd.f32 %v4912_v4, %v4602_v43 }
 0x61b   : > { %v6628_v46 = vpop.eup %6627  ;;  %v4893_v23 = vadd.f32 %v4892_v13, %v4609_v12 }
 0x61c   : > { %v6630_v35 = vpop.eup %6629  ;;  %v5273_v49 = vmul.f32 %v6628_v46, %v9874_v48  ;;  %v4914_v17 = vadd.f32 %v4913_v0, %v4610_v27  ;;  %v9882_v46 = vld [vmem:[#allocation33_spill] sm:$0xff] }
 0x61d   : > { %v5274_v25 = vmul.f32 %v6630_v35, %v9876_v30  ;;  %v4894_v5 = vadd.f32 %v4893_v23, %v4617_v56  ;;  %v9883_v56 = vld [vmem:[#allocation36_spill] sm:$0xff] }
 0x61e   : > { %v5289_v16 = vmax.f32 %v5273_v49, 0.0  ;;  %v4915_v31 = vadd.f32 %v4914_v17, %v4618_v29  ;;  %v9885_v17 = vld [vmem:[#allocation39_spill] sm:$0xff] }
 0x61f   : > { %v6632_v26 = vpop.eup %6631  ;;  %v5290_v34 = vmax.f32 %v5274_v25, 0.0  ;;  %v4895_v19 = vadd.f32 %v4894_v5, %v4625_v20  ;;  %v5347_v10 = vrot.slane %v9885_v17, %v9880_v33 }
 0x620   : > { %v5271_v45 = vmul.f32 %v6632_v26, %v9878_v8  ;;  %v4916_v22 = vadd.f32 %v4915_v31, %v4626_v6 }
 0x621   : > { %v6634_v9 = vpop.eup %6633  ;;  %v5359_v59 = vcombine.low %v5289_v16, %v5290_v34  ;;  %v4896_v38 = vrot.slane %v4895_v19, 4 }
 0x622   : > { %v5272_v54 = vmul.f32 %v6634_v9, %v9879_v36  ;;  %v5287_v60 = vmax.f32 %v5271_v45, 0.0  ;;  %v4917_v50 = vrot.slane %v4916_v22, 4 }
 0x623   : > { %v4897_v44 = vadd.f32 %v4896_v38, %v4895_v19  ;;  %v5387_v21 = vrot.slane %v5359_v59, %v9880_v33 }
 0x624   : > { %v5288_v28 = vmax.f32 %v5272_v54, 0.0  ;;  %v4918_v55 = vadd.f32 %v4917_v50, %v4916_v22 }
 0x625   : > { %v4898_v11 = vrot.slane %v4897_v44, 2 }
 0x626   : > { %v5358_v47 = vcombine.low %v5287_v60, %v5288_v28  ;;  %v4919_v53 = vrot.slane %v4918_v55, 2 }
 0x627   : > { %v4899_v51 = vadd.f32 %v4898_v11, %v4897_v44 }
 0x628   : > { %v5380_v52 = vrot.slane %v5358_v47, %v9880_v33  ;;  %v4920_v7 = vadd.f32 %v4919_v53, %v4918_v55 }
 0x629   : > { %v4900_v39 = vrot.slane %v4899_v51, 1 }
 0x62a   : > { %v5389_v18 = vcombine.low %v5380_v52, %v5387_v21  ;;  %v4921_v1 = vrot.slane %v4920_v7, 1 }
 0x62b   : > { %v4901_v40 = vadd.f32 %v4900_v39, %v4899_v51 }
 0x62c   : > { %v5403_v63 = vrot.slane %v5389_v18, %v9880_v33  ;;  %v4922_v61 = vadd.f32 %v4921_v1, %v4920_v7 }
 0x62d   : > { %v5097_v41 = vmul.f32 0.015625, %v4901_v40 }
 0x62e   : > { %v5404_v2 = vcombine.low %v5396_v15, %v5403_v63  ;;  %v5098_v62 = vmul.f32 0.015625, %v4922_v61 }
 0x62f   : > { %v5153_v43 = vsub.f32 %v5097_v41, %v9200_v42 }
 0x630   : > { %5408 = vst [vmem:[%s208_s10 + $0x8] sm:$0xff] %v5404_v2  ;;  %v5154_v4 = vsub.f32 %v5098_v62, %v9204_v24  ;;  %v9884_v24 = vld [vmem:[#allocation30_spill] sm:$0xff] }
 0x631   : > { %v5169_v57 = vmax.f32 %v5153_v43, 0.0  ;;  %v5331_v29 = vrot.slane %v9884_v24, %v9880_v33 }
 0x632   : > { %v5170_v12 = vmax.f32 %v5154_v4, 0.0 }
 0x633   : > { %v5233_v13 = vadd.f32 1e-05, %v5169_v57 }
 0x634   : > { %v5234_v14 = vadd.f32 1e-05, %v5170_v12 }
 0x635   : > { %6635 = vrsqrt.f32 %v5233_v13 }
 0x636   : > { %6637 = vrsqrt.f32 %v5234_v14 }
 0x63f   : > { %v6636_v27 = vpop.eup %6635 }
 0x640   : > { %v6638_v0 = vpop.eup %6637  ;;  %v5265_v37 = vmul.f32 %v6636_v27, %v9882_v46 }
 0x641   : > { %v5266_v23 = vmul.f32 %v6638_v0, %v9883_v56 }
 0x642   : > { %v5281_v35 = vmax.f32 %v5265_v37, 0.0 }
 0x643   : > { %v5282_v42 = vmax.f32 %v5266_v23, 0.0 }
 0x645   : > { %v5310_v32 = vcombine.low %v5281_v35, %v5282_v42 }
 0x647   : > { %v5338_v48 = vrot.slane %v5310_v32, %v9880_v33 }
 0x649   : > { %v5340_v49 = vcombine.low %v5331_v29, %v5338_v48 }
 0x64b   : > { %v5354_v20 = vrot.slane %v5340_v49, %v9880_v33 }
 0x64d   : > { %v5355_v30 = vcombine.low %v5347_v10, %v5354_v20 }
 0x64f   : > { %5407 = vst [vmem:[%s208_s10] sm:$0xff] %v5355_v30 }
 0x650   : > { %6808 = shalt.err (!%p6805_p7)
}
 0x651   : > { %s6809_s5 = scalar_lea.hbm %s9304_s20, 256  ;;  %s6813_s27 = scalar_lea.hbm %s9355_s4, 512 }
 0x652   : > { %p6810_p8 = scmp.ne.s32.totalorder %s9304_s20, %s6809_s5  ;;  %p6814_p1 = scmp.lt.u32.totalorder %s9304_s20, %s9355_s4 }
 0x653   : > { %p6815_p0 = scmp.lt.u32.totalorder %s6813_s27, %s6809_s5  ;;  %p6817_p6 = scmp.lt.u32.totalorder %s6809_s5, %s9304_s20 }
 0x654   : > { %p6811_p11 = pnand %p6810_p8, %p9886_p9 }
 0x655   : > { %p6816_p5 = por %p6815_p0, %p6814_p1 }
 0x656   : > { %p6812_p13 = pneg %p6811_p11 }
 0x657   : > { %p6818_p10 = por %p6817_p6, %p6816_p5 }
 0x659   : > { %p6819_p12 = pnand %p6818_p10, %p6812_p13 }
 0x65b   : > { %6822 = shalt.err (!%p6819_p12)
}
 0x65c   : > { %s6869_s9 = smov 128   ;;  %s6870_s10 = smov 8  }
 0x65d   : > { %6547 = dma.vmem_to_hbm [thread:$0]  (%p9886_p9), %s9306_s12, 256, %s9304_s20, %s9310_s19, %s6869_s9, %s6869_s9, %s6870_s10  }
 0x65e PF: > { %p6559_p2 = scmp.ge.s32.totalorder %s6861_s18, 2  ;;  %s5439_s11 = sand.u32 1, %s6849_s15  }
 0x65f   : > { %p9887_p3 = scmp.ne.s32.totalorder %s9524_s26, 0  ;;  %s5440_s13 = scalar_lea.sflag [#allocation4], %s5439_s11 }
 0x661   : > { %p6554_p4 = pnand %p6559_p2, %p9887_p3 }
 0x663   : > { %6844 = dma.done.wait (!%p6554_p4), %s5440_s13, 256  }
 0x664   : > { %6846 = vsyncadd (!%p6554_p4), %s5440_s13, 4294967040  ;;  %p15_p7 = scmp.ge.s32.totalorder %s6921_s21, 4   ;;  %s9888_s15 = smov %s6853_s16 }
 0x665   : > { %s9889_s16 = smov %s6857_s17  ;;  %s9890_s17 = smov %s6932_s24 }
 0x666   : > { %s9891_s18 = smov %s6921_s21  ;;  %17 = sbr.rel (!%p15_p7) target bundleno = 4 (0x4), region = 76 }
 0x66d   :  { %5445 = vsyncpa [#allocation3], 1 }
 0x66e   :  { %5447 = vsyncpa [#allocation3 + $0x1], 1 }
 0x66f   :  { %5448 = vsyncpa [#allocation4], 1 }
 0x670   :  { %5450 = vsyncpa [#allocation4 + $0x1], 1 }

</bundles_post_ra>
